<compile_context>
chip_gen: v5e
topology: v5e:2x2
jax: 0.10.0
libtpu: 0.0.40
codegen_flags: <defaults>
</compile_context>

<pallas_src>
import functools

import jax
import jax.numpy as jnp
from jax import lax
from jax.experimental import pallas as pl
from jax.experimental.pallas import tpu as pltpu


def _lstm_gates(g, h_dim):
    """PyTorch LSTM gate order i, f, g, o.  One full-tile sigmoid (EUP) + one tanh."""
    sig = jax.nn.sigmoid(g)
    i_g = sig[:, 0 * h_dim:1 * h_dim]
    f_g = sig[:, 1 * h_dim:2 * h_dim]
    o_g = sig[:, 3 * h_dim:4 * h_dim]
    g_g = jnp.tanh(g[:, 2 * h_dim:3 * h_dim])
    return i_g, f_g, g_g, o_g


def multi_ed_lstm_kernel(
    # inputs (time-major, one batch tile)
    x_ref, mask_ref,
    # embed MLP
    we_ref, be_ref,
    # fused [encoder W_ih | attention W1] and its bias, attention layer 2
    w_ea_ref, b_ea_ref, wa2_ref, ba2_ref,
    # encoder LSTM recurrence
    whh_e_ref, h0e_ref, c0e_ref,
    # decoder LSTM: context projection, folded bias (b_dec + bo2*wih_d_p), t=0 fixup
    wih_dc_ref, b_decf_ref, g0corr_ref,
    # folded output head (wo2 @ wih_d_p) and decoder recurrence
    wfold_ref, whh_d_ref, h0d_ref, c0d_ref,
    # output MLP
    wo1_ref, bo1_ref, wo2_ref, bo2_ref,
    # output
    out_ref,
    # scratch
    gi_enc_scr, enc_scr, gi_dec_scr, ctx_scr, o1_scr,
    *, unroll: int,
):
    T, B, Din = x_ref.shape          # B is the (sublane-aligned) batch tile
    E = we_ref.shape[1]
    H = whh_e_ref.shape[0]
    H4 = 4 * H
    A = wa2_ref.shape[1]

    f32 = jnp.float32
    bf16 = jnp.bfloat16

    # ---- 1) Embedding MLP (Dropout == identity in eval); bf16 matmul, f32 accum ----
    x2 = x_ref[...].reshape(T * B, Din)                   # B multiple of 8 -> free view
    emb2 = jnp.maximum(
        jnp.dot(x2.astype(bf16), we_ref[...], preferred_element_type=f32)
        + be_ref[...], 0.0)                               # (T*B, E)

    # ---- 2) Fused wide matmul: [encoder input projection | attention hidden] --------
    fused = (jnp.dot(emb2.astype(bf16), w_ea_ref[...], preferred_element_type=f32)
             + b_ea_ref[...])                             # (T*B, 4H + E)
    gi_enc_scr[...] = fused[:, :H4].reshape(T, B, H4)     # emb @ W_ih_enc + b_enc
    a1 = jnp.maximum(fused[:, H4:], 0.0)                  # ReLU(emb @ Wa1 + ba1)

    # ---- 2b) Attention logits + softmax over TIME (torch dim=1) --------------------
    logits = (jnp.dot(a1.astype(bf16), wa2_ref[...], preferred_element_type=f32)
              + ba2_ref[...]).reshape(T, B, A)
    m = jnp.max(logits, axis=0, keepdims=True)
    e = jnp.exp(logits - m)
    attn = e * pl.reciprocal(jnp.sum(e, axis=0, keepdims=True), approx=True)  # (T,B,A)

    # ---- 3) Encoder LSTM: only the h @ W_hh recurrence stays on the serial path ----
    h0 = jnp.broadcast_to(h0e_ref[...], (B, H))
    c0 = jnp.broadcast_to(c0e_ref[...], (B, H))

    def enc_step(t, carry):
        h, c = carry
        g = (jnp.dot(h.astype(bf16), whh_e_ref[...], preferred_element_type=f32)
             + gi_enc_scr[t])
        i_g, f_g, g_g, o_g = _lstm_gates(g, H)
        c_new = f_g * c + i_g * g_g
        h_new = o_g * jnp.tanh(c_new)
        enc_scr[t] = h_new
        return (h_new, c_new)

    lax.fori_loop(0, T, enc_step, (h0, c0), unroll=unroll)

    # ---- 4) convolve(enc_out, attn): causal local attention, accumulate in place ---
    ctx_scr[...] = attn[:, :, 0:1] * enc_scr[...]
    for i in range(1, A):                                 # A (attn_len) is small & static
        if i < T:
            ctx_scr[pl.ds(i, T - i)] = (
                ctx_scr[pl.ds(i, T - i)]
                + attn[i:, :, i:i + 1] * enc_scr[pl.ds(0, T - i)])

    # ---- 5) Hoisted decoder context projection (+ folded output-head bias) ----------
    ctx2 = ctx_scr[...].reshape(T * B, H)
    gi_dec_scr[...] = (
        jnp.dot(ctx2.astype(bf16), wih_dc_ref[...], preferred_element_type=f32)
        + b_decf_ref[...]).reshape(T, B, H4)
    # t == 0 uses p_{-1} = tgt_init, not the folded o1@W_fold + bo2 path.
    gi_dec_scr[0] = gi_dec_scr[0] + g0corr_ref[...]

    # ---- 6) Decoder LSTM, autoregressive; output head folded off the serial chain ---
    hd = jnp.broadcast_to(h0d_ref[...], (B, H))
    cd = jnp.broadcast_to(c0d_ref[...], (B, H))
    o1_init = jnp.zeros((B, E), f32)                      # o1_{-1} contributes nothing

    def dec_step(t, carry):
        o1_prev, h, c = carry
        g = (jnp.dot(o1_prev.astype(bf16), wfold_ref[...], preferred_element_type=f32)
             + jnp.dot(h.astype(bf16), whh_d_ref[...], preferred_element_type=f32)
             + gi_dec_scr[t])
        i_g, f_g, g_g, o_g = _lstm_gates(g, H)
        c_new = f_g * c + i_g * g_g
        h_new = o_g * jnp.tanh(c_new)
        o1_new = jnp.maximum(
            jnp.dot(h_new.astype(bf16), wo1_ref[...], preferred_element_type=f32)
            + bo1_ref[...], 0.0)
        o1_scr[t] = o1_new
        return (o1_new, h_new, c_new)

    lax.fori_loop(0, T, dec_step, (o1_init, hd, cd), unroll=unroll)

    # ---- 7) Hoisted output head + mask, single fused store --------------------------
    o1_all = o1_scr[...].reshape(T * B, E)
    p_all = (jnp.dot(o1_all.astype(bf16), wo2_ref[...], preferred_element_type=f32)
             + bo2_ref[...])                              # (T*B, 1)
    out_ref[...] = p_all.reshape(T, B, 1) * mask_ref[...]


def _padded_vmem_bytes(shape, itemsize):
    """Rough (8, 128)-padded VMEM footprint for a buffer."""
    s = tuple(shape)
    if len(s) < 2:
        s = (1,) * (2 - len(s)) + s
    lead = 1
    for d in s[:-2]:
        lead *= d
    sub = -(-s[-2] // 8) * 8
    lane = -(-s[-1] // 128) * 128
    return lead * sub * lane * itemsize


def multi_ed_lstm_forward(x, mask, params, tgt_init=0.0, batch_tile=32):
    """x: (B, T, window_embed_size), mask: (B, T, 1).  Returns (B, T, 1) float32."""
    B, T, Din = x.shape
    E = params["we"].shape[1]
    H = params["whh_e"].shape[0]
    H4 = 4 * H
    A = params["wa2"].shape[1]

    # Batch tile: main tiling knob.  Clamp down for tiny batches so padding stays small.
    BT = max(8, min(int(batch_tile), ((B + 7) // 8) * 8))
    BT = (BT // 8) * 8
    Bp = ((B + BT - 1) // BT) * BT
    pad = Bp - B

    f32 = jnp.float32
    bf16 = jnp.bfloat16

    # Keep x/mask f32 on the wire: avoids bf16 sublane-packing hazards for the free
    # (T, BT, Din) <-> (T*BT, Din) views at BT == 8; casts happen once in-kernel.
    xf = x.astype(f32)
    mf = mask.astype(f32)
    if pad:
        xf = jnp.pad(xf, ((0, pad), (0, 0), (0, 0)))
        mf = jnp.pad(mf, ((0, pad), (0, 0), (0, 0)))

    x_tm = jnp.transpose(xf, (1, 0, 2))                   # (T, Bp, Din)
    mask_tm = jnp.transpose(mf, (1, 0, 2))                # (T, Bp, 1)

    # --- precompose / fold weights in the wrapper (f32), cast matmul weights to bf16 -
    wo2 = params["wo2"].astype(f32)                       # (E, 1)
    bo2 = params["bo2"].astype(f32)                       # (1, 1)
    wih_d_p = params["wih_d_p"].astype(f32)               # (1, 4H)
    w_fold = wo2 @ wih_d_p                                # (E, 4H)  = wo2 ⊗ wih_d_p
    b_dec_fold = params["b_dec"] + bo2[0, 0] * wih_d_p    # bias incl. folded bo2 term
    g0_corr = (float(tgt_init) - bo2[0, 0]) * wih_d_p     # fixup so t=0 sees tgt_init

    param_list = [
        params["we"].astype(bf16), params["be"].astype(f32),
        jnp.concatenate([params["wih_e"], params["wa1"]], axis=1).astype(bf16),
        jnp.concatenate([params["b_enc"], params["ba1"]], axis=1).astype(f32),
        params["wa2"].astype(bf16), params["ba2"].astype(f32),
        params["whh_e"].astype(bf16),
        params["enc_h0"].astype(f32), params["enc_c0"].astype(f32),
        params["wih_d_c"].astype(bf16), b_dec_fold.astype(f32), g0_corr.astype(f32),
        w_fold.astype(bf16), params["whh_d"].astype(bf16),
        params["dec_h0"].astype(f32), params["dec_c0"].astype(f32),
        params["wo1"].astype(bf16), params["bo1"].astype(f32),
        wo2.astype(bf16), bo2,
    ]

    def full_spec(p):
        nd = p.ndim
        return pl.BlockSpec(p.shape, lambda b, _nd=nd: (0,) * _nd)

    in_specs = (
        [pl.BlockSpec((T, BT, Din), lambda b: (0, b, 0)),
         pl.BlockSpec((T, BT, 1), lambda b: (0, b, 0))]
        + [full_spec(p) for p in param_list])

    out_spec = pl.BlockSpec((T, BT, 1), lambda b: (0, b, 0))

    scratch_shapes = [
        pltpu.VMEM((T, BT, H4), jnp.float32),             # encoder input-gate preacts
        pltpu.VMEM((T, BT, H), jnp.float32),              # encoder outputs
        pltpu.VMEM((T, BT, H4), jnp.float32),             # decoder input-gate preacts
        pltpu.VMEM((T, BT, H), jnp.float32),              # context
        pltpu.VMEM((T, BT, E), jnp.float32),              # decoder hidden->E activations
    ]

    # Full unroll for short sequences; partial unroll bounds vreg pressure for long T.
    unroll_steps = T if T <= 16 else 8

    # --- VMEM budget (scratch + double-buffered IO blocks + weights), capped for v7x -
    vmem_est = sum(_padded_vmem_bytes(s.shape, 4) for s in scratch_shapes)
    vmem_est += 2 * (_padded_vmem_bytes((T, BT, Din), 4)
                     + 2 * _padded_vmem_bytes((T, BT, 1), 4))
    vmem_est += 2 * sum(_padded_vmem_bytes(p.shape, p.dtype.itemsize)
                        for p in param_list)
    vmem_limit = int(min(64 * 1024 * 1024, max(32 * 1024 * 1024, (vmem_est * 3) // 2)))

    # --- Advisory cost estimate so XLA schedules surrounding pad/transpose ops well --
    flops = 2 * T * Bp * (Din * E + E * (H4 + E) + E * A        # embed, fused, attn2
                          + 3 * H * H4 + E * H4 + H * E + E)    # recurrences + heads
    transcendentals = T * Bp * (12 * H + A)
    bytes_accessed = (T * Bp * (Din + 2) * 4
                      + sum(p.size * p.dtype.itemsize for p in param_list))
    cost = pl.CostEstimate(flops=int(flops), transcendentals=int(transcendentals),
                           bytes_accessed=int(bytes_accessed))

    kernel = functools.partial(multi_ed_lstm_kernel, unroll=unroll_steps)

    out_tm = pl.pallas_call(
        kernel,
        out_shape=jax.ShapeDtypeStruct((T, Bp, 1), jnp.float32),
        grid=(Bp // BT,),                                  # batch tiles -> megacore on v7x
        in_specs=in_specs,
        out_specs=out_spec,
        scratch_shapes=scratch_shapes,
        compiler_params=pltpu.CompilerParams(
            dimension_semantics=("parallel",),
            vmem_limit_bytes=vmem_limit,
        ),
        cost_estimate=cost,
    )(x_tm, mask_tm, *param_list)

    return jnp.transpose(out_tm, (1, 0, 2))[:B]


# ---------------------------------------------------------------------------
# Pure-JAX reference (mirrors the PyTorch forward, eval mode, full lengths).
# ---------------------------------------------------------------------------
def reference_forward(x, mask, P, tgt_init=0.0):
    B, T, _ = x.shape
    H = P["whh_e"].shape[0]
    emb = jnp.maximum(x @ P["we"] + P["be"], 0.0)
    a1 = jnp.maximum(emb @ P["wa1"] + P["ba1"], 0.0)
    logits = a1 @ P["wa2"] + P["ba2"]
    attn = jax.nn.softmax(logits, axis=1)                 # softmax over time (dim=1)

    def lstm_step(x_t, h, c, wih, whh, b):
        g = x_t @ wih + h @ whh + b
        i = jax.nn.sigmoid(g[:, :H]); f = jax.nn.sigmoid(g[:, H:2 * H])
        gg = jnp.tanh(g[:, 2 * H:3 * H]); o = jax.nn.sigmoid(g[:, 3 * H:])
        c = f * c + i * gg
        h = o * jnp.tanh(c)
        return h, c

    h = jnp.broadcast_to(P["enc_h0"], (B, H)); c = jnp.broadcast_to(P["enc_c0"], (B, H))
    enc = []
    for t in range(T):
        h, c = lstm_step(emb[:, t, :], h, c, P["wih_e"], P["whh_e"], P["b_enc"])
        enc.append(h)
    enc = jnp.stack(enc, axis=1)                          # (B, T, H)

    A = attn.shape[-1]
    ctx = jnp.zeros_like(enc)
    for i in range(A):
        if i == 0:
            shifted = enc
        else:
            shifted = jnp.concatenate(
                [jnp.zeros((B, i, H), enc.dtype), enc[:, :T - i, :]], axis=1)
        ctx = ctx + attn[:, :, i:i + 1] * shifted

    wih_d = jnp.concatenate([P["wih_d_p"], P["wih_d_c"]], axis=0)
    h = jnp.broadcast_to(P["dec_h0"], (B, H)); c = jnp.broadcast_to(P["dec_c0"], (B, H))
    p = jnp.full((B, 1), tgt_init, jnp.float32)
    preds = []
    for t in range(T):
        inp = jnp.concatenate([p, ctx[:, t, :]], axis=1)
        h, c = lstm_step(inp, h, c, wih_d, P["whh_d"], P["b_dec"])
        o1 = jnp.maximum(h @ P["wo1"] + P["bo1"], 0.0)
        p = o1 @ P["wo2"] + P["bo2"]
        preds.append(p)
    pred = jnp.stack(preds, axis=1)                       # (B, T, 1)
    return pred * mask.astype(jnp.float32)


def init_params(key, window_embed_size, embed_dim, h_dim, attn_len):
    ks = list(jax.random.split(key, 20))
    u = lambda k, shape, s=0.1: jax.random.uniform(k, shape, jnp.float32, -s, s)
    H4 = 4 * h_dim
    params = {
        # embed: Linear(window_embed_size, embed_dim)
        "we": u(ks[0], (window_embed_size, embed_dim)),
        "be": u(ks[1], (1, embed_dim)),
        # attn: Linear(embed_dim, embed_dim), Linear(embed_dim, attn_len)
        "wa1": u(ks[2], (embed_dim, embed_dim)),
        "ba1": u(ks[3], (1, embed_dim)),
        "wa2": u(ks[4], (embed_dim, attn_len)),
        "ba2": u(ks[5], (1, attn_len)),
        # encoder LSTM (gate order i,f,g,o), bias = b_ih + b_hh combined
        "wih_e": u(ks[6], (embed_dim, H4)),
        "whh_e": u(ks[7], (h_dim, H4)),
        "b_enc": u(ks[8], (1, H4)) + u(ks[9], (1, H4)),
        "enc_h0": jnp.zeros((1, h_dim), jnp.float32),
        "enc_c0": jnp.zeros((1, h_dim), jnp.float32),
        # decoder LSTM, input dim = 1 + h_dim (split into p-row and context rows)
        "wih_d_p": u(ks[10], (1, H4)),
        "wih_d_c": u(ks[11], (h_dim, H4)),
        "whh_d": u(ks[12], (h_dim, H4)),
        "b_dec": u(ks[13], (1, H4)) + u(ks[14], (1, H4)),
        "dec_h0": jnp.zeros((1, h_dim), jnp.float32),
        "dec_c0": jnp.zeros((1, h_dim), jnp.float32),
        # out: Linear(h_dim, embed_dim), Linear(embed_dim, 1)
        "wo1": u(ks[15], (h_dim, embed_dim)),
        "bo1": u(ks[16], (1, embed_dim)),
        "wo2": u(ks[17], (embed_dim, 1)),
        "bo2": u(ks[18], (1, 1)),
    }
    return params


if __name__ == "__main__":
    # small shapes consistent with the module
    B, T = 2, 8
    window_embed_size, embed_dim, h_dim, attn_len = 16, 32, 32, 3

    key = jax.random.PRNGKey(0)
    kx, kp = jax.random.split(key)
    x = jax.random.normal(kx, (B, T, window_embed_size), jnp.float32)
    mask = jnp.ones((B, T, 1), jnp.float32)          # lengths == T for all rows
    params = init_params(kp, window_embed_size, embed_dim, h_dim, attn_len)

    out = multi_ed_lstm_forward(x, mask, params, tgt_init=0.0)
    out = jax.block_until_ready(out)

    ref = reference_forward(x, mask, params, tgt_init=0.0)
    assert out.shape == (B, T, 1)
    max_err = float(jnp.max(jnp.abs(out - ref)))
    assert jnp.allclose(out, ref, rtol=2e-2, atol=2e-2), f"max abs err {max_err}"

    print("KERNEL_OK")
</pallas_src>

<mosaic_0001>
module attributes {stable_mosaic.version = 11 : i64} {
  func.func @multi_ed_lstm_kernel(%arg0: i32, %arg1: memref<8x8x16xf32, #tpu.memory_space<vmem>>, %arg2: memref<8x8x1xf32, #tpu.memory_space<vmem>>, %arg3: memref<16x32xbf16, #tpu.memory_space<vmem>>, %arg4: memref<1x32xf32, #tpu.memory_space<vmem>>, %arg5: memref<32x160xbf16, #tpu.memory_space<vmem>>, %arg6: memref<1x160xf32, #tpu.memory_space<vmem>>, %arg7: memref<32x3xbf16, #tpu.memory_space<vmem>>, %arg8: memref<1x3xf32, #tpu.memory_space<vmem>>, %arg9: memref<32x128xbf16, #tpu.memory_space<vmem>>, %arg10: memref<1x32xf32, #tpu.memory_space<vmem>>, %arg11: memref<1x32xf32, #tpu.memory_space<vmem>>, %arg12: memref<32x128xbf16, #tpu.memory_space<vmem>>, %arg13: memref<1x128xf32, #tpu.memory_space<vmem>>, %arg14: memref<1x128xf32, #tpu.memory_space<vmem>>, %arg15: memref<32x128xbf16, #tpu.memory_space<vmem>>, %arg16: memref<32x128xbf16, #tpu.memory_space<vmem>>, %arg17: memref<1x32xf32, #tpu.memory_space<vmem>>, %arg18: memref<1x32xf32, #tpu.memory_space<vmem>>, %arg19: memref<32x32xbf16, #tpu.memory_space<vmem>>, %arg20: memref<1x32xf32, #tpu.memory_space<vmem>>, %arg21: memref<32x1xbf16, #tpu.memory_space<vmem>>, %arg22: memref<1x1xf32, #tpu.memory_space<vmem>>, %arg23: memref<8x8x1xf32, #tpu.memory_space<vmem>>, %arg24: memref<8x8x128xf32, #tpu.memory_space<vmem>>, %arg25: memref<8x8x32xf32, #tpu.memory_space<vmem>>, %arg26: memref<8x8x128xf32, #tpu.memory_space<vmem>>, %arg27: memref<8x8x32xf32, #tpu.memory_space<vmem>>, %arg28: memref<8x8x32xf32, #tpu.memory_space<vmem>>) attributes {dimension_semantics = [#tpu.dimension_semantics<parallel>], iteration_bounds = array<i64: 1>, scalar_prefetch = 0 : i64, scratch_operands = 5 : i64, tpu.core_type = #tpu.core_type<tc>, window_params = [{transform_indices = @transform_0, window_bounds = array<i64: 8, 8, 16>}, {transform_indices = @transform_1, window_bounds = array<i64: 8, 8, 1>}, {pipeline_mode = #tpu.pipeline_mode<synchronous>, transform_indices = @transform_2, window_bounds = array<i64: 16, 32>}, {pipeline_mode = #tpu.pipeline_mode<synchronous>, transform_indices = @transform_3, window_bounds = array<i64: 1, 32>}, {pipeline_mode = #tpu.pipeline_mode<synchronous>, transform_indices = @transform_4, window_bounds = array<i64: 32, 160>}, {pipeline_mode = #tpu.pipeline_mode<synchronous>, transform_indices = @transform_5, window_bounds = array<i64: 1, 160>}, {pipeline_mode = #tpu.pipeline_mode<synchronous>, transform_indices = @transform_6, window_bounds = array<i64: 32, 3>}, {pipeline_mode = #tpu.pipeline_mode<synchronous>, transform_indices = @transform_7, window_bounds = array<i64: 1, 3>}, {pipeline_mode = #tpu.pipeline_mode<synchronous>, transform_indices = @transform_8, window_bounds = array<i64: 32, 128>}, {pipeline_mode = #tpu.pipeline_mode<synchronous>, transform_indices = @transform_9, window_bounds = array<i64: 1, 32>}, {pipeline_mode = #tpu.pipeline_mode<synchronous>, transform_indices = @transform_10, window_bounds = array<i64: 1, 32>}, {pipeline_mode = #tpu.pipeline_mode<synchronous>, transform_indices = @transform_11, window_bounds = array<i64: 32, 128>}, {pipeline_mode = #tpu.pipeline_mode<synchronous>, transform_indices = @transform_12, window_bounds = array<i64: 1, 128>}, {pipeline_mode = #tpu.pipeline_mode<synchronous>, transform_indices = @transform_13, window_bounds = array<i64: 1, 128>}, {pipeline_mode = #tpu.pipeline_mode<synchronous>, transform_indices = @transform_14, window_bounds = array<i64: 32, 128>}, {pipeline_mode = #tpu.pipeline_mode<synchronous>, transform_indices = @transform_15, window_bounds = array<i64: 32, 128>}, {pipeline_mode = #tpu.pipeline_mode<synchronous>, transform_indices = @transform_16, window_bounds = array<i64: 1, 32>}, {pipeline_mode = #tpu.pipeline_mode<synchronous>, transform_indices = @transform_17, window_bounds = array<i64: 1, 32>}, {pipeline_mode = #tpu.pipeline_mode<synchronous>, transform_indices = @transform_18, window_bounds = array<i64: 32, 32>}, {pipeline_mode = #tpu.pipeline_mode<synchronous>, transform_indices = @transform_19, window_bounds = array<i64: 1, 32>}, {pipeline_mode = #tpu.pipeline_mode<synchronous>, transform_indices = @transform_20, window_bounds = array<i64: 32, 1>}, {pipeline_mode = #tpu.pipeline_mode<synchronous>, transform_indices = @transform_21, window_bounds = array<i64: 1, 1>}, {transform_indices = @transform_22, window_bounds = array<i64: 8, 8, 1>}]} {
    %c0 = arith.constant 0 : index
    %c0_0 = arith.constant 0 : index
    %c0_1 = arith.constant 0 : index
    %0 = vector.load %arg1[%c0, %c0_0, %c0_1] : memref<8x8x16xf32, #tpu.memory_space<vmem>>, vector<8x8x16xf32>
    %1 = vector.shape_cast %0 : vector<8x8x16xf32> to vector<64x16xf32>
    %2 = arith.truncf %1 : vector<64x16xf32> to vector<64x16xbf16>
    %c0_2 = arith.constant 0 : index
    %c0_3 = arith.constant 0 : index
    %3 = vector.load %arg3[%c0_2, %c0_3] : memref<16x32xbf16, #tpu.memory_space<vmem>>, vector<16x32xbf16>
    %cst = arith.constant dense<0.000000e+00> : vector<64x32xf32>
    %4 = tpu.matmul %2, %3, %cst {dimension_numbers = #tpu.dot_dimension_numbers<[1], [0], [0], [1], [0, 0, 1, 1], [], []>} : vector<64x16xbf16>, vector<16x32xbf16>, vector<64x32xf32> -> vector<64x32xf32>
    %c0_4 = arith.constant 0 : index
    %c0_5 = arith.constant 0 : index
    %5 = vector.load %arg4[%c0_4, %c0_5] : memref<1x32xf32, #tpu.memory_space<vmem>>, vector<1x32xf32>
    %6 = vector.broadcast %5 : vector<1x32xf32> to vector<64x32xf32>
    %7 = arith.addf %4, %6 : vector<64x32xf32>
    %cst_6 = arith.constant 0.000000e+00 : f32
    %8 = vector.broadcast %cst_6 : f32 to vector<64x32xf32>
    %9 = arith.maximumf %7, %8 : vector<64x32xf32>
    %10 = arith.truncf %9 : vector<64x32xf32> to vector<64x32xbf16>
    %c0_7 = arith.constant 0 : index
    %c0_8 = arith.constant 0 : index
    %11 = vector.load %arg5[%c0_7, %c0_8] : memref<32x160xbf16, #tpu.memory_space<vmem>>, vector<32x160xbf16>
    %cst_9 = arith.constant dense<0.000000e+00> : vector<64x160xf32>
    %12 = tpu.matmul %10, %11, %cst_9 {dimension_numbers = #tpu.dot_dimension_numbers<[1], [0], [0], [1], [0, 0, 1, 1], [], []>} : vector<64x32xbf16>, vector<32x160xbf16>, vector<64x160xf32> -> vector<64x160xf32>
    %c0_10 = arith.constant 0 : index
    %c0_11 = arith.constant 0 : index
    %13 = vector.load %arg6[%c0_10, %c0_11] : memref<1x160xf32, #tpu.memory_space<vmem>>, vector<1x160xf32>
    %14 = vector.broadcast %13 : vector<1x160xf32> to vector<64x160xf32>
    %15 = arith.addf %12, %14 : vector<64x160xf32>
    %16 = vector.extract_strided_slice %15 {offsets = [0, 0], sizes = [64, 128], strides = [1, 1]} : vector<64x160xf32> to vector<64x128xf32>
    %17 = vector.shape_cast %16 : vector<64x128xf32> to vector<8x8x128xf32>
    %c0_12 = arith.constant 0 : index
    %c0_13 = arith.constant 0 : index
    %c0_14 = arith.constant 0 : index
    %18 = vector.load %arg24[%c0_12, %c0_13, %c0_14] : memref<8x8x128xf32, #tpu.memory_space<vmem>>, vector<8x8x128xf32>
    tpu.vector_store %arg24[%c0_12, %c0_13, %c0_14], %17 {strides = array<i32>} : memref<8x8x128xf32, #tpu.memory_space<vmem>>, vector<8x8x128xf32>,
    %19 = vector.extract_strided_slice %15 {offsets = [0, 128], sizes = [64, 32], strides = [1, 1]} : vector<64x160xf32> to vector<64x32xf32>
    %cst_15 = arith.constant 0.000000e+00 : f32
    %20 = vector.broadcast %cst_15 : f32 to vector<64x32xf32>
    %21 = arith.maximumf %19, %20 : vector<64x32xf32>
    %22 = arith.truncf %21 : vector<64x32xf32> to vector<64x32xbf16>
    %c0_16 = arith.constant 0 : index
    %c0_17 = arith.constant 0 : index
    %23 = vector.load %arg7[%c0_16, %c0_17] : memref<32x3xbf16, #tpu.memory_space<vmem>>, vector<32x3xbf16>
    %cst_18 = arith.constant dense<0.000000e+00> : vector<64x3xf32>
    %24 = tpu.matmul %22, %23, %cst_18 {dimension_numbers = #tpu.dot_dimension_numbers<[1], [0], [0], [1], [0, 0, 1, 1], [], []>} : vector<64x32xbf16>, vector<32x3xbf16>, vector<64x3xf32> -> vector<64x3xf32>
    %c0_19 = arith.constant 0 : index
    %c0_20 = arith.constant 0 : index
    %25 = vector.load %arg8[%c0_19, %c0_20] : memref<1x3xf32, #tpu.memory_space<vmem>>, vector<1x3xf32>
    %26 = vector.broadcast %25 : vector<1x3xf32> to vector<64x3xf32>
    %27 = arith.addf %24, %26 : vector<64x3xf32>
    %28 = vector.shape_cast %27 : vector<64x3xf32> to vector<8x8x3xf32>
    %cst_21 = arith.constant dense<0xFF800000> : vector<8x3xf32>
    %29 = vector.multi_reduction <maximumf>, %28, %cst_21 [0] : vector<8x8x3xf32> to vector<8x3xf32>
    %30 = vector.shape_cast %29 : vector<8x3xf32> to vector<1x8x3xf32>
    %31 = vector.broadcast %30 : vector<1x8x3xf32> to vector<8x8x3xf32>
    %32 = arith.subf %28, %31 : vector<8x8x3xf32>
    %33 = math.exp %32 : vector<8x8x3xf32>
    %cst_22 = arith.constant dense<0.000000e+00> : vector<8x3xf32>
    %34 = vector.multi_reduction <add>, %33, %cst_22 [0] : vector<8x8x3xf32> to vector<8x3xf32>
    %35 = vector.shape_cast %34 : vector<8x3xf32> to vector<1x8x3xf32>
    %36 = tpu.reciprocal %35 {approx = true} : vector<1x8x3xf32> -> vector<1x8x3xf32>
    %37 = vector.broadcast %36 : vector<1x8x3xf32> to vector<8x8x3xf32>
    %38 = arith.mulf %33, %37 : vector<8x8x3xf32>
    %c0_23 = arith.constant 0 : index
    %c0_24 = arith.constant 0 : index
    %39 = vector.load %arg10[%c0_23, %c0_24] : memref<1x32xf32, #tpu.memory_space<vmem>>, vector<1x32xf32>
    %40 = vector.shape_cast %39 : vector<1x32xf32> to vector<1x32xf32>
    %41 = vector.broadcast %40 : vector<1x32xf32> to vector<8x32xf32>
    %c0_25 = arith.constant 0 : index
    %c0_26 = arith.constant 0 : index
    %42 = vector.load %arg11[%c0_25, %c0_26] : memref<1x32xf32, #tpu.memory_space<vmem>>, vector<1x32xf32>
    %43 = vector.shape_cast %42 : vector<1x32xf32> to vector<1x32xf32>
    %44 = vector.broadcast %43 : vector<1x32xf32> to vector<8x32xf32>
    %c0_i32 = arith.constant 0 : i32
    %45 = arith.truncf %41 : vector<8x32xf32> to vector<8x32xbf16>
    %c0_27 = arith.constant 0 : index
    %c0_28 = arith.constant 0 : index
    %46 = vector.load %arg9[%c0_27, %c0_28] : memref<32x128xbf16, #tpu.memory_space<vmem>>, vector<32x128xbf16>
    %cst_29 = arith.constant dense<0.000000e+00> : vector<8x128xf32>
    %47 = tpu.matmul %45, %46, %cst_29 {dimension_numbers = #tpu.dot_dimension_numbers<[1], [0], [0], [1], [0, 0, 1, 1], [], []>} : vector<8x32xbf16>, vector<32x128xbf16>, vector<8x128xf32> -> vector<8x128xf32>
    %48 = arith.index_cast %c0_i32 : i32 to index
    %c0_30 = arith.constant 0 : index
    %c0_31 = arith.constant 0 : index
    %49 = vector.load %arg24[%48, %c0_30, %c0_31] : memref<8x8x128xf32, #tpu.memory_space<vmem>>, vector<1x8x128xf32>
    %50 = vector.shape_cast %49 : vector<1x8x128xf32> to vector<8x128xf32>
    %51 = arith.addf %47, %50 : vector<8x128xf32>
    %52 = arith.negf %51 : vector<8x128xf32>
    %53 = math.exp %52 : vector<8x128xf32>
    %cst_32 = arith.constant 1.000000e+00 : f32
    %54 = vector.broadcast %cst_32 : f32 to vector<8x128xf32>
    %55 = arith.addf %54, %53 : vector<8x128xf32>
    %56 = arith.divf %54, %55 : vector<8x128xf32>
    %57 = vector.extract_strided_slice %56 {offsets = [0, 0], sizes = [8, 32], strides = [1, 1]} : vector<8x128xf32> to vector<8x32xf32>
    %58 = vector.extract_strided_slice %56 {offsets = [0, 32], sizes = [8, 32], strides = [1, 1]} : vector<8x128xf32> to vector<8x32xf32>
    %59 = vector.extract_strided_slice %56 {offsets = [0, 96], sizes = [8, 32], strides = [1, 1]} : vector<8x128xf32> to vector<8x32xf32>
    %60 = vector.extract_strided_slice %51 {offsets = [0, 64], sizes = [8, 32], strides = [1, 1]} : vector<8x128xf32> to vector<8x32xf32>
    %61 = math.tanh %60 : vector<8x32xf32>
    %62 = arith.mulf %58, %44 : vector<8x32xf32>
    %63 = arith.mulf %57, %61 : vector<8x32xf32>
    %64 = arith.addf %62, %63 : vector<8x32xf32>
    %65 = math.tanh %64 : vector<8x32xf32>
    %66 = arith.mulf %59, %65 : vector<8x32xf32>
    %67 = arith.index_cast %c0_i32 : i32 to index
    %c0_33 = arith.constant 0 : index
    %c0_34 = arith.constant 0 : index
    %68 = vector.load %arg25[%67, %c0_33, %c0_34] : memref<8x8x32xf32, #tpu.memory_space<vmem>>, vector<1x8x32xf32>
    %69 = vector.shape_cast %68 : vector<1x8x32xf32> to vector<8x32xf32>
    %70 = vector.shape_cast %66 : vector<8x32xf32> to vector<1x8x32xf32>
    tpu.vector_store %arg25[%67, %c0_33, %c0_34], %70 {strides = array<i32>} : memref<8x8x32xf32, #tpu.memory_space<vmem>>, vector<1x8x32xf32>,
    %c1_i32 = arith.constant 1 : i32
    %71 = arith.truncf %66 : vector<8x32xf32> to vector<8x32xbf16>
    %c0_35 = arith.constant 0 : index
    %c0_36 = arith.constant 0 : index
    %72 = vector.load %arg9[%c0_35, %c0_36] : memref<32x128xbf16, #tpu.memory_space<vmem>>, vector<32x128xbf16>
    %cst_37 = arith.constant dense<0.000000e+00> : vector<8x128xf32>
    %73 = tpu.matmul %71, %72, %cst_37 {dimension_numbers = #tpu.dot_dimension_numbers<[1], [0], [0], [1], [0, 0, 1, 1], [], []>} : vector<8x32xbf16>, vector<32x128xbf16>, vector<8x128xf32> -> vector<8x128xf32>
    %74 = arith.index_cast %c1_i32 : i32 to index
    %c0_38 = arith.constant 0 : index
    %c0_39 = arith.constant 0 : index
    %75 = vector.load %arg24[%74, %c0_38, %c0_39] : memref<8x8x128xf32, #tpu.memory_space<vmem>>, vector<1x8x128xf32>
    %76 = vector.shape_cast %75 : vector<1x8x128xf32> to vector<8x128xf32>
    %77 = arith.addf %73, %76 : vector<8x128xf32>
    %78 = arith.negf %77 : vector<8x128xf32>
    %79 = math.exp %78 : vector<8x128xf32>
    %cst_40 = arith.constant 1.000000e+00 : f32
    %80 = vector.broadcast %cst_40 : f32 to vector<8x128xf32>
    %81 = arith.addf %80, %79 : vector<8x128xf32>
    %82 = arith.divf %80, %81 : vector<8x128xf32>
    %83 = vector.extract_strided_slice %82 {offsets = [0, 0], sizes = [8, 32], strides = [1, 1]} : vector<8x128xf32> to vector<8x32xf32>
    %84 = vector.extract_strided_slice %82 {offsets = [0, 32], sizes = [8, 32], strides = [1, 1]} : vector<8x128xf32> to vector<8x32xf32>
    %85 = vector.extract_strided_slice %82 {offsets = [0, 96], sizes = [8, 32], strides = [1, 1]} : vector<8x128xf32> to vector<8x32xf32>
    %86 = vector.extract_strided_slice %77 {offsets = [0, 64], sizes = [8, 32], strides = [1, 1]} : vector<8x128xf32> to vector<8x32xf32>
    %87 = math.tanh %86 : vector<8x32xf32>
    %88 = arith.mulf %84, %64 : vector<8x32xf32>
    %89 = arith.mulf %83, %87 : vector<8x32xf32>
    %90 = arith.addf %88, %89 : vector<8x32xf32>
    %91 = math.tanh %90 : vector<8x32xf32>
    %92 = arith.mulf %85, %91 : vector<8x32xf32>
    %93 = arith.index_cast %c1_i32 : i32 to index
    %c0_41 = arith.constant 0 : index
    %c0_42 = arith.constant 0 : index
    %94 = vector.load %arg25[%93, %c0_41, %c0_42] : memref<8x8x32xf32, #tpu.memory_space<vmem>>, vector<1x8x32xf32>
    %95 = vector.shape_cast %94 : vector<1x8x32xf32> to vector<8x32xf32>
    %96 = vector.shape_cast %92 : vector<8x32xf32> to vector<1x8x32xf32>
    tpu.vector_store %arg25[%93, %c0_41, %c0_42], %96 {strides = array<i32>} : memref<8x8x32xf32, #tpu.memory_space<vmem>>, vector<1x8x32xf32>,
    %c2_i32 = arith.constant 2 : i32
    %97 = arith.truncf %92 : vector<8x32xf32> to vector<8x32xbf16>
    %c0_43 = arith.constant 0 : index
    %c0_44 = arith.constant 0 : index
    %98 = vector.load %arg9[%c0_43, %c0_44] : memref<32x128xbf16, #tpu.memory_space<vmem>>, vector<32x128xbf16>
    %cst_45 = arith.constant dense<0.000000e+00> : vector<8x128xf32>
    %99 = tpu.matmul %97, %98, %cst_45 {dimension_numbers = #tpu.dot_dimension_numbers<[1], [0], [0], [1], [0, 0, 1, 1], [], []>} : vector<8x32xbf16>, vector<32x128xbf16>, vector<8x128xf32> -> vector<8x128xf32>
    %100 = arith.index_cast %c2_i32 : i32 to index
    %c0_46 = arith.constant 0 : index
    %c0_47 = arith.constant 0 : index
    %101 = vector.load %arg24[%100, %c0_46, %c0_47] : memref<8x8x128xf32, #tpu.memory_space<vmem>>, vector<1x8x128xf32>
    %102 = vector.shape_cast %101 : vector<1x8x128xf32> to vector<8x128xf32>
    %103 = arith.addf %99, %102 : vector<8x128xf32>
    %104 = arith.negf %103 : vector<8x128xf32>
    %105 = math.exp %104 : vector<8x128xf32>
    %cst_48 = arith.constant 1.000000e+00 : f32
    %106 = vector.broadcast %cst_48 : f32 to vector<8x128xf32>
    %107 = arith.addf %106, %105 : vector<8x128xf32>
    %108 = arith.divf %106, %107 : vector<8x128xf32>
    %109 = vector.extract_strided_slice %108 {offsets = [0, 0], sizes = [8, 32], strides = [1, 1]} : vector<8x128xf32> to vector<8x32xf32>
    %110 = vector.extract_strided_slice %108 {offsets = [0, 32], sizes = [8, 32], strides = [1, 1]} : vector<8x128xf32> to vector<8x32xf32>
    %111 = vector.extract_strided_slice %108 {offsets = [0, 96], sizes = [8, 32], strides = [1, 1]} : vector<8x128xf32> to vector<8x32xf32>
    %112 = vector.extract_strided_slice %103 {offsets = [0, 64], sizes = [8, 32], strides = [1, 1]} : vector<8x128xf32> to vector<8x32xf32>
    %113 = math.tanh %112 : vector<8x32xf32>
    %114 = arith.mulf %110, %90 : vector<8x32xf32>
    %115 = arith.mulf %109, %113 : vector<8x32xf32>
    %116 = arith.addf %114, %115 : vector<8x32xf32>
    %117 = math.tanh %116 : vector<8x32xf32>
    %118 = arith.mulf %111, %117 : vector<8x32xf32>
    %119 = arith.index_cast %c2_i32 : i32 to index
    %c0_49 = arith.constant 0 : index
    %c0_50 = arith.constant 0 : index
    %120 = vector.load %arg25[%119, %c0_49, %c0_50] : memref<8x8x32xf32, #tpu.memory_space<vmem>>, vector<1x8x32xf32>
    %121 = vector.shape_cast %120 : vector<1x8x32xf32> to vector<8x32xf32>
    %122 = vector.shape_cast %118 : vector<8x32xf32> to vector<1x8x32xf32>
    tpu.vector_store %arg25[%119, %c0_49, %c0_50], %122 {strides = array<i32>} : memref<8x8x32xf32, #tpu.memory_space<vmem>>, vector<1x8x32xf32>,
    %c3_i32 = arith.constant 3 : i32
    %123 = arith.truncf %118 : vector<8x32xf32> to vector<8x32xbf16>
    %c0_51 = arith.constant 0 : index
    %c0_52 = arith.constant 0 : index
    %124 = vector.load %arg9[%c0_51, %c0_52] : memref<32x128xbf16, #tpu.memory_space<vmem>>, vector<32x128xbf16>
    %cst_53 = arith.constant dense<0.000000e+00> : vector<8x128xf32>
    %125 = tpu.matmul %123, %124, %cst_53 {dimension_numbers = #tpu.dot_dimension_numbers<[1], [0], [0], [1], [0, 0, 1, 1], [], []>} : vector<8x32xbf16>, vector<32x128xbf16>, vector<8x128xf32> -> vector<8x128xf32>
    %126 = arith.index_cast %c3_i32 : i32 to index
    %c0_54 = arith.constant 0 : index
    %c0_55 = arith.constant 0 : index
    %127 = vector.load %arg24[%126, %c0_54, %c0_55] : memref<8x8x128xf32, #tpu.memory_space<vmem>>, vector<1x8x128xf32>
    %128 = vector.shape_cast %127 : vector<1x8x128xf32> to vector<8x128xf32>
    %129 = arith.addf %125, %128 : vector<8x128xf32>
    %130 = arith.negf %129 : vector<8x128xf32>
    %131 = math.exp %130 : vector<8x128xf32>
    %cst_56 = arith.constant 1.000000e+00 : f32
    %132 = vector.broadcast %cst_56 : f32 to vector<8x128xf32>
    %133 = arith.addf %132, %131 : vector<8x128xf32>
    %134 = arith.divf %132, %133 : vector<8x128xf32>
    %135 = vector.extract_strided_slice %134 {offsets = [0, 0], sizes = [8, 32], strides = [1, 1]} : vector<8x128xf32> to vector<8x32xf32>
    %136 = vector.extract_strided_slice %134 {offsets = [0, 32], sizes = [8, 32], strides = [1, 1]} : vector<8x128xf32> to vector<8x32xf32>
    %137 = vector.extract_strided_slice %134 {offsets = [0, 96], sizes = [8, 32], strides = [1, 1]} : vector<8x128xf32> to vector<8x32xf32>
    %138 = vector.extract_strided_slice %129 {offsets = [0, 64], sizes = [8, 32], strides = [1, 1]} : vector<8x128xf32> to vector<8x32xf32>
    %139 = math.tanh %138 : vector<8x32xf32>
    %140 = arith.mulf %136, %116 : vector<8x32xf32>
    %141 = arith.mulf %135, %139 : vector<8x32xf32>
    %142 = arith.addf %140, %141 : vector<8x32xf32>
    %143 = math.tanh %142 : vector<8x32xf32>
    %144 = arith.mulf %137, %143 : vector<8x32xf32>
    %145 = arith.index_cast %c3_i32 : i32 to index
    %c0_57 = arith.constant 0 : index
    %c0_58 = arith.constant 0 : index
    %146 = vector.load %arg25[%145, %c0_57, %c0_58] : memref<8x8x32xf32, #tpu.memory_space<vmem>>, vector<1x8x32xf32>
    %147 = vector.shape_cast %146 : vector<1x8x32xf32> to vector<8x32xf32>
    %148 = vector.shape_cast %144 : vector<8x32xf32> to vector<1x8x32xf32>
    tpu.vector_store %arg25[%145, %c0_57, %c0_58], %148 {strides = array<i32>} : memref<8x8x32xf32, #tpu.memory_space<vmem>>, vector<1x8x32xf32>,
    %c4_i32 = arith.constant 4 : i32
    %149 = arith.truncf %144 : vector<8x32xf32> to vector<8x32xbf16>
    %c0_59 = arith.constant 0 : index
    %c0_60 = arith.constant 0 : index
    %150 = vector.load %arg9[%c0_59, %c0_60] : memref<32x128xbf16, #tpu.memory_space<vmem>>, vector<32x128xbf16>
    %cst_61 = arith.constant dense<0.000000e+00> : vector<8x128xf32>
    %151 = tpu.matmul %149, %150, %cst_61 {dimension_numbers = #tpu.dot_dimension_numbers<[1], [0], [0], [1], [0, 0, 1, 1], [], []>} : vector<8x32xbf16>, vector<32x128xbf16>, vector<8x128xf32> -> vector<8x128xf32>
    %152 = arith.index_cast %c4_i32 : i32 to index
    %c0_62 = arith.constant 0 : index
    %c0_63 = arith.constant 0 : index
    %153 = vector.load %arg24[%152, %c0_62, %c0_63] : memref<8x8x128xf32, #tpu.memory_space<vmem>>, vector<1x8x128xf32>
    %154 = vector.shape_cast %153 : vector<1x8x128xf32> to vector<8x128xf32>
    %155 = arith.addf %151, %154 : vector<8x128xf32>
    %156 = arith.negf %155 : vector<8x128xf32>
    %157 = math.exp %156 : vector<8x128xf32>
    %cst_64 = arith.constant 1.000000e+00 : f32
    %158 = vector.broadcast %cst_64 : f32 to vector<8x128xf32>
    %159 = arith.addf %158, %157 : vector<8x128xf32>
    %160 = arith.divf %158, %159 : vector<8x128xf32>
    %161 = vector.extract_strided_slice %160 {offsets = [0, 0], sizes = [8, 32], strides = [1, 1]} : vector<8x128xf32> to vector<8x32xf32>
    %162 = vector.extract_strided_slice %160 {offsets = [0, 32], sizes = [8, 32], strides = [1, 1]} : vector<8x128xf32> to vector<8x32xf32>
    %163 = vector.extract_strided_slice %160 {offsets = [0, 96], sizes = [8, 32], strides = [1, 1]} : vector<8x128xf32> to vector<8x32xf32>
    %164 = vector.extract_strided_slice %155 {offsets = [0, 64], sizes = [8, 32], strides = [1, 1]} : vector<8x128xf32> to vector<8x32xf32>
    %165 = math.tanh %164 : vector<8x32xf32>
    %166 = arith.mulf %162, %142 : vector<8x32xf32>
    %167 = arith.mulf %161, %165 : vector<8x32xf32>
    %168 = arith.addf %166, %167 : vector<8x32xf32>
    %169 = math.tanh %168 : vector<8x32xf32>
    %170 = arith.mulf %163, %169 : vector<8x32xf32>
    %171 = arith.index_cast %c4_i32 : i32 to index
    %c0_65 = arith.constant 0 : index
    %c0_66 = arith.constant 0 : index
    %172 = vector.load %arg25[%171, %c0_65, %c0_66] : memref<8x8x32xf32, #tpu.memory_space<vmem>>, vector<1x8x32xf32>
    %173 = vector.shape_cast %172 : vector<1x8x32xf32> to vector<8x32xf32>
    %174 = vector.shape_cast %170 : vector<8x32xf32> to vector<1x8x32xf32>
    tpu.vector_store %arg25[%171, %c0_65, %c0_66], %174 {strides = array<i32>} : memref<8x8x32xf32, #tpu.memory_space<vmem>>, vector<1x8x32xf32>,
    %c5_i32 = arith.constant 5 : i32
    %175 = arith.truncf %170 : vector<8x32xf32> to vector<8x32xbf16>
    %c0_67 = arith.constant 0 : index
    %c0_68 = arith.constant 0 : index
    %176 = vector.load %arg9[%c0_67, %c0_68] : memref<32x128xbf16, #tpu.memory_space<vmem>>, vector<32x128xbf16>
    %cst_69 = arith.constant dense<0.000000e+00> : vector<8x128xf32>
    %177 = tpu.matmul %175, %176, %cst_69 {dimension_numbers = #tpu.dot_dimension_numbers<[1], [0], [0], [1], [0, 0, 1, 1], [], []>} : vector<8x32xbf16>, vector<32x128xbf16>, vector<8x128xf32> -> vector<8x128xf32>
    %178 = arith.index_cast %c5_i32 : i32 to index
    %c0_70 = arith.constant 0 : index
    %c0_71 = arith.constant 0 : index
    %179 = vector.load %arg24[%178, %c0_70, %c0_71] : memref<8x8x128xf32, #tpu.memory_space<vmem>>, vector<1x8x128xf32>
    %180 = vector.shape_cast %179 : vector<1x8x128xf32> to vector<8x128xf32>
    %181 = arith.addf %177, %180 : vector<8x128xf32>
    %182 = arith.negf %181 : vector<8x128xf32>
    %183 = math.exp %182 : vector<8x128xf32>
    %cst_72 = arith.constant 1.000000e+00 : f32
    %184 = vector.broadcast %cst_72 : f32 to vector<8x128xf32>
    %185 = arith.addf %184, %183 : vector<8x128xf32>
    %186 = arith.divf %184, %185 : vector<8x128xf32>
    %187 = vector.extract_strided_slice %186 {offsets = [0, 0], sizes = [8, 32], strides = [1, 1]} : vector<8x128xf32> to vector<8x32xf32>
    %188 = vector.extract_strided_slice %186 {offsets = [0, 32], sizes = [8, 32], strides = [1, 1]} : vector<8x128xf32> to vector<8x32xf32>
    %189 = vector.extract_strided_slice %186 {offsets = [0, 96], sizes = [8, 32], strides = [1, 1]} : vector<8x128xf32> to vector<8x32xf32>
    %190 = vector.extract_strided_slice %181 {offsets = [0, 64], sizes = [8, 32], strides = [1, 1]} : vector<8x128xf32> to vector<8x32xf32>
    %191 = math.tanh %190 : vector<8x32xf32>
    %192 = arith.mulf %188, %168 : vector<8x32xf32>
    %193 = arith.mulf %187, %191 : vector<8x32xf32>
    %194 = arith.addf %192, %193 : vector<8x32xf32>
    %195 = math.tanh %194 : vector<8x32xf32>
    %196 = arith.mulf %189, %195 : vector<8x32xf32>
    %197 = arith.index_cast %c5_i32 : i32 to index
    %c0_73 = arith.constant 0 : index
    %c0_74 = arith.constant 0 : index
    %198 = vector.load %arg25[%197, %c0_73, %c0_74] : memref<8x8x32xf32, #tpu.memory_space<vmem>>, vector<1x8x32xf32>
    %199 = vector.shape_cast %198 : vector<1x8x32xf32> to vector<8x32xf32>
    %200 = vector.shape_cast %196 : vector<8x32xf32> to vector<1x8x32xf32>
    tpu.vector_store %arg25[%197, %c0_73, %c0_74], %200 {strides = array<i32>} : memref<8x8x32xf32, #tpu.memory_space<vmem>>, vector<1x8x32xf32>,
    %c6_i32 = arith.constant 6 : i32
    %201 = arith.truncf %196 : vector<8x32xf32> to vector<8x32xbf16>
    %c0_75 = arith.constant 0 : index
    %c0_76 = arith.constant 0 : index
    %202 = vector.load %arg9[%c0_75, %c0_76] : memref<32x128xbf16, #tpu.memory_space<vmem>>, vector<32x128xbf16>
    %cst_77 = arith.constant dense<0.000000e+00> : vector<8x128xf32>
    %203 = tpu.matmul %201, %202, %cst_77 {dimension_numbers = #tpu.dot_dimension_numbers<[1], [0], [0], [1], [0, 0, 1, 1], [], []>} : vector<8x32xbf16>, vector<32x128xbf16>, vector<8x128xf32> -> vector<8x128xf32>
    %204 = arith.index_cast %c6_i32 : i32 to index
    %c0_78 = arith.constant 0 : index
    %c0_79 = arith.constant 0 : index
    %205 = vector.load %arg24[%204, %c0_78, %c0_79] : memref<8x8x128xf32, #tpu.memory_space<vmem>>, vector<1x8x128xf32>
    %206 = vector.shape_cast %205 : vector<1x8x128xf32> to vector<8x128xf32>
    %207 = arith.addf %203, %206 : vector<8x128xf32>
    %208 = arith.negf %207 : vector<8x128xf32>
    %209 = math.exp %208 : vector<8x128xf32>
    %cst_80 = arith.constant 1.000000e+00 : f32
    %210 = vector.broadcast %cst_80 : f32 to vector<8x128xf32>
    %211 = arith.addf %210, %209 : vector<8x128xf32>
    %212 = arith.divf %210, %211 : vector<8x128xf32>
    %213 = vector.extract_strided_slice %212 {offsets = [0, 0], sizes = [8, 32], strides = [1, 1]} : vector<8x128xf32> to vector<8x32xf32>
    %214 = vector.extract_strided_slice %212 {offsets = [0, 32], sizes = [8, 32], strides = [1, 1]} : vector<8x128xf32> to vector<8x32xf32>
    %215 = vector.extract_strided_slice %212 {offsets = [0, 96], sizes = [8, 32], strides = [1, 1]} : vector<8x128xf32> to vector<8x32xf32>
    %216 = vector.extract_strided_slice %207 {offsets = [0, 64], sizes = [8, 32], strides = [1, 1]} : vector<8x128xf32> to vector<8x32xf32>
    %217 = math.tanh %216 : vector<8x32xf32>
    %218 = arith.mulf %214, %194 : vector<8x32xf32>
    %219 = arith.mulf %213, %217 : vector<8x32xf32>
    %220 = arith.addf %218, %219 : vector<8x32xf32>
    %221 = math.tanh %220 : vector<8x32xf32>
    %222 = arith.mulf %215, %221 : vector<8x32xf32>
    %223 = arith.index_cast %c6_i32 : i32 to index
    %c0_81 = arith.constant 0 : index
    %c0_82 = arith.constant 0 : index
    %224 = vector.load %arg25[%223, %c0_81, %c0_82] : memref<8x8x32xf32, #tpu.memory_space<vmem>>, vector<1x8x32xf32>
    %225 = vector.shape_cast %224 : vector<1x8x32xf32> to vector<8x32xf32>
    %226 = vector.shape_cast %222 : vector<8x32xf32> to vector<1x8x32xf32>
    tpu.vector_store %arg25[%223, %c0_81, %c0_82], %226 {strides = array<i32>} : memref<8x8x32xf32, #tpu.memory_space<vmem>>, vector<1x8x32xf32>,
    %c7_i32 = arith.constant 7 : i32
    %227 = arith.truncf %222 : vector<8x32xf32> to vector<8x32xbf16>
    %c0_83 = arith.constant 0 : index
    %c0_84 = arith.constant 0 : index
    %228 = vector.load %arg9[%c0_83, %c0_84] : memref<32x128xbf16, #tpu.memory_space<vmem>>, vector<32x128xbf16>
    %cst_85 = arith.constant dense<0.000000e+00> : vector<8x128xf32>
    %229 = tpu.matmul %227, %228, %cst_85 {dimension_numbers = #tpu.dot_dimension_numbers<[1], [0], [0], [1], [0, 0, 1, 1], [], []>} : vector<8x32xbf16>, vector<32x128xbf16>, vector<8x128xf32> -> vector<8x128xf32>
    %230 = arith.index_cast %c7_i32 : i32 to index
    %c0_86 = arith.constant 0 : index
    %c0_87 = arith.constant 0 : index
    %231 = vector.load %arg24[%230, %c0_86, %c0_87] : memref<8x8x128xf32, #tpu.memory_space<vmem>>, vector<1x8x128xf32>
    %232 = vector.shape_cast %231 : vector<1x8x128xf32> to vector<8x128xf32>
    %233 = arith.addf %229, %232 : vector<8x128xf32>
    %234 = arith.negf %233 : vector<8x128xf32>
    %235 = math.exp %234 : vector<8x128xf32>
    %cst_88 = arith.constant 1.000000e+00 : f32
    %236 = vector.broadcast %cst_88 : f32 to vector<8x128xf32>
    %237 = arith.addf %236, %235 : vector<8x128xf32>
    %238 = arith.divf %236, %237 : vector<8x128xf32>
    %239 = vector.extract_strided_slice %238 {offsets = [0, 0], sizes = [8, 32], strides = [1, 1]} : vector<8x128xf32> to vector<8x32xf32>
    %240 = vector.extract_strided_slice %238 {offsets = [0, 32], sizes = [8, 32], strides = [1, 1]} : vector<8x128xf32> to vector<8x32xf32>
    %241 = vector.extract_strided_slice %238 {offsets = [0, 96], sizes = [8, 32], strides = [1, 1]} : vector<8x128xf32> to vector<8x32xf32>
    %242 = vector.extract_strided_slice %233 {offsets = [0, 64], sizes = [8, 32], strides = [1, 1]} : vector<8x128xf32> to vector<8x32xf32>
    %243 = math.tanh %242 : vector<8x32xf32>
    %244 = arith.mulf %240, %220 : vector<8x32xf32>
    %245 = arith.mulf %239, %243 : vector<8x32xf32>
    %246 = arith.addf %244, %245 : vector<8x32xf32>
    %247 = math.tanh %246 : vector<8x32xf32>
    %248 = arith.mulf %241, %247 : vector<8x32xf32>
    %249 = arith.index_cast %c7_i32 : i32 to index
    %c0_89 = arith.constant 0 : index
    %c0_90 = arith.constant 0 : index
    %250 = vector.load %arg25[%249, %c0_89, %c0_90] : memref<8x8x32xf32, #tpu.memory_space<vmem>>, vector<1x8x32xf32>
    %251 = vector.shape_cast %250 : vector<1x8x32xf32> to vector<8x32xf32>
    %252 = vector.shape_cast %248 : vector<8x32xf32> to vector<1x8x32xf32>
    tpu.vector_store %arg25[%249, %c0_89, %c0_90], %252 {strides = array<i32>} : memref<8x8x32xf32, #tpu.memory_space<vmem>>, vector<1x8x32xf32>,
    %c8_i32 = arith.constant 8 : i32
    %253 = vector.extract_strided_slice %38 {offsets = [0, 0, 0], sizes = [8, 8, 1], strides = [1, 1, 1]} : vector<8x8x3xf32> to vector<8x8x1xf32>
    %c0_91 = arith.constant 0 : index
    %c0_92 = arith.constant 0 : index
    %c0_93 = arith.constant 0 : index
    %254 = vector.load %arg25[%c0_91, %c0_92, %c0_93] : memref<8x8x32xf32, #tpu.memory_space<vmem>>, vector<8x8x32xf32>
    %255 = vector.broadcast %253 : vector<8x8x1xf32> to vector<8x8x32xf32>
    %256 = arith.mulf %255, %254 : vector<8x8x32xf32>
    %c0_94 = arith.constant 0 : index
    %c0_95 = arith.constant 0 : index
    %c0_96 = arith.constant 0 : index
    %257 = vector.load %arg27[%c0_94, %c0_95, %c0_96] : memref<8x8x32xf32, #tpu.memory_space<vmem>>, vector<8x8x32xf32>
    tpu.vector_store %arg27[%c0_94, %c0_95, %c0_96], %256 {strides = array<i32>} : memref<8x8x32xf32, #tpu.memory_space<vmem>>, vector<8x8x32xf32>,
    %c1 = arith.constant 1 : index
    %c0_97 = arith.constant 0 : index
    %c0_98 = arith.constant 0 : index
    %258 = vector.load %arg27[%c1, %c0_97, %c0_98] : memref<8x8x32xf32, #tpu.memory_space<vmem>>, vector<7x8x32xf32>
    %259 = vector.extract_strided_slice %38 {offsets = [1, 0, 1], sizes = [7, 8, 1], strides = [1, 1, 1]} : vector<8x8x3xf32> to vector<7x8x1xf32>
    %c0_99 = arith.constant 0 : index
    %c0_100 = arith.constant 0 : index
    %c0_101 = arith.constant 0 : index
    %260 = vector.load %arg25[%c0_99, %c0_100, %c0_101] : memref<8x8x32xf32, #tpu.memory_space<vmem>>, vector<7x8x32xf32>
    %261 = vector.broadcast %259 : vector<7x8x1xf32> to vector<7x8x32xf32>
    %262 = arith.mulf %261, %260 : vector<7x8x32xf32>
    %263 = arith.addf %258, %262 : vector<7x8x32xf32>
    %c1_102 = arith.constant 1 : index
    %c0_103 = arith.constant 0 : index
    %c0_104 = arith.constant 0 : index
    %264 = vector.load %arg27[%c1_102, %c0_103, %c0_104] : memref<8x8x32xf32, #tpu.memory_space<vmem>>, vector<7x8x32xf32>
    tpu.vector_store %arg27[%c1_102, %c0_103, %c0_104], %263 {strides = array<i32>} : memref<8x8x32xf32, #tpu.memory_space<vmem>>, vector<7x8x32xf32>,
    %c2 = arith.constant 2 : index
    %c0_105 = arith.constant 0 : index
    %c0_106 = arith.constant 0 : index
    %265 = vector.load %arg27[%c2, %c0_105, %c0_106] : memref<8x8x32xf32, #tpu.memory_space<vmem>>, vector<6x8x32xf32>
    %266 = vector.extract_strided_slice %38 {offsets = [2, 0, 2], sizes = [6, 8, 1], strides = [1, 1, 1]} : vector<8x8x3xf32> to vector<6x8x1xf32>
    %c0_107 = arith.constant 0 : index
    %c0_108 = arith.constant 0 : index
    %c0_109 = arith.constant 0 : index
    %267 = vector.load %arg25[%c0_107, %c0_108, %c0_109] : memref<8x8x32xf32, #tpu.memory_space<vmem>>, vector<6x8x32xf32>
    %268 = vector.broadcast %266 : vector<6x8x1xf32> to vector<6x8x32xf32>
    %269 = arith.mulf %268, %267 : vector<6x8x32xf32>
    %270 = arith.addf %265, %269 : vector<6x8x32xf32>
    %c2_110 = arith.constant 2 : index
    %c0_111 = arith.constant 0 : index
    %c0_112 = arith.constant 0 : index
    %271 = vector.load %arg27[%c2_110, %c0_111, %c0_112] : memref<8x8x32xf32, #tpu.memory_space<vmem>>, vector<6x8x32xf32>
    tpu.vector_store %arg27[%c2_110, %c0_111, %c0_112], %270 {strides = array<i32>} : memref<8x8x32xf32, #tpu.memory_space<vmem>>, vector<6x8x32xf32>,
    %c0_113 = arith.constant 0 : index
    %c0_114 = arith.constant 0 : index
    %c0_115 = arith.constant 0 : index
    %272 = vector.load %arg27[%c0_113, %c0_114, %c0_115] : memref<8x8x32xf32, #tpu.memory_space<vmem>>, vector<8x8x32xf32>
    %273 = vector.shape_cast %272 : vector<8x8x32xf32> to vector<64x32xf32>
    %274 = arith.truncf %273 : vector<64x32xf32> to vector<64x32xbf16>
    %c0_116 = arith.constant 0 : index
    %c0_117 = arith.constant 0 : index
    %275 = vector.load %arg12[%c0_116, %c0_117] : memref<32x128xbf16, #tpu.memory_space<vmem>>, vector<32x128xbf16>
    %cst_118 = arith.constant dense<0.000000e+00> : vector<64x128xf32>
    %276 = tpu.matmul %274, %275, %cst_118 {dimension_numbers = #tpu.dot_dimension_numbers<[1], [0], [0], [1], [0, 0, 1, 1], [], []>} : vector<64x32xbf16>, vector<32x128xbf16>, vector<64x128xf32> -> vector<64x128xf32>
    %c0_119 = arith.constant 0 : index
    %c0_120 = arith.constant 0 : index
    %277 = vector.load %arg13[%c0_119, %c0_120] : memref<1x128xf32, #tpu.memory_space<vmem>>, vector<1x128xf32>
    %278 = vector.broadcast %277 : vector<1x128xf32> to vector<64x128xf32>
    %279 = arith.addf %276, %278 : vector<64x128xf32>
    %280 = vector.shape_cast %279 : vector<64x128xf32> to vector<8x8x128xf32>
    %c0_121 = arith.constant 0 : index
    %c0_122 = arith.constant 0 : index
    %c0_123 = arith.constant 0 : index
    %281 = vector.load %arg26[%c0_121, %c0_122, %c0_123] : memref<8x8x128xf32, #tpu.memory_space<vmem>>, vector<8x8x128xf32>
    tpu.vector_store %arg26[%c0_121, %c0_122, %c0_123], %280 {strides = array<i32>} : memref<8x8x128xf32, #tpu.memory_space<vmem>>, vector<8x8x128xf32>,
    %c0_124 = arith.constant 0 : index
    %c0_125 = arith.constant 0 : index
    %c0_126 = arith.constant 0 : index
    %282 = vector.load %arg26[%c0_124, %c0_125, %c0_126] : memref<8x8x128xf32, #tpu.memory_space<vmem>>, vector<1x8x128xf32>
    %283 = vector.shape_cast %282 : vector<1x8x128xf32> to vector<8x128xf32>
    %c0_127 = arith.constant 0 : index
    %c0_128 = arith.constant 0 : index
    %284 = vector.load %arg14[%c0_127, %c0_128] : memref<1x128xf32, #tpu.memory_space<vmem>>, vector<1x128xf32>
    %285 = vector.broadcast %284 : vector<1x128xf32> to vector<8x128xf32>
    %286 = arith.addf %283, %285 : vector<8x128xf32>
    %c0_129 = arith.constant 0 : index
    %c0_130 = arith.constant 0 : index
    %c0_131 = arith.constant 0 : index
    %287 = vector.load %arg26[%c0_129, %c0_130, %c0_131] : memref<8x8x128xf32, #tpu.memory_space<vmem>>, vector<1x8x128xf32>
    %288 = vector.shape_cast %287 : vector<1x8x128xf32> to vector<8x128xf32>
    %289 = vector.shape_cast %286 : vector<8x128xf32> to vector<1x8x128xf32>
    tpu.vector_store %arg26[%c0_129, %c0_130, %c0_131], %289 {strides = array<i32>} : memref<8x8x128xf32, #tpu.memory_space<vmem>>, vector<1x8x128xf32>,
    %c0_132 = arith.constant 0 : index
    %c0_133 = arith.constant 0 : index
    %290 = vector.load %arg17[%c0_132, %c0_133] : memref<1x32xf32, #tpu.memory_space<vmem>>, vector<1x32xf32>
    %291 = vector.shape_cast %290 : vector<1x32xf32> to vector<1x32xf32>
    %292 = vector.broadcast %291 : vector<1x32xf32> to vector<8x32xf32>
    %c0_134 = arith.constant 0 : index
    %c0_135 = arith.constant 0 : index
    %293 = vector.load %arg18[%c0_134, %c0_135] : memref<1x32xf32, #tpu.memory_space<vmem>>, vector<1x32xf32>
    %294 = vector.shape_cast %293 : vector<1x32xf32> to vector<1x32xf32>
    %295 = vector.broadcast %294 : vector<1x32xf32> to vector<8x32xf32>
    %cst_136 = arith.constant 0.000000e+00 : f32
    %296 = vector.broadcast %cst_136 : f32 to vector<8x32xf32>
    %c0_i32_137 = arith.constant 0 : i32
    %297 = arith.truncf %296 : vector<8x32xf32> to vector<8x32xbf16>
    %c0_138 = arith.constant 0 : index
    %c0_139 = arith.constant 0 : index
    %298 = vector.load %arg15[%c0_138, %c0_139] : memref<32x128xbf16, #tpu.memory_space<vmem>>, vector<32x128xbf16>
    %cst_140 = arith.constant dense<0.000000e+00> : vector<8x128xf32>
    %299 = tpu.matmul %297, %298, %cst_140 {dimension_numbers = #tpu.dot_dimension_numbers<[1], [0], [0], [1], [0, 0, 1, 1], [], []>} : vector<8x32xbf16>, vector<32x128xbf16>, vector<8x128xf32> -> vector<8x128xf32>
    %300 = arith.truncf %292 : vector<8x32xf32> to vector<8x32xbf16>
    %c0_141 = arith.constant 0 : index
    %c0_142 = arith.constant 0 : index
    %301 = vector.load %arg16[%c0_141, %c0_142] : memref<32x128xbf16, #tpu.memory_space<vmem>>, vector<32x128xbf16>
    %cst_143 = arith.constant dense<0.000000e+00> : vector<8x128xf32>
    %302 = tpu.matmul %300, %301, %cst_143 {dimension_numbers = #tpu.dot_dimension_numbers<[1], [0], [0], [1], [0, 0, 1, 1], [], []>} : vector<8x32xbf16>, vector<32x128xbf16>, vector<8x128xf32> -> vector<8x128xf32>
    %303 = arith.addf %299, %302 : vector<8x128xf32>
    %304 = arith.index_cast %c0_i32_137 : i32 to index
    %c0_144 = arith.constant 0 : index
    %c0_145 = arith.constant 0 : index
    %305 = vector.load %arg26[%304, %c0_144, %c0_145] : memref<8x8x128xf32, #tpu.memory_space<vmem>>, vector<1x8x128xf32>
    %306 = vector.shape_cast %305 : vector<1x8x128xf32> to vector<8x128xf32>
    %307 = arith.addf %303, %306 : vector<8x128xf32>
    %308 = arith.negf %307 : vector<8x128xf32>
    %309 = math.exp %308 : vector<8x128xf32>
    %cst_146 = arith.constant 1.000000e+00 : f32
    %310 = vector.broadcast %cst_146 : f32 to vector<8x128xf32>
    %311 = arith.addf %310, %309 : vector<8x128xf32>
    %312 = arith.divf %310, %311 : vector<8x128xf32>
    %313 = vector.extract_strided_slice %312 {offsets = [0, 0], sizes = [8, 32], strides = [1, 1]} : vector<8x128xf32> to vector<8x32xf32>
    %314 = vector.extract_strided_slice %312 {offsets = [0, 32], sizes = [8, 32], strides = [1, 1]} : vector<8x128xf32> to vector<8x32xf32>
    %315 = vector.extract_strided_slice %312 {offsets = [0, 96], sizes = [8, 32], strides = [1, 1]} : vector<8x128xf32> to vector<8x32xf32>
    %316 = vector.extract_strided_slice %307 {offsets = [0, 64], sizes = [8, 32], strides = [1, 1]} : vector<8x128xf32> to vector<8x32xf32>
    %317 = math.tanh %316 : vector<8x32xf32>
    %318 = arith.mulf %314, %295 : vector<8x32xf32>
    %319 = arith.mulf %313, %317 : vector<8x32xf32>
    %320 = arith.addf %318, %319 : vector<8x32xf32>
    %321 = math.tanh %320 : vector<8x32xf32>
    %322 = arith.mulf %315, %321 : vector<8x32xf32>
    %323 = arith.truncf %322 : vector<8x32xf32> to vector<8x32xbf16>
    %c0_147 = arith.constant 0 : index
    %c0_148 = arith.constant 0 : index
    %324 = vector.load %arg19[%c0_147, %c0_148] : memref<32x32xbf16, #tpu.memory_space<vmem>>, vector<32x32xbf16>
    %cst_149 = arith.constant dense<0.000000e+00> : vector<8x32xf32>
    %325 = tpu.matmul %323, %324, %cst_149 {dimension_numbers = #tpu.dot_dimension_numbers<[1], [0], [0], [1], [0, 0, 1, 1], [], []>} : vector<8x32xbf16>, vector<32x32xbf16>, vector<8x32xf32> -> vector<8x32xf32>
    %c0_150 = arith.constant 0 : index
    %c0_151 = arith.constant 0 : index
    %326 = vector.load %arg20[%c0_150, %c0_151] : memref<1x32xf32, #tpu.memory_space<vmem>>, vector<1x32xf32>
    %327 = vector.broadcast %326 : vector<1x32xf32> to vector<8x32xf32>
    %328 = arith.addf %325, %327 : vector<8x32xf32>
    %cst_152 = arith.constant 0.000000e+00 : f32
    %329 = vector.broadcast %cst_152 : f32 to vector<8x32xf32>
    %330 = arith.maximumf %328, %329 : vector<8x32xf32>
    %331 = arith.index_cast %c0_i32_137 : i32 to index
    %c0_153 = arith.constant 0 : index
    %c0_154 = arith.constant 0 : index
    %332 = vector.load %arg28[%331, %c0_153, %c0_154] : memref<8x8x32xf32, #tpu.memory_space<vmem>>, vector<1x8x32xf32>
    %333 = vector.shape_cast %332 : vector<1x8x32xf32> to vector<8x32xf32>
    %334 = vector.shape_cast %330 : vector<8x32xf32> to vector<1x8x32xf32>
    tpu.vector_store %arg28[%331, %c0_153, %c0_154], %334 {strides = array<i32>} : memref<8x8x32xf32, #tpu.memory_space<vmem>>, vector<1x8x32xf32>,
    %c1_i32_155 = arith.constant 1 : i32
    %335 = arith.truncf %330 : vector<8x32xf32> to vector<8x32xbf16>
    %c0_156 = arith.constant 0 : index
    %c0_157 = arith.constant 0 : index
    %336 = vector.load %arg15[%c0_156, %c0_157] : memref<32x128xbf16, #tpu.memory_space<vmem>>, vector<32x128xbf16>
    %cst_158 = arith.constant dense<0.000000e+00> : vector<8x128xf32>
    %337 = tpu.matmul %335, %336, %cst_158 {dimension_numbers = #tpu.dot_dimension_numbers<[1], [0], [0], [1], [0, 0, 1, 1], [], []>} : vector<8x32xbf16>, vector<32x128xbf16>, vector<8x128xf32> -> vector<8x128xf32>
    %338 = arith.truncf %322 : vector<8x32xf32> to vector<8x32xbf16>
    %c0_159 = arith.constant 0 : index
    %c0_160 = arith.constant 0 : index
    %339 = vector.load %arg16[%c0_159, %c0_160] : memref<32x128xbf16, #tpu.memory_space<vmem>>, vector<32x128xbf16>
    %cst_161 = arith.constant dense<0.000000e+00> : vector<8x128xf32>
    %340 = tpu.matmul %338, %339, %cst_161 {dimension_numbers = #tpu.dot_dimension_numbers<[1], [0], [0], [1], [0, 0, 1, 1], [], []>} : vector<8x32xbf16>, vector<32x128xbf16>, vector<8x128xf32> -> vector<8x128xf32>
    %341 = arith.addf %337, %340 : vector<8x128xf32>
    %342 = arith.index_cast %c1_i32_155 : i32 to index
    %c0_162 = arith.constant 0 : index
    %c0_163 = arith.constant 0 : index
    %343 = vector.load %arg26[%342, %c0_162, %c0_163] : memref<8x8x128xf32, #tpu.memory_space<vmem>>, vector<1x8x128xf32>
    %344 = vector.shape_cast %343 : vector<1x8x128xf32> to vector<8x128xf32>
    %345 = arith.addf %341, %344 : vector<8x128xf32>
    %346 = arith.negf %345 : vector<8x128xf32>
    %347 = math.exp %346 : vector<8x128xf32>
    %cst_164 = arith.constant 1.000000e+00 : f32
    %348 = vector.broadcast %cst_164 : f32 to vector<8x128xf32>
    %349 = arith.addf %348, %347 : vector<8x128xf32>
    %350 = arith.divf %348, %349 : vector<8x128xf32>
    %351 = vector.extract_strided_slice %350 {offsets = [0, 0], sizes = [8, 32], strides = [1, 1]} : vector<8x128xf32> to vector<8x32xf32>
    %352 = vector.extract_strided_slice %350 {offsets = [0, 32], sizes = [8, 32], strides = [1, 1]} : vector<8x128xf32> to vector<8x32xf32>
    %353 = vector.extract_strided_slice %350 {offsets = [0, 96], sizes = [8, 32], strides = [1, 1]} : vector<8x128xf32> to vector<8x32xf32>
    %354 = vector.extract_strided_slice %345 {offsets = [0, 64], sizes = [8, 32], strides = [1, 1]} : vector<8x128xf32> to vector<8x32xf32>
    %355 = math.tanh %354 : vector<8x32xf32>
    %356 = arith.mulf %352, %320 : vector<8x32xf32>
    %357 = arith.mulf %351, %355 : vector<8x32xf32>
    %358 = arith.addf %356, %357 : vector<8x32xf32>
    %359 = math.tanh %358 : vector<8x32xf32>
    %360 = arith.mulf %353, %359 : vector<8x32xf32>
    %361 = arith.truncf %360 : vector<8x32xf32> to vector<8x32xbf16>
    %c0_165 = arith.constant 0 : index
    %c0_166 = arith.constant 0 : index
    %362 = vector.load %arg19[%c0_165, %c0_166] : memref<32x32xbf16, #tpu.memory_space<vmem>>, vector<32x32xbf16>
    %cst_167 = arith.constant dense<0.000000e+00> : vector<8x32xf32>
    %363 = tpu.matmul %361, %362, %cst_167 {dimension_numbers = #tpu.dot_dimension_numbers<[1], [0], [0], [1], [0, 0, 1, 1], [], []>} : vector<8x32xbf16>, vector<32x32xbf16>, vector<8x32xf32> -> vector<8x32xf32>
    %c0_168 = arith.constant 0 : index
    %c0_169 = arith.constant 0 : index
    %364 = vector.load %arg20[%c0_168, %c0_169] : memref<1x32xf32, #tpu.memory_space<vmem>>, vector<1x32xf32>
    %365 = vector.broadcast %364 : vector<1x32xf32> to vector<8x32xf32>
    %366 = arith.addf %363, %365 : vector<8x32xf32>
    %cst_170 = arith.constant 0.000000e+00 : f32
    %367 = vector.broadcast %cst_170 : f32 to vector<8x32xf32>
    %368 = arith.maximumf %366, %367 : vector<8x32xf32>
    %369 = arith.index_cast %c1_i32_155 : i32 to index
    %c0_171 = arith.constant 0 : index
    %c0_172 = arith.constant 0 : index
    %370 = vector.load %arg28[%369, %c0_171, %c0_172] : memref<8x8x32xf32, #tpu.memory_space<vmem>>, vector<1x8x32xf32>
    %371 = vector.shape_cast %370 : vector<1x8x32xf32> to vector<8x32xf32>
    %372 = vector.shape_cast %368 : vector<8x32xf32> to vector<1x8x32xf32>
    tpu.vector_store %arg28[%369, %c0_171, %c0_172], %372 {strides = array<i32>} : memref<8x8x32xf32, #tpu.memory_space<vmem>>, vector<1x8x32xf32>,
    %c2_i32_173 = arith.constant 2 : i32
    %373 = arith.truncf %368 : vector<8x32xf32> to vector<8x32xbf16>
    %c0_174 = arith.constant 0 : index
    %c0_175 = arith.constant 0 : index
    %374 = vector.load %arg15[%c0_174, %c0_175] : memref<32x128xbf16, #tpu.memory_space<vmem>>, vector<32x128xbf16>
    %cst_176 = arith.constant dense<0.000000e+00> : vector<8x128xf32>
    %375 = tpu.matmul %373, %374, %cst_176 {dimension_numbers = #tpu.dot_dimension_numbers<[1], [0], [0], [1], [0, 0, 1, 1], [], []>} : vector<8x32xbf16>, vector<32x128xbf16>, vector<8x128xf32> -> vector<8x128xf32>
    %376 = arith.truncf %360 : vector<8x32xf32> to vector<8x32xbf16>
    %c0_177 = arith.constant 0 : index
    %c0_178 = arith.constant 0 : index
    %377 = vector.load %arg16[%c0_177, %c0_178] : memref<32x128xbf16, #tpu.memory_space<vmem>>, vector<32x128xbf16>
    %cst_179 = arith.constant dense<0.000000e+00> : vector<8x128xf32>
    %378 = tpu.matmul %376, %377, %cst_179 {dimension_numbers = #tpu.dot_dimension_numbers<[1], [0], [0], [1], [0, 0, 1, 1], [], []>} : vector<8x32xbf16>, vector<32x128xbf16>, vector<8x128xf32> -> vector<8x128xf32>
    %379 = arith.addf %375, %378 : vector<8x128xf32>
    %380 = arith.index_cast %c2_i32_173 : i32 to index
    %c0_180 = arith.constant 0 : index
    %c0_181 = arith.constant 0 : index
    %381 = vector.load %arg26[%380, %c0_180, %c0_181] : memref<8x8x128xf32, #tpu.memory_space<vmem>>, vector<1x8x128xf32>
    %382 = vector.shape_cast %381 : vector<1x8x128xf32> to vector<8x128xf32>
    %383 = arith.addf %379, %382 : vector<8x128xf32>
    %384 = arith.negf %383 : vector<8x128xf32>
    %385 = math.exp %384 : vector<8x128xf32>
    %cst_182 = arith.constant 1.000000e+00 : f32
    %386 = vector.broadcast %cst_182 : f32 to vector<8x128xf32>
    %387 = arith.addf %386, %385 : vector<8x128xf32>
    %388 = arith.divf %386, %387 : vector<8x128xf32>
    %389 = vector.extract_strided_slice %388 {offsets = [0, 0], sizes = [8, 32], strides = [1, 1]} : vector<8x128xf32> to vector<8x32xf32>
    %390 = vector.extract_strided_slice %388 {offsets = [0, 32], sizes = [8, 32], strides = [1, 1]} : vector<8x128xf32> to vector<8x32xf32>
    %391 = vector.extract_strided_slice %388 {offsets = [0, 96], sizes = [8, 32], strides = [1, 1]} : vector<8x128xf32> to vector<8x32xf32>
    %392 = vector.extract_strided_slice %383 {offsets = [0, 64], sizes = [8, 32], strides = [1, 1]} : vector<8x128xf32> to vector<8x32xf32>
    %393 = math.tanh %392 : vector<8x32xf32>
    %394 = arith.mulf %390, %358 : vector<8x32xf32>
    %395 = arith.mulf %389, %393 : vector<8x32xf32>
    %396 = arith.addf %394, %395 : vector<8x32xf32>
    %397 = math.tanh %396 : vector<8x32xf32>
    %398 = arith.mulf %391, %397 : vector<8x32xf32>
    %399 = arith.truncf %398 : vector<8x32xf32> to vector<8x32xbf16>
    %c0_183 = arith.constant 0 : index
    %c0_184 = arith.constant 0 : index
    %400 = vector.load %arg19[%c0_183, %c0_184] : memref<32x32xbf16, #tpu.memory_space<vmem>>, vector<32x32xbf16>
    %cst_185 = arith.constant dense<0.000000e+00> : vector<8x32xf32>
    %401 = tpu.matmul %399, %400, %cst_185 {dimension_numbers = #tpu.dot_dimension_numbers<[1], [0], [0], [1], [0, 0, 1, 1], [], []>} : vector<8x32xbf16>, vector<32x32xbf16>, vector<8x32xf32> -> vector<8x32xf32>
    %c0_186 = arith.constant 0 : index
    %c0_187 = arith.constant 0 : index
    %402 = vector.load %arg20[%c0_186, %c0_187] : memref<1x32xf32, #tpu.memory_space<vmem>>, vector<1x32xf32>
    %403 = vector.broadcast %402 : vector<1x32xf32> to vector<8x32xf32>
    %404 = arith.addf %401, %403 : vector<8x32xf32>
    %cst_188 = arith.constant 0.000000e+00 : f32
    %405 = vector.broadcast %cst_188 : f32 to vector<8x32xf32>
    %406 = arith.maximumf %404, %405 : vector<8x32xf32>
    %407 = arith.index_cast %c2_i32_173 : i32 to index
    %c0_189 = arith.constant 0 : index
    %c0_190 = arith.constant 0 : index
    %408 = vector.load %arg28[%407, %c0_189, %c0_190] : memref<8x8x32xf32, #tpu.memory_space<vmem>>, vector<1x8x32xf32>
    %409 = vector.shape_cast %408 : vector<1x8x32xf32> to vector<8x32xf32>
    %410 = vector.shape_cast %406 : vector<8x32xf32> to vector<1x8x32xf32>
    tpu.vector_store %arg28[%407, %c0_189, %c0_190], %410 {strides = array<i32>} : memref<8x8x32xf32, #tpu.memory_space<vmem>>, vector<1x8x32xf32>,
    %c3_i32_191 = arith.constant 3 : i32
    %411 = arith.truncf %406 : vector<8x32xf32> to vector<8x32xbf16>
    %c0_192 = arith.constant 0 : index
    %c0_193 = arith.constant 0 : index
    %412 = vector.load %arg15[%c0_192, %c0_193] : memref<32x128xbf16, #tpu.memory_space<vmem>>, vector<32x128xbf16>
    %cst_194 = arith.constant dense<0.000000e+00> : vector<8x128xf32>
    %413 = tpu.matmul %411, %412, %cst_194 {dimension_numbers = #tpu.dot_dimension_numbers<[1], [0], [0], [1], [0, 0, 1, 1], [], []>} : vector<8x32xbf16>, vector<32x128xbf16>, vector<8x128xf32> -> vector<8x128xf32>
    %414 = arith.truncf %398 : vector<8x32xf32> to vector<8x32xbf16>
    %c0_195 = arith.constant 0 : index
    %c0_196 = arith.constant 0 : index
    %415 = vector.load %arg16[%c0_195, %c0_196] : memref<32x128xbf16, #tpu.memory_space<vmem>>, vector<32x128xbf16>
    %cst_197 = arith.constant dense<0.000000e+00> : vector<8x128xf32>
    %416 = tpu.matmul %414, %415, %cst_197 {dimension_numbers = #tpu.dot_dimension_numbers<[1], [0], [0], [1], [0, 0, 1, 1], [], []>} : vector<8x32xbf16>, vector<32x128xbf16>, vector<8x128xf32> -> vector<8x128xf32>
    %417 = arith.addf %413, %416 : vector<8x128xf32>
    %418 = arith.index_cast %c3_i32_191 : i32 to index
    %c0_198 = arith.constant 0 : index
    %c0_199 = arith.constant 0 : index
    %419 = vector.load %arg26[%418, %c0_198, %c0_199] : memref<8x8x128xf32, #tpu.memory_space<vmem>>, vector<1x8x128xf32>
    %420 = vector.shape_cast %419 : vector<1x8x128xf32> to vector<8x128xf32>
    %421 = arith.addf %417, %420 : vector<8x128xf32>
    %422 = arith.negf %421 : vector<8x128xf32>
    %423 = math.exp %422 : vector<8x128xf32>
    %cst_200 = arith.constant 1.000000e+00 : f32
    %424 = vector.broadcast %cst_200 : f32 to vector<8x128xf32>
    %425 = arith.addf %424, %423 : vector<8x128xf32>
    %426 = arith.divf %424, %425 : vector<8x128xf32>
    %427 = vector.extract_strided_slice %426 {offsets = [0, 0], sizes = [8, 32], strides = [1, 1]} : vector<8x128xf32> to vector<8x32xf32>
    %428 = vector.extract_strided_slice %426 {offsets = [0, 32], sizes = [8, 32], strides = [1, 1]} : vector<8x128xf32> to vector<8x32xf32>
    %429 = vector.extract_strided_slice %426 {offsets = [0, 96], sizes = [8, 32], strides = [1, 1]} : vector<8x128xf32> to vector<8x32xf32>
    %430 = vector.extract_strided_slice %421 {offsets = [0, 64], sizes = [8, 32], strides = [1, 1]} : vector<8x128xf32> to vector<8x32xf32>
    %431 = math.tanh %430 : vector<8x32xf32>
    %432 = arith.mulf %428, %396 : vector<8x32xf32>
    %433 = arith.mulf %427, %431 : vector<8x32xf32>
    %434 = arith.addf %432, %433 : vector<8x32xf32>
    %435 = math.tanh %434 : vector<8x32xf32>
    %436 = arith.mulf %429, %435 : vector<8x32xf32>
    %437 = arith.truncf %436 : vector<8x32xf32> to vector<8x32xbf16>
    %c0_201 = arith.constant 0 : index
    %c0_202 = arith.constant 0 : index
    %438 = vector.load %arg19[%c0_201, %c0_202] : memref<32x32xbf16, #tpu.memory_space<vmem>>, vector<32x32xbf16>
    %cst_203 = arith.constant dense<0.000000e+00> : vector<8x32xf32>
    %439 = tpu.matmul %437, %438, %cst_203 {dimension_numbers = #tpu.dot_dimension_numbers<[1], [0], [0], [1], [0, 0, 1, 1], [], []>} : vector<8x32xbf16>, vector<32x32xbf16>, vector<8x32xf32> -> vector<8x32xf32>
    %c0_204 = arith.constant 0 : index
    %c0_205 = arith.constant 0 : index
    %440 = vector.load %arg20[%c0_204, %c0_205] : memref<1x32xf32, #tpu.memory_space<vmem>>, vector<1x32xf32>
    %441 = vector.broadcast %440 : vector<1x32xf32> to vector<8x32xf32>
    %442 = arith.addf %439, %441 : vector<8x32xf32>
    %cst_206 = arith.constant 0.000000e+00 : f32
    %443 = vector.broadcast %cst_206 : f32 to vector<8x32xf32>
    %444 = arith.maximumf %442, %443 : vector<8x32xf32>
    %445 = arith.index_cast %c3_i32_191 : i32 to index
    %c0_207 = arith.constant 0 : index
    %c0_208 = arith.constant 0 : index
    %446 = vector.load %arg28[%445, %c0_207, %c0_208] : memref<8x8x32xf32, #tpu.memory_space<vmem>>, vector<1x8x32xf32>
    %447 = vector.shape_cast %446 : vector<1x8x32xf32> to vector<8x32xf32>
    %448 = vector.shape_cast %444 : vector<8x32xf32> to vector<1x8x32xf32>
    tpu.vector_store %arg28[%445, %c0_207, %c0_208], %448 {strides = array<i32>} : memref<8x8x32xf32, #tpu.memory_space<vmem>>, vector<1x8x32xf32>,
    %c4_i32_209 = arith.constant 4 : i32
    %449 = arith.truncf %444 : vector<8x32xf32> to vector<8x32xbf16>
    %c0_210 = arith.constant 0 : index
    %c0_211 = arith.constant 0 : index
    %450 = vector.load %arg15[%c0_210, %c0_211] : memref<32x128xbf16, #tpu.memory_space<vmem>>, vector<32x128xbf16>
    %cst_212 = arith.constant dense<0.000000e+00> : vector<8x128xf32>
    %451 = tpu.matmul %449, %450, %cst_212 {dimension_numbers = #tpu.dot_dimension_numbers<[1], [0], [0], [1], [0, 0, 1, 1], [], []>} : vector<8x32xbf16>, vector<32x128xbf16>, vector<8x128xf32> -> vector<8x128xf32>
    %452 = arith.truncf %436 : vector<8x32xf32> to vector<8x32xbf16>
    %c0_213 = arith.constant 0 : index
    %c0_214 = arith.constant 0 : index
    %453 = vector.load %arg16[%c0_213, %c0_214] : memref<32x128xbf16, #tpu.memory_space<vmem>>, vector<32x128xbf16>
    %cst_215 = arith.constant dense<0.000000e+00> : vector<8x128xf32>
    %454 = tpu.matmul %452, %453, %cst_215 {dimension_numbers = #tpu.dot_dimension_numbers<[1], [0], [0], [1], [0, 0, 1, 1], [], []>} : vector<8x32xbf16>, vector<32x128xbf16>, vector<8x128xf32> -> vector<8x128xf32>
    %455 = arith.addf %451, %454 : vector<8x128xf32>
    %456 = arith.index_cast %c4_i32_209 : i32 to index
    %c0_216 = arith.constant 0 : index
    %c0_217 = arith.constant 0 : index
    %457 = vector.load %arg26[%456, %c0_216, %c0_217] : memref<8x8x128xf32, #tpu.memory_space<vmem>>, vector<1x8x128xf32>
    %458 = vector.shape_cast %457 : vector<1x8x128xf32> to vector<8x128xf32>
    %459 = arith.addf %455, %458 : vector<8x128xf32>
    %460 = arith.negf %459 : vector<8x128xf32>
    %461 = math.exp %460 : vector<8x128xf32>
    %cst_218 = arith.constant 1.000000e+00 : f32
    %462 = vector.broadcast %cst_218 : f32 to vector<8x128xf32>
    %463 = arith.addf %462, %461 : vector<8x128xf32>
    %464 = arith.divf %462, %463 : vector<8x128xf32>
    %465 = vector.extract_strided_slice %464 {offsets = [0, 0], sizes = [8, 32], strides = [1, 1]} : vector<8x128xf32> to vector<8x32xf32>
    %466 = vector.extract_strided_slice %464 {offsets = [0, 32], sizes = [8, 32], strides = [1, 1]} : vector<8x128xf32> to vector<8x32xf32>
    %467 = vector.extract_strided_slice %464 {offsets = [0, 96], sizes = [8, 32], strides = [1, 1]} : vector<8x128xf32> to vector<8x32xf32>
    %468 = vector.extract_strided_slice %459 {offsets = [0, 64], sizes = [8, 32], strides = [1, 1]} : vector<8x128xf32> to vector<8x32xf32>
    %469 = math.tanh %468 : vector<8x32xf32>
    %470 = arith.mulf %466, %434 : vector<8x32xf32>
    %471 = arith.mulf %465, %469 : vector<8x32xf32>
    %472 = arith.addf %470, %471 : vector<8x32xf32>
    %473 = math.tanh %472 : vector<8x32xf32>
    %474 = arith.mulf %467, %473 : vector<8x32xf32>
    %475 = arith.truncf %474 : vector<8x32xf32> to vector<8x32xbf16>
    %c0_219 = arith.constant 0 : index
    %c0_220 = arith.constant 0 : index
    %476 = vector.load %arg19[%c0_219, %c0_220] : memref<32x32xbf16, #tpu.memory_space<vmem>>, vector<32x32xbf16>
    %cst_221 = arith.constant dense<0.000000e+00> : vector<8x32xf32>
    %477 = tpu.matmul %475, %476, %cst_221 {dimension_numbers = #tpu.dot_dimension_numbers<[1], [0], [0], [1], [0, 0, 1, 1], [], []>} : vector<8x32xbf16>, vector<32x32xbf16>, vector<8x32xf32> -> vector<8x32xf32>
    %c0_222 = arith.constant 0 : index
    %c0_223 = arith.constant 0 : index
    %478 = vector.load %arg20[%c0_222, %c0_223] : memref<1x32xf32, #tpu.memory_space<vmem>>, vector<1x32xf32>
    %479 = vector.broadcast %478 : vector<1x32xf32> to vector<8x32xf32>
    %480 = arith.addf %477, %479 : vector<8x32xf32>
    %cst_224 = arith.constant 0.000000e+00 : f32
    %481 = vector.broadcast %cst_224 : f32 to vector<8x32xf32>
    %482 = arith.maximumf %480, %481 : vector<8x32xf32>
    %483 = arith.index_cast %c4_i32_209 : i32 to index
    %c0_225 = arith.constant 0 : index
    %c0_226 = arith.constant 0 : index
    %484 = vector.load %arg28[%483, %c0_225, %c0_226] : memref<8x8x32xf32, #tpu.memory_space<vmem>>, vector<1x8x32xf32>
    %485 = vector.shape_cast %484 : vector<1x8x32xf32> to vector<8x32xf32>
    %486 = vector.shape_cast %482 : vector<8x32xf32> to vector<1x8x32xf32>
    tpu.vector_store %arg28[%483, %c0_225, %c0_226], %486 {strides = array<i32>} : memref<8x8x32xf32, #tpu.memory_space<vmem>>, vector<1x8x32xf32>,
    %c5_i32_227 = arith.constant 5 : i32
    %487 = arith.truncf %482 : vector<8x32xf32> to vector<8x32xbf16>
    %c0_228 = arith.constant 0 : index
    %c0_229 = arith.constant 0 : index
    %488 = vector.load %arg15[%c0_228, %c0_229] : memref<32x128xbf16, #tpu.memory_space<vmem>>, vector<32x128xbf16>
    %cst_230 = arith.constant dense<0.000000e+00> : vector<8x128xf32>
    %489 = tpu.matmul %487, %488, %cst_230 {dimension_numbers = #tpu.dot_dimension_numbers<[1], [0], [0], [1], [0, 0, 1, 1], [], []>} : vector<8x32xbf16>, vector<32x128xbf16>, vector<8x128xf32> -> vector<8x128xf32>
    %490 = arith.truncf %474 : vector<8x32xf32> to vector<8x32xbf16>
    %c0_231 = arith.constant 0 : index
    %c0_232 = arith.constant 0 : index
    %491 = vector.load %arg16[%c0_231, %c0_232] : memref<32x128xbf16, #tpu.memory_space<vmem>>, vector<32x128xbf16>
    %cst_233 = arith.constant dense<0.000000e+00> : vector<8x128xf32>
    %492 = tpu.matmul %490, %491, %cst_233 {dimension_numbers = #tpu.dot_dimension_numbers<[1], [0], [0], [1], [0, 0, 1, 1], [], []>} : vector<8x32xbf16>, vector<32x128xbf16>, vector<8x128xf32> -> vector<8x128xf32>
    %493 = arith.addf %489, %492 : vector<8x128xf32>
    %494 = arith.index_cast %c5_i32_227 : i32 to index
    %c0_234 = arith.constant 0 : index
    %c0_235 = arith.constant 0 : index
    %495 = vector.load %arg26[%494, %c0_234, %c0_235] : memref<8x8x128xf32, #tpu.memory_space<vmem>>, vector<1x8x128xf32>
    %496 = vector.shape_cast %495 : vector<1x8x128xf32> to vector<8x128xf32>
    %497 = arith.addf %493, %496 : vector<8x128xf32>
    %498 = arith.negf %497 : vector<8x128xf32>
    %499 = math.exp %498 : vector<8x128xf32>
    %cst_236 = arith.constant 1.000000e+00 : f32
    %500 = vector.broadcast %cst_236 : f32 to vector<8x128xf32>
    %501 = arith.addf %500, %499 : vector<8x128xf32>
    %502 = arith.divf %500, %501 : vector<8x128xf32>
    %503 = vector.extract_strided_slice %502 {offsets = [0, 0], sizes = [8, 32], strides = [1, 1]} : vector<8x128xf32> to vector<8x32xf32>
    %504 = vector.extract_strided_slice %502 {offsets = [0, 32], sizes = [8, 32], strides = [1, 1]} : vector<8x128xf32> to vector<8x32xf32>
    %505 = vector.extract_strided_slice %502 {offsets = [0, 96], sizes = [8, 32], strides = [1, 1]} : vector<8x128xf32> to vector<8x32xf32>
    %506 = vector.extract_strided_slice %497 {offsets = [0, 64], sizes = [8, 32], strides = [1, 1]} : vector<8x128xf32> to vector<8x32xf32>
    %507 = math.tanh %506 : vector<8x32xf32>
    %508 = arith.mulf %504, %472 : vector<8x32xf32>
    %509 = arith.mulf %503, %507 : vector<8x32xf32>
    %510 = arith.addf %508, %509 : vector<8x32xf32>
    %511 = math.tanh %510 : vector<8x32xf32>
    %512 = arith.mulf %505, %511 : vector<8x32xf32>
    %513 = arith.truncf %512 : vector<8x32xf32> to vector<8x32xbf16>
    %c0_237 = arith.constant 0 : index
    %c0_238 = arith.constant 0 : index
    %514 = vector.load %arg19[%c0_237, %c0_238] : memref<32x32xbf16, #tpu.memory_space<vmem>>, vector<32x32xbf16>
    %cst_239 = arith.constant dense<0.000000e+00> : vector<8x32xf32>
    %515 = tpu.matmul %513, %514, %cst_239 {dimension_numbers = #tpu.dot_dimension_numbers<[1], [0], [0], [1], [0, 0, 1, 1], [], []>} : vector<8x32xbf16>, vector<32x32xbf16>, vector<8x32xf32> -> vector<8x32xf32>
    %c0_240 = arith.constant 0 : index
    %c0_241 = arith.constant 0 : index
    %516 = vector.load %arg20[%c0_240, %c0_241] : memref<1x32xf32, #tpu.memory_space<vmem>>, vector<1x32xf32>
    %517 = vector.broadcast %516 : vector<1x32xf32> to vector<8x32xf32>
    %518 = arith.addf %515, %517 : vector<8x32xf32>
    %cst_242 = arith.constant 0.000000e+00 : f32
    %519 = vector.broadcast %cst_242 : f32 to vector<8x32xf32>
    %520 = arith.maximumf %518, %519 : vector<8x32xf32>
    %521 = arith.index_cast %c5_i32_227 : i32 to index
    %c0_243 = arith.constant 0 : index
    %c0_244 = arith.constant 0 : index
    %522 = vector.load %arg28[%521, %c0_243, %c0_244] : memref<8x8x32xf32, #tpu.memory_space<vmem>>, vector<1x8x32xf32>
    %523 = vector.shape_cast %522 : vector<1x8x32xf32> to vector<8x32xf32>
    %524 = vector.shape_cast %520 : vector<8x32xf32> to vector<1x8x32xf32>
    tpu.vector_store %arg28[%521, %c0_243, %c0_244], %524 {strides = array<i32>} : memref<8x8x32xf32, #tpu.memory_space<vmem>>, vector<1x8x32xf32>,
    %c6_i32_245 = arith.constant 6 : i32
    %525 = arith.truncf %520 : vector<8x32xf32> to vector<8x32xbf16>
    %c0_246 = arith.constant 0 : index
    %c0_247 = arith.constant 0 : index
    %526 = vector.load %arg15[%c0_246, %c0_247] : memref<32x128xbf16, #tpu.memory_space<vmem>>, vector<32x128xbf16>
    %cst_248 = arith.constant dense<0.000000e+00> : vector<8x128xf32>
    %527 = tpu.matmul %525, %526, %cst_248 {dimension_numbers = #tpu.dot_dimension_numbers<[1], [0], [0], [1], [0, 0, 1, 1], [], []>} : vector<8x32xbf16>, vector<32x128xbf16>, vector<8x128xf32> -> vector<8x128xf32>
    %528 = arith.truncf %512 : vector<8x32xf32> to vector<8x32xbf16>
    %c0_249 = arith.constant 0 : index
    %c0_250 = arith.constant 0 : index
    %529 = vector.load %arg16[%c0_249, %c0_250] : memref<32x128xbf16, #tpu.memory_space<vmem>>, vector<32x128xbf16>
    %cst_251 = arith.constant dense<0.000000e+00> : vector<8x128xf32>
    %530 = tpu.matmul %528, %529, %cst_251 {dimension_numbers = #tpu.dot_dimension_numbers<[1], [0], [0], [1], [0, 0, 1, 1], [], []>} : vector<8x32xbf16>, vector<32x128xbf16>, vector<8x128xf32> -> vector<8x128xf32>
    %531 = arith.addf %527, %530 : vector<8x128xf32>
    %532 = arith.index_cast %c6_i32_245 : i32 to index
    %c0_252 = arith.constant 0 : index
    %c0_253 = arith.constant 0 : index
    %533 = vector.load %arg26[%532, %c0_252, %c0_253] : memref<8x8x128xf32, #tpu.memory_space<vmem>>, vector<1x8x128xf32>
    %534 = vector.shape_cast %533 : vector<1x8x128xf32> to vector<8x128xf32>
    %535 = arith.addf %531, %534 : vector<8x128xf32>
    %536 = arith.negf %535 : vector<8x128xf32>
    %537 = math.exp %536 : vector<8x128xf32>
    %cst_254 = arith.constant 1.000000e+00 : f32
    %538 = vector.broadcast %cst_254 : f32 to vector<8x128xf32>
    %539 = arith.addf %538, %537 : vector<8x128xf32>
    %540 = arith.divf %538, %539 : vector<8x128xf32>
    %541 = vector.extract_strided_slice %540 {offsets = [0, 0], sizes = [8, 32], strides = [1, 1]} : vector<8x128xf32> to vector<8x32xf32>
    %542 = vector.extract_strided_slice %540 {offsets = [0, 32], sizes = [8, 32], strides = [1, 1]} : vector<8x128xf32> to vector<8x32xf32>
    %543 = vector.extract_strided_slice %540 {offsets = [0, 96], sizes = [8, 32], strides = [1, 1]} : vector<8x128xf32> to vector<8x32xf32>
    %544 = vector.extract_strided_slice %535 {offsets = [0, 64], sizes = [8, 32], strides = [1, 1]} : vector<8x128xf32> to vector<8x32xf32>
    %545 = math.tanh %544 : vector<8x32xf32>
    %546 = arith.mulf %542, %510 : vector<8x32xf32>
    %547 = arith.mulf %541, %545 : vector<8x32xf32>
    %548 = arith.addf %546, %547 : vector<8x32xf32>
    %549 = math.tanh %548 : vector<8x32xf32>
    %550 = arith.mulf %543, %549 : vector<8x32xf32>
    %551 = arith.truncf %550 : vector<8x32xf32> to vector<8x32xbf16>
    %c0_255 = arith.constant 0 : index
    %c0_256 = arith.constant 0 : index
    %552 = vector.load %arg19[%c0_255, %c0_256] : memref<32x32xbf16, #tpu.memory_space<vmem>>, vector<32x32xbf16>
    %cst_257 = arith.constant dense<0.000000e+00> : vector<8x32xf32>
    %553 = tpu.matmul %551, %552, %cst_257 {dimension_numbers = #tpu.dot_dimension_numbers<[1], [0], [0], [1], [0, 0, 1, 1], [], []>} : vector<8x32xbf16>, vector<32x32xbf16>, vector<8x32xf32> -> vector<8x32xf32>
    %c0_258 = arith.constant 0 : index
    %c0_259 = arith.constant 0 : index
    %554 = vector.load %arg20[%c0_258, %c0_259] : memref<1x32xf32, #tpu.memory_space<vmem>>, vector<1x32xf32>
    %555 = vector.broadcast %554 : vector<1x32xf32> to vector<8x32xf32>
    %556 = arith.addf %553, %555 : vector<8x32xf32>
    %cst_260 = arith.constant 0.000000e+00 : f32
    %557 = vector.broadcast %cst_260 : f32 to vector<8x32xf32>
    %558 = arith.maximumf %556, %557 : vector<8x32xf32>
    %559 = arith.index_cast %c6_i32_245 : i32 to index
    %c0_261 = arith.constant 0 : index
    %c0_262 = arith.constant 0 : index
    %560 = vector.load %arg28[%559, %c0_261, %c0_262] : memref<8x8x32xf32, #tpu.memory_space<vmem>>, vector<1x8x32xf32>
    %561 = vector.shape_cast %560 : vector<1x8x32xf32> to vector<8x32xf32>
    %562 = vector.shape_cast %558 : vector<8x32xf32> to vector<1x8x32xf32>
    tpu.vector_store %arg28[%559, %c0_261, %c0_262], %562 {strides = array<i32>} : memref<8x8x32xf32, #tpu.memory_space<vmem>>, vector<1x8x32xf32>,
    %c7_i32_263 = arith.constant 7 : i32
    %563 = arith.truncf %558 : vector<8x32xf32> to vector<8x32xbf16>
    %c0_264 = arith.constant 0 : index
    %c0_265 = arith.constant 0 : index
    %564 = vector.load %arg15[%c0_264, %c0_265] : memref<32x128xbf16, #tpu.memory_space<vmem>>, vector<32x128xbf16>
    %cst_266 = arith.constant dense<0.000000e+00> : vector<8x128xf32>
    %565 = tpu.matmul %563, %564, %cst_266 {dimension_numbers = #tpu.dot_dimension_numbers<[1], [0], [0], [1], [0, 0, 1, 1], [], []>} : vector<8x32xbf16>, vector<32x128xbf16>, vector<8x128xf32> -> vector<8x128xf32>
    %566 = arith.truncf %550 : vector<8x32xf32> to vector<8x32xbf16>
    %c0_267 = arith.constant 0 : index
    %c0_268 = arith.constant 0 : index
    %567 = vector.load %arg16[%c0_267, %c0_268] : memref<32x128xbf16, #tpu.memory_space<vmem>>, vector<32x128xbf16>
    %cst_269 = arith.constant dense<0.000000e+00> : vector<8x128xf32>
    %568 = tpu.matmul %566, %567, %cst_269 {dimension_numbers = #tpu.dot_dimension_numbers<[1], [0], [0], [1], [0, 0, 1, 1], [], []>} : vector<8x32xbf16>, vector<32x128xbf16>, vector<8x128xf32> -> vector<8x128xf32>
    %569 = arith.addf %565, %568 : vector<8x128xf32>
    %570 = arith.index_cast %c7_i32_263 : i32 to index
    %c0_270 = arith.constant 0 : index
    %c0_271 = arith.constant 0 : index
    %571 = vector.load %arg26[%570, %c0_270, %c0_271] : memref<8x8x128xf32, #tpu.memory_space<vmem>>, vector<1x8x128xf32>
    %572 = vector.shape_cast %571 : vector<1x8x128xf32> to vector<8x128xf32>
    %573 = arith.addf %569, %572 : vector<8x128xf32>
    %574 = arith.negf %573 : vector<8x128xf32>
    %575 = math.exp %574 : vector<8x128xf32>
    %cst_272 = arith.constant 1.000000e+00 : f32
    %576 = vector.broadcast %cst_272 : f32 to vector<8x128xf32>
    %577 = arith.addf %576, %575 : vector<8x128xf32>
    %578 = arith.divf %576, %577 : vector<8x128xf32>
    %579 = vector.extract_strided_slice %578 {offsets = [0, 0], sizes = [8, 32], strides = [1, 1]} : vector<8x128xf32> to vector<8x32xf32>
    %580 = vector.extract_strided_slice %578 {offsets = [0, 32], sizes = [8, 32], strides = [1, 1]} : vector<8x128xf32> to vector<8x32xf32>
    %581 = vector.extract_strided_slice %578 {offsets = [0, 96], sizes = [8, 32], strides = [1, 1]} : vector<8x128xf32> to vector<8x32xf32>
    %582 = vector.extract_strided_slice %573 {offsets = [0, 64], sizes = [8, 32], strides = [1, 1]} : vector<8x128xf32> to vector<8x32xf32>
    %583 = math.tanh %582 : vector<8x32xf32>
    %584 = arith.mulf %580, %548 : vector<8x32xf32>
    %585 = arith.mulf %579, %583 : vector<8x32xf32>
    %586 = arith.addf %584, %585 : vector<8x32xf32>
    %587 = math.tanh %586 : vector<8x32xf32>
    %588 = arith.mulf %581, %587 : vector<8x32xf32>
    %589 = arith.truncf %588 : vector<8x32xf32> to vector<8x32xbf16>
    %c0_273 = arith.constant 0 : index
    %c0_274 = arith.constant 0 : index
    %590 = vector.load %arg19[%c0_273, %c0_274] : memref<32x32xbf16, #tpu.memory_space<vmem>>, vector<32x32xbf16>
    %cst_275 = arith.constant dense<0.000000e+00> : vector<8x32xf32>
    %591 = tpu.matmul %589, %590, %cst_275 {dimension_numbers = #tpu.dot_dimension_numbers<[1], [0], [0], [1], [0, 0, 1, 1], [], []>} : vector<8x32xbf16>, vector<32x32xbf16>, vector<8x32xf32> -> vector<8x32xf32>
    %c0_276 = arith.constant 0 : index
    %c0_277 = arith.constant 0 : index
    %592 = vector.load %arg20[%c0_276, %c0_277] : memref<1x32xf32, #tpu.memory_space<vmem>>, vector<1x32xf32>
    %593 = vector.broadcast %592 : vector<1x32xf32> to vector<8x32xf32>
    %594 = arith.addf %591, %593 : vector<8x32xf32>
    %cst_278 = arith.constant 0.000000e+00 : f32
    %595 = vector.broadcast %cst_278 : f32 to vector<8x32xf32>
    %596 = arith.maximumf %594, %595 : vector<8x32xf32>
    %597 = arith.index_cast %c7_i32_263 : i32 to index
    %c0_279 = arith.constant 0 : index
    %c0_280 = arith.constant 0 : index
    %598 = vector.load %arg28[%597, %c0_279, %c0_280] : memref<8x8x32xf32, #tpu.memory_space<vmem>>, vector<1x8x32xf32>
    %599 = vector.shape_cast %598 : vector<1x8x32xf32> to vector<8x32xf32>
    %600 = vector.shape_cast %596 : vector<8x32xf32> to vector<1x8x32xf32>
    tpu.vector_store %arg28[%597, %c0_279, %c0_280], %600 {strides = array<i32>} : memref<8x8x32xf32, #tpu.memory_space<vmem>>, vector<1x8x32xf32>,
    %c8_i32_281 = arith.constant 8 : i32
    %c0_282 = arith.constant 0 : index
    %c0_283 = arith.constant 0 : index
    %c0_284 = arith.constant 0 : index
    %601 = vector.load %arg28[%c0_282, %c0_283, %c0_284] : memref<8x8x32xf32, #tpu.memory_space<vmem>>, vector<8x8x32xf32>
    %602 = vector.shape_cast %601 : vector<8x8x32xf32> to vector<64x32xf32>
    %603 = arith.truncf %602 : vector<64x32xf32> to vector<64x32xbf16>
    %c0_285 = arith.constant 0 : index
    %c0_286 = arith.constant 0 : index
    %604 = vector.load %arg21[%c0_285, %c0_286] : memref<32x1xbf16, #tpu.memory_space<vmem>>, vector<32x1xbf16>
    %cst_287 = arith.constant dense<0.000000e+00> : vector<64x1xf32>
    %605 = tpu.matmul %603, %604, %cst_287 {dimension_numbers = #tpu.dot_dimension_numbers<[1], [0], [0], [1], [0, 0, 1, 1], [], []>} : vector<64x32xbf16>, vector<32x1xbf16>, vector<64x1xf32> -> vector<64x1xf32>
    %c0_288 = arith.constant 0 : index
    %c0_289 = arith.constant 0 : index
    %606 = vector.load %arg22[%c0_288, %c0_289] : memref<1x1xf32, #tpu.memory_space<vmem>>, vector<1x1xf32>
    %607 = vector.broadcast %606 : vector<1x1xf32> to vector<64x1xf32>
    %608 = arith.addf %605, %607 : vector<64x1xf32>
    %609 = vector.shape_cast %608 : vector<64x1xf32> to vector<8x8x1xf32>
    %c0_290 = arith.constant 0 : index
    %c0_291 = arith.constant 0 : index
    %c0_292 = arith.constant 0 : index
    %610 = vector.load %arg2[%c0_290, %c0_291, %c0_292] : memref<8x8x1xf32, #tpu.memory_space<vmem>>, vector<8x8x1xf32>
    %611 = arith.mulf %609, %610 : vector<8x8x1xf32>
    %c0_293 = arith.constant 0 : index
    %c0_294 = arith.constant 0 : index
    %c0_295 = arith.constant 0 : index
    %612 = vector.load %arg23[%c0_293, %c0_294, %c0_295] : memref<8x8x1xf32, #tpu.memory_space<vmem>>, vector<8x8x1xf32>
    tpu.vector_store %arg23[%c0_293, %c0_294, %c0_295], %611 {strides = array<i32>} : memref<8x8x1xf32, #tpu.memory_space<vmem>>, vector<8x8x1xf32>,
    return
  }
  func.func @transform_0(%arg0: i32) -> (i32, i32, i32) {
    %c0_i32 = arith.constant 0 : i32
    %c0_i32_0 = arith.constant 0 : i32
    %c0_i32_1 = arith.constant 0 : i32
    return %c0_i32, %arg0, %c0_i32_0 : i32, i32, i32
  }
  func.func @transform_1(%arg0: i32) -> (i32, i32, i32) {
    %c0_i32 = arith.constant 0 : i32
    %c0_i32_0 = arith.constant 0 : i32
    %c0_i32_1 = arith.constant 0 : i32
    return %c0_i32, %arg0, %c0_i32_0 : i32, i32, i32
  }
  func.func @transform_2(%arg0: i32) -> (i32, i32) {
    %c0_i32 = arith.constant 0 : i32
    %c0_i32_0 = arith.constant 0 : i32
    %c0_i32_1 = arith.constant 0 : i32
    return %c0_i32, %c0_i32_0 : i32, i32
  }
  func.func @transform_3(%arg0: i32) -> (i32, i32) {
    %c0_i32 = arith.constant 0 : i32
    %c0_i32_0 = arith.constant 0 : i32
    %c0_i32_1 = arith.constant 0 : i32
    return %c0_i32, %c0_i32_0 : i32, i32
  }
  func.func @transform_4(%arg0: i32) -> (i32, i32) {
    %c0_i32 = arith.constant 0 : i32
    %c0_i32_0 = arith.constant 0 : i32
    %c0_i32_1 = arith.constant 0 : i32
    return %c0_i32, %c0_i32_0 : i32, i32
  }
  func.func @transform_5(%arg0: i32) -> (i32, i32) {
    %c0_i32 = arith.constant 0 : i32
    %c0_i32_0 = arith.constant 0 : i32
    %c0_i32_1 = arith.constant 0 : i32
    return %c0_i32, %c0_i32_0 : i32, i32
  }
  func.func @transform_6(%arg0: i32) -> (i32, i32) {
    %c0_i32 = arith.constant 0 : i32
    %c0_i32_0 = arith.constant 0 : i32
    %c0_i32_1 = arith.constant 0 : i32
    return %c0_i32, %c0_i32_0 : i32, i32
  }
  func.func @transform_7(%arg0: i32) -> (i32, i32) {
    %c0_i32 = arith.constant 0 : i32
    %c0_i32_0 = arith.constant 0 : i32
    %c0_i32_1 = arith.constant 0 : i32
    return %c0_i32, %c0_i32_0 : i32, i32
  }
  func.func @transform_8(%arg0: i32) -> (i32, i32) {
    %c0_i32 = arith.constant 0 : i32
    %c0_i32_0 = arith.constant 0 : i32
    %c0_i32_1 = arith.constant 0 : i32
    return %c0_i32, %c0_i32_0 : i32, i32
  }
  func.func @transform_9(%arg0: i32) -> (i32, i32) {
    %c0_i32 = arith.constant 0 : i32
    %c0_i32_0 = arith.constant 0 : i32
    %c0_i32_1 = arith.constant 0 : i32
    return %c0_i32, %c0_i32_0 : i32, i32
  }
  func.func @transform_10(%arg0: i32) -> (i32, i32) {
    %c0_i32 = arith.constant 0 : i32
    %c0_i32_0 = arith.constant 0 : i32
    %c0_i32_1 = arith.constant 0 : i32
    return %c0_i32, %c0_i32_0 : i32, i32
  }
  func.func @transform_11(%arg0: i32) -> (i32, i32) {
    %c0_i32 = arith.constant 0 : i32
    %c0_i32_0 = arith.constant 0 : i32
    %c0_i32_1 = arith.constant 0 : i32
    return %c0_i32, %c0_i32_0 : i32, i32
  }
  func.func @transform_12(%arg0: i32) -> (i32, i32) {
    %c0_i32 = arith.constant 0 : i32
    %c0_i32_0 = arith.constant 0 : i32
    %c0_i32_1 = arith.constant 0 : i32
    return %c0_i32, %c0_i32_0 : i32, i32
  }
  func.func @transform_13(%arg0: i32) -> (i32, i32) {
    %c0_i32 = arith.constant 0 : i32
    %c0_i32_0 = arith.constant 0 : i32
    %c0_i32_1 = arith.constant 0 : i32
    return %c0_i32, %c0_i32_0 : i32, i32
  }
  func.func @transform_14(%arg0: i32) -> (i32, i32) {
    %c0_i32 = arith.constant 0 : i32
    %c0_i32_0 = arith.constant 0 : i32
    %c0_i32_1 = arith.constant 0 : i32
    return %c0_i32, %c0_i32_0 : i32, i32
  }
  func.func @transform_15(%arg0: i32) -> (i32, i32) {
    %c0_i32 = arith.constant 0 : i32
    %c0_i32_0 = arith.constant 0 : i32
    %c0_i32_1 = arith.constant 0 : i32
    return %c0_i32, %c0_i32_0 : i32, i32
  }
  func.func @transform_16(%arg0: i32) -> (i32, i32) {
    %c0_i32 = arith.constant 0 : i32
    %c0_i32_0 = arith.constant 0 : i32
    %c0_i32_1 = arith.constant 0 : i32
    return %c0_i32, %c0_i32_0 : i32, i32
  }
  func.func @transform_17(%arg0: i32) -> (i32, i32) {
    %c0_i32 = arith.constant 0 : i32
    %c0_i32_0 = arith.constant 0 : i32
    %c0_i32_1 = arith.constant 0 : i32
    return %c0_i32, %c0_i32_0 : i32, i32
  }
  func.func @transform_18(%arg0: i32) -> (i32, i32) {
    %c0_i32 = arith.constant 0 : i32
    %c0_i32_0 = arith.constant 0 : i32
    %c0_i32_1 = arith.constant 0 : i32
    return %c0_i32, %c0_i32_0 : i32, i32
  }
  func.func @transform_19(%arg0: i32) -> (i32, i32) {
    %c0_i32 = arith.constant 0 : i32
    %c0_i32_0 = arith.constant 0 : i32
    %c0_i32_1 = arith.constant 0 : i32
    return %c0_i32, %c0_i32_0 : i32, i32
  }
  func.func @transform_20(%arg0: i32) -> (i32, i32) {
    %c0_i32 = arith.constant 0 : i32
    %c0_i32_0 = arith.constant 0 : i32
    %c0_i32_1 = arith.constant 0 : i32
    return %c0_i32, %c0_i32_0 : i32, i32
  }
  func.func @transform_21(%arg0: i32) -> (i32, i32) {
    %c0_i32 = arith.constant 0 : i32
    %c0_i32_0 = arith.constant 0 : i32
    %c0_i32_1 = arith.constant 0 : i32
    return %c0_i32, %c0_i32_0 : i32, i32
  }
  func.func @transform_22(%arg0: i32) -> (i32, i32, i32) {
    %c0_i32 = arith.constant 0 : i32
    %c0_i32_0 = arith.constant 0 : i32
    %c0_i32_1 = arith.constant 0 : i32
    return %c0_i32, %arg0, %c0_i32_0 : i32, i32, i32
  }
}

</mosaic_0001>

<bundles_post_ra>
// kernel: tpu_custom_call.1
= control target key start
LH: loop header
LB: loop body
LE: loop exit
PB: predicated region body
PF: predicated region fallthrough
CT: control target
= control target key end

     0   :  { %s4345_s0 = inlined_call_operand.vmem [shape: f32[8,8,16], index: 0, kind: input, shape index: {}]   ;;  %s4346_s1 = inlined_call_operand.vmem [shape: f32[8,8,1], index: 1, kind: input, shape index: {}]   ;;  %s4347_s2 = inlined_call_operand.hbm [shape: bf16[16,32], index: 2, kind: input, shape index: {}]   ;;  %s4348_s3 = inlined_call_operand.hbm [shape: f32[1,32], index: 3, kind: input, shape index: {}]   ;;  %s4349_s4 = inlined_call_operand.vmem [shape: bf16[32,160], index: 4, kind: input, shape index: {}]   ;;  %s4350_s5 = inlined_call_operand.hbm [shape: f32[1,160], index: 5, kind: input, shape index: {}]   ;;  %s4351_s6 = inlined_call_operand.vmem [shape: bf16[32,3], index: 6, kind: input, shape index: {}]   ;;  %s4352_s7 = inlined_call_operand.hbm [shape: f32[1,3], index: 7, kind: input, shape index: {}]   ;;  %s4353_s8 = inlined_call_operand.vmem [shape: bf16[32,128], index: 8, kind: input, shape index: {}]   ;;  %s4354_s9 = inlined_call_operand.vmem [shape: f32[1,32], index: 9, kind: input, shape index: {}]   ;;  %s4355_s10 = inlined_call_operand.vmem [shape: f32[1,32], index: 10, kind: input, shape index: {}]   ;;  %s4356_s11 = inlined_call_operand.hbm [shape: bf16[32,128], index: 11, kind: input, shape index: {}]   ;;  %s4357_s12 = inlined_call_operand.vmem [shape: f32[1,128], index: 12, kind: input, shape index: {}]   ;;  %s4358_s13 = inlined_call_operand.vmem [shape: f32[1,128], index: 13, kind: input, shape index: {}]   ;;  %s4359_s14 = inlined_call_operand.hbm [shape: bf16[32,128], index: 14, kind: input, shape index: {}]   ;;  %s4360_s15 = inlined_call_operand.hbm [shape: bf16[32,128], index: 15, kind: input, shape index: {}]   ;;  %s4361_s16 = inlined_call_operand.vmem [shape: f32[1,32], index: 16, kind: input, shape index: {}]   ;;  %s4362_s17 = inlined_call_operand.vmem [shape: f32[1,32], index: 17, kind: input, shape index: {}]   ;;  %s4363_s18 = inlined_call_operand.hbm [shape: bf16[32,32], index: 18, kind: input, shape index: {}]   ;;  %s4364_s19 = inlined_call_operand.vmem [shape: f32[1,32], index: 19, kind: input, shape index: {}]   ;;  %s4365_s20 = inlined_call_operand.vmem [shape: bf16[32,1], index: 20, kind: input, shape index: {}]   ;;  %s4366_s21 = inlined_call_operand.<no memory space> [shape: f32[1,1], index: 21, kind: input, shape index: {}]   ;;  %s4367_s22 = inlined_call_operand.vmem [shape: f32[8,8,1], index: 22, kind: output, shape index: {}]  }
   0x1   :  { %4372 = sst [smem:[#allocation26_spill]] %s4345_s0  ;;  %v27_v0 = vstv %s4366_s21 }
   0x2   :  { %4373 = sst [smem:[#allocation27_spill]] %s4346_s1  ;;  %28 = vst [vmem:[#allocation7] sm:$0x1] %v27_v0 }
   0x3   :  { %4374 = sst [smem:[#allocation28_spill]] %s4347_s2 }
   0x4   :  { %4375 = sst [smem:[#allocation29_spill]] %s4348_s3 }
   0x5   :  { %4376 = sst [smem:[#allocation30_spill]] %s4349_s4 }
   0x6   :  { %4377 = sst [smem:[#allocation31_spill]] %s4350_s5 }
   0x7   :  { %4378 = sst [smem:[#allocation32_spill]] %s4351_s6 }
   0x8   :  { %29 = vsyncpa [#allocation9], 0 }
   0x9   :  { %30 = vsyncpa [#allocation11], 0 }
   0xa   :  { %31 = vsyncpa [#allocation14], 0 }
   0xb   :  { %32 = vsyncpa [#allocation17], 0  ;;  %s4379_s4 = sld [smem:[#allocation29_spill]] }
  0x11   :  { %s56_s0 = sshll.u32 %s4379_s4, 4  ;;  %s57_s0 = int_to_ptr.hbm [resolvable:$true] %s56_s0 }
  0x12   :  { %33 = vsyncpa [#allocation20], 0  ;;  %s3565_s23 = smov [#allocation10]   ;;  %s82_s6 = sshll.u32 %s4352_s7, 4  ;;  %s83_s6 = int_to_ptr.hbm [resolvable:$true] %s82_s6 }
  0x13   :  { %s58_s1 = sshll.u32 %s3565_s23, 4  ;;  %s3566_s21 = smov [#allocation13]   ;;  %s59_s1 = int_to_ptr.vmem [resolvable:$true] %s58_s1 }
  0x14   :  { %61 = dma.hbm_to_vmem [thread:$0]  %s57_s0, 16, %s59_s1, [#allocation11]  }
  0x15   :  { %s84_s25 = sshll.u32 %s3566_s21, 4  ;;  %s115_s27 = sshll.u32 %s4359_s14, 4  ;;  %s85_s25 = int_to_ptr.vmem [resolvable:$true] %s84_s25  ;;  %s116_s27 = int_to_ptr.hbm [resolvable:$true] %s115_s27 }
  0x16   :  { %87 = dma.hbm_to_vmem [thread:$0]  %s83_s6, 16, %s85_s25, [#allocation14]  }
  0x17   :  { %s3567_s3 = smov [#allocation16]   ;;  %s4380_s4 = sld [smem:[#allocation28_spill]] }
  0x18   :  { %s117_s28 = sshll.u32 %s3567_s3, 4  ;;  %s3568_s5 = smov 64   ;;  %s118_s28 = int_to_ptr.vmem [resolvable:$true] %s117_s28 }
  0x19   :  { %s3569_s7 = smov 4   ;;  %s3570_s0 = smov [#allocation8]  }
  0x1a   :  { %123 = dma.hbm_to_vmem [thread:$0]  %s116_s27, 256, %s118_s28, [#allocation17], %s3568_s5, %s3568_s5, %s3569_s7  }
  0x1b   :  { %s44_s1 = sshll.u32 %s3570_s0, 4  ;;  %s4381_s14 = sld [smem:[#allocation31_spill]]  ;;  %s45_s1 = int_to_ptr.vmem [resolvable:$true] %s44_s1 }
  0x1c   :  { %s98_s2 = sshll.u32 %s4356_s11, 4  ;;  %s3571_s3 = smov [#allocation12]   ;;  %s99_s2 = int_to_ptr.hbm [resolvable:$true] %s98_s2 }
  0x1d   :  { %s42_s23 = sshll.u32 %s4380_s4, 4  ;;  %s71_s29 = sshll.u32 %s3571_s3, 4  ;;  %s43_s23 = int_to_ptr.hbm [resolvable:$true] %s42_s23  ;;  %s72_s29 = int_to_ptr.vmem [resolvable:$true] %s71_s29 }
  0x1e   :  { %50 = dma.hbm_to_vmem [thread:$0]  %s43_s23, 128, %s45_s1, [#allocation9], %s3568_s5, %s3568_s5, %s3569_s7  }
  0x1f   :  { %s3572_s27 = smov [#allocation15]   ;;  %s128_s0 = sshll.u32 %s4360_s15, 4  ;;  %s129_s0 = int_to_ptr.hbm [resolvable:$true] %s128_s0 }
  0x20   :  { %s100_s28 = sshll.u32 %s3572_s27, 4  ;;  %s145_s11 = sshll.u32 %s4363_s18, 4  ;;  %s101_s28 = int_to_ptr.vmem [resolvable:$true] %s100_s28  ;;  %s146_s11 = int_to_ptr.hbm [resolvable:$true] %s145_s11 }
  0x21   :  { %s69_s21 = sshll.u32 %s4381_s14, 4  ;;  %s3573_s24 = smov [#allocation18]   ;;  %s70_s21 = int_to_ptr.hbm [resolvable:$true] %s69_s21 }
  0x22   :  { %74 = dma.hbm_to_vmem [thread:$0]  %s70_s21, 32, %s72_s29, [#allocation11]  }
  0x23   :  { %106 = dma.hbm_to_vmem [thread:$0]  %s99_s2, 256, %s101_s28, [#allocation14], %s3568_s5, %s3568_s5, %s3569_s7  }
  0x24   :  { %s130_s6 = sshll.u32 %s3573_s24, 4  ;;  %s3574_s14 = smov [#allocation19]   ;;  %s131_s6 = int_to_ptr.vmem [resolvable:$true] %s130_s6 }
  0x25   :  { %136 = dma.hbm_to_vmem [thread:$0]  %s129_s0, 256, %s131_s6, [#allocation17], %s3568_s5, %s3568_s5, %s3569_s7  }
  0x26   :  { %s147_s15 = sshll.u32 %s3574_s14, 4  ;;  %s148_s15 = int_to_ptr.vmem [resolvable:$true] %s147_s15 }
  0x27   :  { %153 = dma.hbm_to_vmem [thread:$0]  %s146_s11, 256, %s148_s15, [#allocation20], %s3568_s5, %s3568_s5, %s3569_s7  }
  0x28   :  { %3555 = dma.done.wait [#allocation9], 128  }
  0x29   :  { %3556 = vsyncadd [#allocation9], 4294967168 }
  0x2a   :  { %3557 = dma.done.wait [#allocation11], 48  }
  0x2b   :  { %3558 = vsyncadd [#allocation11], 4294967248 }
  0x2c   :  { %3559 = dma.done.wait [#allocation14], 272  }
  0x2d   :  { %3560 = vsyncadd [#allocation14], 4294967024 }
  0x2e   :  { %3561 = dma.done.wait [#allocation17], 512  }
  0x2f   :  { %3562 = vsyncadd [#allocation17], 4294966784 }
  0x30   :  { %3563 = dma.done.wait [#allocation20], 256  }
  0x31   :  { %3564 = vsyncadd [#allocation20], 4294967040  ;;  %v3090_v1 = vld [vmem:[#allocation8] sm:$0xff]  ;;  %s4382_s25 = sld [smem:[#allocation26_spill]]  ;;  %vm217_vm0 = vcmask 130048   ;;  %vm301_vm1 = vcmask 261120  }
  0x32   :  { %237 = vmatpush.bf16.msra.mxu0 %v3090_v1  ;;  %3165 = vmatpush.bf16.msra.mxu1 %v3090_v1  ;;  %s4383_s15 = sld [smem:[#allocation30_spill]]  ;;  %v3098_v17 = vld [vmem:[%s4353_s8 + $0x8] sm:$0xff]  ;;  %v3097_v18 = vld [vmem:[%s4353_s8] sm:$0xff]  ;;  %s3575_s3 = smov 32   ;;  %vm453_vm6 = vcmask 23552  }
  0x33   :  { %3166 = vmatpush.bf16.msra.mxu2 %v3090_v1  ;;  %3167 = vmatpush.bf16.msra.mxu3 %v3090_v1  ;;  %v3200_v24 = vld [vmem:[%s4354_s9] ss:$0 sm:$0xff]  ;;  %v3199_v31 = vld [vmem:[#allocation10] ss:$0 sm:$0xff]  ;;  %s4384_s21 = sld [smem:[#allocation32_spill]] }
  0x34   :  { %v524_v26 = vpack.c.bf16 %v3200_v24, %v3200_v24  ;;  %v275_v63 = vld [vmem:[#allocation12] sm:$0x3]  ;;  %s4385_s11 = sld [smem:[#allocation27_spill]] }
  0x35   :  { %v3812_v0 = vperm.slane %v275_v63, 0 }
  0x36   :  { %551 = vmatpush.bf16.msrb.mxu0 %v3098_v17 }
  0x37   :  { %v193_v2 = vld [vmem:[%s4382_s25] sm:$0xff]  ;;  %v194_v3 = vld [vmem:[%s4382_s25 + $0x8] sm:$0xff]  ;;  %v195_v5 = vld [vmem:[%s4382_s25 + $0x10] sm:$0xff] }
  0x38   :  { %v201_v4 = vpack.c.bf16 %v194_v3, %v193_v2  ;;  %v196_v6 = vld [vmem:[%s4382_s25 + $0x18] sm:$0xff]  ;;  %v197_v7 = vld [vmem:[%s4382_s25 + $0x20] sm:$0xff]  ;;  %v198_v9 = vld [vmem:[%s4382_s25 + $0x28] sm:$0xff] }
  0x39   :  { %v202_v8 = vpack.c.bf16 %v196_v6, %v195_v5  ;;  %v199_v10 = vld [vmem:[%s4382_s25 + $0x30] sm:$0xff]  ;;  %v200_v11 = vld [vmem:[%s4382_s25 + $0x38] sm:$0xff]  ;;  %v203_v12 = vpack.c.bf16 %v198_v9, %v197_v7  ;;  %v2729_v19 = vld [vmem:[%s4383_s15] sm:$0xf]  ;;  %v278_v5 = vperm.slane %v275_v63, 1 }
  0x3a   :  { %v204_v13 = vpack.c.bf16 %v200_v11, %v199_v10  ;;  %v2737_v14 = vld [vmem:[%s4383_s15 + $0x10] sm:$0xf]  ;;  %v3094_v15 = vld [vmem:[%s4383_s15 + $0x14] sm:$0xf0]  ;;  %2723 = vmatmul.msk.bf16.vlgmr.msra.gmra.mxu0 %vm217_vm0, %v201_v4  ;;  %v3092_v20 = vld [vmem:[%s4383_s15 + $0x4] sm:$0xf0] }
  0x3b   :  { %v2738_v16 = vor.u32 %v3094_v15, %v2737_v14  ;;  %2724 = vmatmul.msk.bf16.vlgmr.msra.gmra.mxu1 %vm217_vm0, %v202_v8  ;;  %2725 = vmatmul.msk.bf16.vlgmr.msra.gmra.mxu2 %vm217_vm0, %v203_v12  ;;  %v2730_v21 = vor.u32 %v3092_v20, %v2729_v19  ;;  %v3093_v22 = vld [vmem:[%s4383_s15 + $0x14] sm:$0xf]  ;;  %v2739_v23 = vld [vmem:[%s4383_s15 + $0x18] sm:$0xf0]  ;;  %v3091_v27 = vld [vmem:[%s4383_s15 + $0x4] sm:$0xf] }
  0x3c   :  { %2726 = vmatmul.msk.bf16.vlgmr.msra.gmra.mxu3 %vm217_vm0, %v204_v13  ;;  %552 = vmatpush.bf16.msrb.mxu0 %v3097_v18  ;;  %v2742_v25 = vor.u32 %v3093_v22, %v2739_v23  ;;  %v2731_v28 = vld [vmem:[%s4383_s15 + $0x8] sm:$0xf0]  ;;  %v3095_v62 = vld [vmem:[%s4384_s21] sm:$0xff] }
  0x3d   :  { %320 = vmatpush.bf16.msrb.mxu1 %v2738_v16  ;;  %v2734_v29 = vor.u32 %v3091_v27, %v2731_v28  ;;  %v3096_v61 = vld [vmem:[%s4384_s21 + $0x8] sm:$0xff]  ;;  %v3201_v10 = vld [vmem:[%s4355_s10] ss:$0 sm:$0xff] }
  0x3e   :  { %349 = vmatpush.bf16.msrb.mxu2 %v2742_v25  ;;  %430 = vmatpush.bf16.msrb.mxu3 %v3096_v61 }
  0x41   :  { %321 = vmatpush.bf16.msrb.mxu1 %v2730_v21 }
  0x42   :  { %350 = vmatpush.bf16.msrb.mxu2 %v2734_v29  ;;  %431 = vmatpush.bf16.msrb.mxu3 %v3095_v62 }
  0x4a   :  { %2771 = vmatmul.msk.bf16.vlgmr.msrb.gmra.mxu0 %vm301_vm1, %v524_v26 }
  0xb7   :  { %v239_v30 = vpop.f32.mrf.mxu0 }
  0xb8   :  { %v244_v32 = vpop.f32.mrf.mxu1  ;;  %v240_v33 = vadd.f32 %v3199_v31, %v239_v30 }
  0xb9   :  { %v245_v40 = vadd.f32 %v3199_v31, %v244_v32 }
  0xba   :  { %v259_v36 = vmax.f32 %v240_v33, 0.0 }
  0xbb   :  { %v261_v43 = vmax.f32 %v245_v40, 0.0 }
  0xbe   :  { %v249_v42 = vpop.f32.mrf.mxu2 }
  0xbf   :  { %v241_v34 = vpop.f32.mrf.mxu0  ;;  %v250_v47 = vadd.f32 %v3199_v31, %v249_v42  ;;  %v254_v49 = vpop.f32.mrf.mxu3 }
  0xc0   :  { %v242_v35 = vadd.f32 %v3199_v31, %v241_v34  ;;  %v246_v39 = vpop.f32.mrf.mxu1  ;;  %v255_v54 = vadd.f32 %v3199_v31, %v254_v49 }
  0xc1   :  { %v247_v41 = vadd.f32 %v3199_v31, %v246_v39  ;;  %v263_v50 = vmax.f32 %v250_v47, 0.0 }
  0xc2   :  { %v260_v37 = vmax.f32 %v242_v35, 0.0  ;;  %v265_v56 = vmax.f32 %v255_v54, 0.0  ;;  %v3202_v54 = vld [vmem:[#allocation13] ss:$0 sm:$0xff] }
  0xc3   :  { %v262_v44 = vmax.f32 %v247_v41, 0.0 }
  0xc4   :  { %v267_v38 = vpack.c.bf16 %v260_v37, %v259_v36 }
  0xc5   :  { %v268_v45 = vpack.c.bf16 %v262_v44, %v261_v43 }
  0xc6   :  { %2743 = vmatmul.msk.bf16.vlgmr.msrb.gmra.mxu1 %vm301_vm1, %v267_v38  ;;  %2747 = vmatmul.msk.bf16.vlgmr.msrb.gmra.mxu2 %vm301_vm1, %v267_v38  ;;  %v251_v46 = vpop.f32.mrf.mxu2 }
  0xc7   :  { %v252_v48 = vadd.f32 %v3199_v31, %v251_v46  ;;  %v256_v53 = vpop.f32.mrf.mxu3  ;;  %v554_v59 = vpop.f32.mrf.mxu0 }
  0xc8   :  { %v257_v55 = vadd.f32 %v3199_v31, %v256_v53 }
  0xc9   :  { %v264_v51 = vmax.f32 %v252_v48, 0.0 }
  0xca   :  { %v266_v57 = vmax.f32 %v257_v55, 0.0 }
  0xcb   :  { %v269_v52 = vpack.c.bf16 %v264_v51, %v263_v50 }
  0xcc   :  { %v270_v58 = vpack.c.bf16 %v266_v57, %v265_v56 }
  0xcf   :  { %v556_v60 = vpop.f32.mrf.mxu0 }
  0xd6   :  { %2748 = vmatmul.msk.bf16.gmra.mxu2 %vm301_vm1, %v268_v45  ;;  %2744 = vmatmul.msk.bf16.gmra.mxu1 %vm301_vm1, %v268_v45 }
  0xe6   :  { %2749 = vmatmul.msk.bf16.gmra.mxu2 %vm301_vm1, %v269_v52  ;;  %2745 = vmatmul.msk.bf16.gmra.mxu1 %vm301_vm1, %v269_v52 }
  0xf6   :  { %2750 = vmatmul.msk.bf16.gmra.mxu2 %vm301_vm1, %v270_v58  ;;  %2746 = vmatmul.msk.bf16.gmra.mxu1 %vm301_vm1, %v270_v58 }
 0x143   :  { %v323_v1 = vpop.f32.mrf.mxu1 }
 0x144   :  { %v324_v2 = vadd.f32 %v323_v1, %v3812_v0 }
 0x146   :  { %v555_v3 = vadd.f32 %v554_v59, %v324_v2 }
 0x148   :  { %3216 = vtanh.f32 %v555_v3  ;;  %v2772_v35 = vmul.f32 -1.442695, %v555_v3 }
 0x149   :  { %v352_v4 = vpop.f32.mrf.mxu2 }
 0x14a   :  { %v353_v7 = vadd.f32 %v352_v4, %v278_v5  ;;  %3218 = vpow2.f32 %v2772_v35 }
 0x14c   :  { %v380_v11 = vmax.f32 %v353_v7, 0.0 }
 0x14e   :  { %v3217_v6 = vpop.eup %3216 }
 0x14f   :  { %583 = vrot.lane.b32.xlu0 %v3217_v6, %s3568_s5 }
 0x150   :  { %v3219_v36 = vpop.eup %3218 }
 0x151   :  { %v354_v8 = vpop.f32.mrf.mxu2  ;;  %v561_v37 = vadd.f32 1.0, %v3219_v36 }
 0x152   :  { %v355_v9 = vadd.f32 %v354_v8, %v278_v5 }
 0x153   :  { %3220 = vrcp.f32 %v561_v37  ;;  %v573_v43 = vand.u32 2147483648, %v561_v37  ;;  %vm567_vm3 = vweird.f32 %v561_v37  ;;  %v571_v44 = vand.u32 2147483647, %v561_v37 }
 0x154   :  { %v381_v12 = vmax.f32 %v355_v9, 0.0 }
 0x155   :  { %v574_v46 = vor.u32 1.1754944e-38, %v573_v43  ;;  %vm572_vm5 = vcmp.eq.f32.partialorder %v571_v44, 8.507059e+37 }
 0x156   :  { %v388_v13 = vpack.c.bf16 %v381_v12, %v380_v11 }
 0x157   :  { %578 = vrot.lane.b32.xlu0 %v3201_v10, %s3575_s3 }
 0x158   :  { %2759 = vmatmul.msk.bf16.vlgmr.msrb.gmra.mxu3 %vm301_vm1, %v388_v13 }
 0x159   :  { %v357_v14 = vpop.f32.mrf.mxu2  ;;  %v3221_v38 = vpop.eup %3220 }
 0x15a   :  { %v358_v15 = vadd.f32 %v357_v14, %v278_v5  ;;  %v563_v39 = vmul.f32 %v3221_v38, %v561_v37  ;;  %vm568_vm2 = vweird.f32 %v3221_v38 }
 0x15b   :  { %vm569_vm4 = vmor %vm567_vm3, %vm568_vm2 }
 0x15c   :  { %v382_v17 = vmax.f32 %v358_v15, 0.0  ;;  %v564_v40 = vsub.f32 1.0, %v563_v39 }
 0x15e   :  { %v565_v41 = vmul.f32 %v3221_v38, %v564_v40 }
 0x160   :  { %v566_v42 = vadd.f32 %v3221_v38, %v565_v41 }
 0x161   :  { %v359_v16 = vpop.f32.mrf.mxu2 }
 0x162   :  { %v360_v18 = vadd.f32 %v359_v16, %v278_v5  ;;  %v570_v45 = vsel %vm569_vm4, %v3221_v38, %v566_v42 }
 0x163   :  { %v3824_v48 = vsel %vm572_vm5, %v574_v46, %v570_v45 }
 0x164   :  { %v383_v19 = vmax.f32 %v360_v18, 0.0 }
 0x166   :  { %v389_v20 = vpack.c.bf16 %v383_v19, %v382_v17 }
 0x168   :  { %2760 = vmatmul.msk.bf16.gmra.mxu3 %vm301_vm1, %v389_v20 }
 0x169   :  { %v362_v21 = vpop.f32.mrf.mxu2 }
 0x16a   :  { %v363_v22 = vadd.f32 %v362_v21, %v278_v5 }
 0x16c   :  { %v384_v24 = vmax.f32 %v363_v22, 0.0 }
 0x171   :  { %v364_v23 = vpop.f32.mrf.mxu2 }
 0x172   :  { %v365_v25 = vadd.f32 %v364_v23, %v278_v5 }
 0x174   :  { %v385_v26 = vmax.f32 %v365_v25, 0.0 }
 0x176   :  { %v390_v27 = vpack.c.bf16 %v385_v26, %v384_v24 }
 0x178   :  { %2761 = vmatmul.msk.bf16.gmra.mxu3 %vm301_vm1, %v390_v27 }
 0x179   :  { %v367_v28 = vpop.f32.mrf.mxu2 }
 0x17a   :  { %v368_v29 = vadd.f32 %v367_v28, %v278_v5 }
 0x17c   :  { %v386_v31 = vmax.f32 %v368_v29, 0.0 }
 0x181   :  { %v369_v30 = vpop.f32.mrf.mxu2 }
 0x182   :  { %v370_v32 = vadd.f32 %v369_v30, %v278_v5 }
 0x184   :  { %v387_v33 = vmax.f32 %v370_v32, 0.0 }
 0x186   :  { %v391_v34 = vpack.c.bf16 %v387_v33, %v386_v31 }
 0x188   :  { %2762 = vmatmul.msk.bf16.gmra.mxu3 %vm301_vm1, %v391_v34 }
 0x1c1   :  { %v584_v47 = vpop.permute.xlu0 %583 }
 0x1c2   :  { %v586_v49 = vmul.f32 %v584_v47, %v3824_v48 }
 0x1c4   :  { %588 = vrot.lane.b32.xlu1 %v586_v49, %s3575_s3 }
 0x1db   :  { %v433_v50 = vpop.f32.mrf.mxu3 }
 0x1dc   :  { %v434_v55 = vadd.f32 %v3202_v54, %v433_v50 }
 0x1de   :  { %v454_v58 = vsel %vm453_vm6, %v434_v55, -inf }
 0x1e3   :  { %v435_v51 = vpop.f32.mrf.mxu3 }
 0x1e4   :  { %v436_v61 = vadd.f32 %v3202_v54, %v435_v51 }
 0x1e6   :  { %v455_v1 = vsel %vm453_vm6, %v436_v61, -inf }
 0x1eb   :  { %v438_v52 = vpop.f32.mrf.mxu3 }
 0x1ec   :  { %v439_v4 = vadd.f32 %v3202_v54, %v438_v52  ;;  %v579_v52 = vpop.permute.xlu0 %578 }
 0x1ee   :  { %v456_v7 = vsel %vm453_vm6, %v439_v4, -inf }
 0x1f3   :  { %v440_v53 = vpop.f32.mrf.mxu3 }
 0x1f4   :  { %v441_v11 = vadd.f32 %v3202_v54, %v440_v53 }
 0x1f6   :  { %v457_v13 = vsel %vm453_vm6, %v441_v11, -inf }
 0x1fb   :  { %v443_v56 = vpop.f32.mrf.mxu3 }
 0x1fc   :  { %v444_v57 = vadd.f32 %v3202_v54, %v443_v56 }
 0x1fe   :  { %v458_v59 = vsel %vm453_vm6, %v444_v57, -inf }
 0x1ff   :  { %v459_v60 = vmax.f32 %v454_v58, %v458_v59 }
 0x203   :  { %v445_v62 = vpop.f32.mrf.mxu3 }
 0x204   :  { %v446_v63 = vadd.f32 %v3202_v54, %v445_v62 }
 0x206   :  { %v460_v2 = vsel %vm453_vm6, %v446_v63, -inf }
 0x207   :  { %v461_v3 = vmax.f32 %v455_v1, %v460_v2 }
 0x209   :  { %v466_v5 = vmax.f32 %v459_v60, %v461_v3 }
 0x20b   :  { %v448_v6 = vpop.f32.mrf.mxu3 }
 0x20c   :  { %v449_v8 = vadd.f32 %v3202_v54, %v448_v6 }
 0x20e   :  { %v462_v9 = vsel %vm453_vm6, %v449_v8, -inf }
 0x20f   :  { %v463_v10 = vmax.f32 %v456_v7, %v462_v9 }
 0x213   :  { %v450_v12 = vpop.f32.mrf.mxu3 }
 0x214   :  { %v451_v14 = vadd.f32 %v3202_v54, %v450_v12 }
 0x216   :  { %v464_v15 = vsel %vm453_vm6, %v451_v14, -inf }
 0x217   :  { %v465_v16 = vmax.f32 %v457_v13, %v464_v15 }
 0x219   :  { %v467_v17 = vmax.f32 %v463_v10, %v465_v16  ;;  %v3100_v10 = vld [vmem:[%s4353_s8 + $0x8] sm:$0xff]  ;;  %v325_v16 = vpop.f32.mrf.mxu1 }
 0x21a   :  { %634 = vmatpush.bf16.msra.mxu1 %v3100_v10 }
 0x21b   :  { %v468_v18 = vmax.f32 %v466_v5, %v467_v17 }
 0x21d   :  { %v469_v19 = vsub.f32 %v434_v55, %v468_v18  ;;  %v470_v20 = vsub.f32 %v436_v61, %v468_v18  ;;  %v471_v21 = vsub.f32 %v439_v4, %v468_v18  ;;  %v472_v22 = vsub.f32 %v441_v11, %v468_v18  ;;  %v3099_v11 = vld [vmem:[%s4353_s8] sm:$0xff] }
 0x21e   :  { %v473_v23 = vsub.f32 %v444_v57, %v468_v18  ;;  %v474_v24 = vsub.f32 %v446_v63, %v468_v18  ;;  %v475_v25 = vsub.f32 %v449_v8, %v468_v18  ;;  %v476_v31 = vsub.f32 %v451_v14, %v468_v18  ;;  %635 = vmatpush.bf16.msra.mxu1 %v3099_v11 }
 0x21f   :  { %v477_v26 = vmul.f32 1.442695, %v469_v19  ;;  %v479_v27 = vmul.f32 1.442695, %v470_v20  ;;  %v481_v28 = vmul.f32 1.442695, %v471_v21  ;;  %v581_v57 = vmul.f32 %v579_v52, %v3824_v48 }
 0x220   :  { %v483_v29 = vmul.f32 1.442695, %v472_v22  ;;  %v485_v30 = vmul.f32 1.442695, %v473_v23  ;;  %v487_v32 = vmul.f32 1.442695, %v474_v24  ;;  %v326_v22 = vadd.f32 %v325_v16, %v3812_v0 }
 0x221   :  { %3222 = vpow2.f32 %v477_v26  ;;  %v489_v33 = vmul.f32 1.442695, %v475_v25  ;;  %v491_v36 = vmul.f32 1.442695, %v476_v31  ;;  %v328_v17 = vpop.f32.mrf.mxu1 }
 0x222   :  { %3224 = vpow2.f32 %v479_v27 }
 0x223   :  { %3226 = vpow2.f32 %v481_v28 }
 0x224   :  { %3228 = vpow2.f32 %v483_v29 }
 0x225   :  { %3230 = vpow2.f32 %v485_v30 }
 0x226   :  { %3232 = vpow2.f32 %v487_v32 }
 0x227   :  { %v3223_v34 = vpop.eup %3222  ;;  %3234 = vpow2.f32 %v489_v33 }
 0x228   :  { %v3225_v35 = vpop.eup %3224  ;;  %v493_v37 = vsel %vm453_vm6, %v3223_v34, 0.0  ;;  %3236 = vpow2.f32 %v491_v36 }
 0x229   :  { %v3227_v38 = vpop.eup %3226  ;;  %v494_v39 = vsel %vm453_vm6, %v3225_v35, 0.0  ;;  %v3875_v18 = vpop.f32.mrf.mxu1 }
 0x22a   :  { %v3229_v40 = vpop.eup %3228  ;;  %v495_v41 = vadd.f32 %v494_v39, %v493_v37  ;;  %v496_v42 = vsel %vm453_vm6, %v3227_v38, 0.0 }
 0x22b   :  { %v3231_v43 = vpop.eup %3230  ;;  %v498_v45 = vsel %vm453_vm6, %v3229_v40, 0.0 }
 0x22c   :  { %v497_v44 = vadd.f32 %v496_v42, %v495_v41  ;;  %v3233_v46 = vpop.eup %3232  ;;  %v500_v49 = vsel %vm453_vm6, %v3231_v43, 0.0 }
 0x22d   :  { %v3235_v50 = vpop.eup %3234  ;;  %v502_v53 = vsel %vm453_vm6, %v3233_v46, 0.0 }
 0x22e   :  { %v499_v47 = vadd.f32 %v498_v45, %v497_v44  ;;  %v3237_v54 = vpop.eup %3236  ;;  %v504_v56 = vsel %vm453_vm6, %v3235_v50, 0.0 }
 0x22f   :  { %v506_v59 = vsel %vm453_vm6, %v3237_v54, 0.0 }
 0x230   :  { %v501_v51 = vadd.f32 %v500_v49, %v499_v47  ;;  %v3101_v47 = vld [vmem:[%s4353_s8] sm:$0xff] }
 0x231   :  { %v3877_v19 = vpop.f32.mrf.mxu1 }
 0x232   :  { %v503_v55 = vadd.f32 %v502_v53, %v501_v51  ;;  %v329_v53 = vadd.f32 %v328_v17, %v3812_v0 }
 0x234   :  { %v505_v58 = vadd.f32 %v504_v56, %v503_v55 }
 0x236   :  { %v589_v60 = vpop.permute.xlu1 %588  ;;  %v507_v62 = vadd.f32 %v506_v59, %v505_v58 }
 0x237   :  { %v591_v61 = vadd.f32 %v589_v60, %v581_v57 }
 0x239   :  { %3238 = vtanh.f32 %v591_v61  ;;  %v3879_v20 = vpop.f32.mrf.mxu1 }
 0x23a   :  { %3240 = vrcp.f32 %v507_v62 }
 0x23f   :  { %v3239_v63 = vpop.eup %3238 }
 0x240   :  { %v3241_v1 = vpop.eup %3240  ;;  %594 = vrot.lane.b32.xlu1 %v3239_v63, %s3568_s5 }
 0x241   :  { %v3846_v2 = vmul.f32 %v3241_v1, %v3225_v35  ;;  %v3848_v3 = vmul.f32 %v3241_v1, %v3223_v34  ;;  %v3850_v4 = vmul.f32 %v3241_v1, %v3229_v40  ;;  %v3852_v5 = vmul.f32 %v3241_v1, %v3227_v38  ;;  %v3881_v21 = vpop.f32.mrf.mxu1 }
 0x242   :  { %v3854_v6 = vmul.f32 %v3241_v1, %v3233_v46  ;;  %v3856_v7 = vmul.f32 %v3241_v1, %v3231_v43  ;;  %v3858_v8 = vmul.f32 %v3241_v1, %v3235_v50  ;;  %v3860_v9 = vmul.f32 %v3241_v1, %v3237_v54  ;;  %v3102_v46 = vld [vmem:[%s4353_s8 + $0x8] sm:$0xff] }
 0x243   :  { %715 = vmatpush.bf16.msra.mxu2 %v3102_v46 }
 0x247   :  { %716 = vmatpush.bf16.msra.mxu2 %v3101_v47 }
 0x2b2   :  { %v595_v12 = vpop.permute.xlu1 %594 }
 0x2b3   :  { %v3869_v13 = vmul.f32 %v595_v12, %v3824_v48  ;;  %v3883_v48 = vpop.f32.mrf.mxu1 }
 0x2b5   :  { %v603_v14 = vpack.c.bf16 %v3869_v13, %v3869_v13 }
 0x2b7   :  { %611 = vrot.lane.b32.xlu2 %v603_v14, %s3575_s3 }
 0x311   :  { %v612_v15 = vpop.permute.xlu2 %611 }
 0x312   :  { %2781 = vmatmul.msk.bf16.vlgmr.msra.gmra.mxu1 %vm301_vm1, %v612_v15 }
 0x38f   :  { %v637_v23 = vpop.f32.mrf.mxu1 }
 0x390   :  { %v638_v24 = vadd.f32 %v637_v23, %v326_v22 }
 0x392   :  { %3242 = vtanh.f32 %v638_v24  ;;  %v2782_v27 = vmul.f32 -1.442695, %v638_v24 }
 0x394   :  { %3244 = vpow2.f32 %v2782_v27  ;;  %v3104_v27 = vld [vmem:[%s4353_s8 + $0x8] sm:$0xff] }
 0x395   :  { %796 = vmatpush.bf16.msra.mxu3 %v3104_v27 }
 0x397   :  { %v639_v25 = vpop.f32.mrf.mxu1 }
 0x398   :  { %v3243_v26 = vpop.eup %3242 }
 0x399   :  { %663 = vrot.lane.b32.xlu2 %v3243_v26, %s3568_s5 }
 0x39a   :  { %v3245_v28 = vpop.eup %3244 }
 0x39b   :  { %v644_v29 = vadd.f32 1.0, %v3245_v28  ;;  %v3103_v28 = vld [vmem:[%s4353_s8] sm:$0xff] }
 0x39c   :  { %797 = vmatpush.bf16.msra.mxu3 %v3103_v28 }
 0x39d   :  { %3246 = vrcp.f32 %v644_v29  ;;  %v656_v35 = vand.u32 2147483648, %v644_v29  ;;  %vm650_vm8 = vweird.f32 %v644_v29  ;;  %v654_v36 = vand.u32 2147483647, %v644_v29 }
 0x39f   :  { %v657_v38 = vor.u32 1.1754944e-38, %v656_v35  ;;  %vm655_vm10 = vcmp.eq.f32.partialorder %v654_v36, 8.507059e+37 }
 0x3a3   :  { %v3247_v30 = vpop.eup %3246 }
 0x3a4   :  { %v646_v31 = vmul.f32 %v3247_v30, %v644_v29  ;;  %vm651_vm7 = vweird.f32 %v3247_v30 }
 0x3a5   :  { %vm652_vm9 = vmor %vm650_vm8, %vm651_vm7 }
 0x3a6   :  { %v647_v32 = vsub.f32 1.0, %v646_v31 }
 0x3a8   :  { %v648_v33 = vmul.f32 %v3247_v30, %v647_v32 }
 0x3aa   :  { %v649_v34 = vadd.f32 %v3247_v30, %v648_v33  ;;  %v331_v33 = vadd.f32 %v3875_v18, %v3812_v0 }
 0x3ac   :  { %v653_v37 = vsel %vm652_vm9, %v3247_v30, %v649_v34 }
 0x3ad   :  { %v658_v40 = vsel %vm655_vm10, %v657_v38, %v653_v37 }
 0x3ae   :  { %v661_v42 = vmul.f32 %v658_v40, %v591_v61 }
 0x3f3   :  { %v664_v39 = vpop.permute.xlu2 %663 }
 0x3f4   :  { %v666_v41 = vmul.f32 %v664_v39, %v658_v40 }
 0x3f6   :  { %668 = vrot.lane.b32.xlu0 %v666_v41, %s3575_s3 }
 0x468   :  { %v669_v43 = vpop.permute.xlu0 %668 }
 0x469   :  { %v671_v44 = vadd.f32 %v669_v43, %v661_v42 }
 0x46b   :  { %3248 = vtanh.f32 %v671_v44 }
 0x471   :  { %v3249_v45 = vpop.eup %3248 }
 0x472   :  { %674 = vrot.lane.b32.xlu1 %v3249_v45, %s3568_s5 }
 0x4e4   :  { %v675_v49 = vpop.permute.xlu1 %674 }
 0x4e5   :  { %v3895_v50 = vmul.f32 %v675_v49, %v658_v40 }
 0x4e7   :  { %v684_v51 = vpack.c.bf16 %v3895_v50, %v3895_v50 }
 0x4e9   :  { %692 = vrot.lane.b32.xlu2 %v684_v51, %s3575_s3 }
 0x543   :  { %v693_v52 = vpop.permute.xlu2 %692 }
 0x544   :  { %2791 = vmatmul.msk.bf16.vlgmr.msra.gmra.mxu2 %vm301_vm1, %v693_v52 }
 0x5c7   :  { %v718_v54 = vpop.f32.mrf.mxu2 }
 0x5c8   :  { %v719_v55 = vadd.f32 %v718_v54, %v329_v53 }
 0x5ca   :  { %3250 = vtanh.f32 %v719_v55  ;;  %v2792_v58 = vmul.f32 -1.442695, %v719_v55 }
 0x5cc   :  { %3252 = vpow2.f32 %v2792_v58  ;;  %v3106_v58 = vld [vmem:[%s4353_s8 + $0x8] sm:$0xff] }
 0x5cd   :  { %877 = vmatpush.bf16.msra.mxu0 %v3106_v58 }
 0x5cf   :  { %v720_v56 = vpop.f32.mrf.mxu2 }
 0x5d0   :  { %v3251_v57 = vpop.eup %3250 }
 0x5d1   :  { %744 = vrot.lane.b32.xlu0 %v3251_v57, %s3568_s5 }
 0x5d2   :  { %v3253_v59 = vpop.eup %3252 }
 0x5d3   :  { %v725_v60 = vadd.f32 1.0, %v3253_v59  ;;  %v3105_v59 = vld [vmem:[%s4353_s8] sm:$0xff] }
 0x5d4   :  { %878 = vmatpush.bf16.msra.mxu0 %v3105_v59 }
 0x5d5   :  { %3254 = vrcp.f32 %v725_v60  ;;  %v737_v11 = vand.u32 2147483648, %v725_v60  ;;  %vm731_vm12 = vweird.f32 %v725_v60  ;;  %v735_v12 = vand.u32 2147483647, %v725_v60 }
 0x5d7   :  { %v738_v15 = vor.u32 1.1754944e-38, %v737_v11  ;;  %vm736_vm14 = vcmp.eq.f32.partialorder %v735_v12, 8.507059e+37 }
 0x5db   :  { %v3255_v61 = vpop.eup %3254 }
 0x5dc   :  { %v727_v62 = vmul.f32 %v3255_v61, %v725_v60  ;;  %vm732_vm11 = vweird.f32 %v3255_v61 }
 0x5dd   :  { %vm733_vm13 = vmor %vm731_vm12, %vm732_vm11 }
 0x5de   :  { %v728_v63 = vsub.f32 1.0, %v727_v62 }
 0x5e0   :  { %v729_v1 = vmul.f32 %v3255_v61, %v728_v63 }
 0x5e2   :  { %v730_v10 = vadd.f32 %v3255_v61, %v729_v1  ;;  %v334_v1 = vadd.f32 %v3877_v19, %v3812_v0 }
 0x5e4   :  { %v734_v14 = vsel %vm733_vm13, %v3255_v61, %v730_v10 }
 0x5e5   :  { %v739_v17 = vsel %vm736_vm14, %v738_v15, %v734_v14 }
 0x5e6   :  { %v742_v23 = vmul.f32 %v739_v17, %v671_v44 }
 0x643   :  { %v745_v16 = vpop.permute.xlu0 %744 }
 0x644   :  { %v747_v22 = vmul.f32 %v745_v16, %v739_v17 }
 0x646   :  { %749 = vrot.lane.b32.xlu1 %v747_v22, %s3575_s3 }
 0x6b8   :  { %v750_v24 = vpop.permute.xlu1 %749 }
 0x6b9   :  { %v752_v25 = vadd.f32 %v750_v24, %v742_v23 }
 0x6bb   :  { %3256 = vtanh.f32 %v752_v25 }
 0x6c1   :  { %v3257_v26 = vpop.eup %3256 }
 0x6c2   :  { %755 = vrot.lane.b32.xlu2 %v3257_v26, %s3568_s5 }
 0x71c   :  { %v756_v29 = vpop.permute.xlu2 %755 }
 0x71d   :  { %v3911_v30 = vmul.f32 %v756_v29, %v739_v17 }
 0x71f   :  { %v765_v31 = vpack.c.bf16 %v3911_v30, %v3911_v30 }
 0x721   :  { %773 = vrot.lane.b32.xlu0 %v765_v31, %s3575_s3 }
 0x793   :  { %v774_v32 = vpop.permute.xlu0 %773 }
 0x794   :  { %2801 = vmatmul.msk.bf16.vlgmr.msra.gmra.mxu3 %vm301_vm1, %v774_v32 }
 0x817   :  { %v799_v34 = vpop.f32.mrf.mxu3 }
 0x818   :  { %v800_v35 = vadd.f32 %v799_v34, %v331_v33 }
 0x81a   :  { %3258 = vtanh.f32 %v800_v35  ;;  %v2802_v38 = vmul.f32 -1.442695, %v800_v35 }
 0x81c   :  { %3260 = vpow2.f32 %v2802_v38  ;;  %v3108_v38 = vld [vmem:[%s4353_s8 + $0x8] sm:$0xff] }
 0x81d   :  { %958 = vmatpush.bf16.msrb.mxu1 %v3108_v38 }
 0x81f   :  { %v801_v36 = vpop.f32.mrf.mxu3 }
 0x820   :  { %v3259_v37 = vpop.eup %3258 }
 0x821   :  { %825 = vrot.lane.b32.xlu1 %v3259_v37, %s3568_s5 }
 0x822   :  { %v3261_v39 = vpop.eup %3260 }
 0x823   :  { %v806_v40 = vadd.f32 1.0, %v3261_v39  ;;  %v3107_v39 = vld [vmem:[%s4353_s8] sm:$0xff] }
 0x824   :  { %959 = vmatpush.bf16.msrb.mxu1 %v3107_v39  ;;  %v3116_v39 = vld [vmem:[#allocation16 + $0x8] sm:$0xff] }
 0x825   :  { %3262 = vrcp.f32 %v806_v40  ;;  %v818_v46 = vand.u32 2147483648, %v806_v40  ;;  %vm812_vm0 = vweird.f32 %v806_v40  ;;  %v816_v18 = vand.u32 2147483647, %v806_v40 }
 0x827   :  { %v819_v49 = vor.u32 1.1754944e-38, %v818_v46  ;;  %vm817_vm3 = vcmp.eq.f32.partialorder %v816_v18, 8.507059e+37 }
 0x82b   :  { %v3263_v41 = vpop.eup %3262 }
 0x82c   :  { %v808_v42 = vmul.f32 %v3263_v41, %v806_v40  ;;  %vm813_vm15 = vweird.f32 %v3263_v41 }
 0x82d   :  { %vm814_vm2 = vmor %vm812_vm0, %vm813_vm15 }
 0x82e   :  { %v809_v43 = vsub.f32 1.0, %v808_v42 }
 0x830   :  { %v810_v44 = vmul.f32 %v3263_v41, %v809_v43 }
 0x832   :  { %v811_v45 = vadd.f32 %v3263_v41, %v810_v44  ;;  %v336_v44 = vadd.f32 %v3879_v20, %v3812_v0 }
 0x834   :  { %v815_v47 = vsel %vm814_vm2, %v3263_v41, %v811_v45 }
 0x835   :  { %v820_v52 = vsel %vm817_vm3, %v819_v49, %v815_v47 }
 0x836   :  { %v823_v54 = vmul.f32 %v820_v52, %v752_v25 }
 0x893   :  { %v826_v51 = vpop.permute.xlu1 %825 }
 0x894   :  { %v828_v53 = vmul.f32 %v826_v51, %v820_v52 }
 0x896   :  { %830 = vrot.lane.b32.xlu2 %v828_v53, %s3575_s3 }
 0x8f0   :  { %v831_v55 = vpop.permute.xlu2 %830 }
 0x8f1   :  { %v833_v56 = vadd.f32 %v831_v55, %v823_v54  ;;  %v3576_v54 = vmov 1  }
 0x8f2   :  { %3183 = vset.pattern.permute.xlu1 %v3576_v54 }
 0x8f3   :  { %3264 = vtanh.f32 %v833_v56 }
 0x8f9   :  { %v3265_v57 = vpop.eup %3264 }
 0x8fa   :  { %836 = vrot.lane.b32.xlu0 %v3265_v57, %s3568_s5 }
 0x96c   :  { %v837_v60 = vpop.permute.xlu0 %836 }
 0x96d   :  { %v3928_v61 = vmul.f32 %v837_v60, %v820_v52 }
 0x96f   :  { %v846_v62 = vpack.c.bf16 %v3928_v61, %v3928_v61 }
 0x971   :  { %854 = vrot.lane.b32.xlu1 %v846_v62, %s3575_s3 }
 0x9e3   :  { %v855_v63 = vpop.permute.xlu1 %854 }
 0x9e4   :  { %2811 = vmatmul.msk.bf16.vlgmr.msra.gmra.mxu0 %vm301_vm1, %v855_v63 }
 0xa61   :  { %v880_v10 = vpop.f32.mrf.mxu0 }
 0xa62   :  { %v881_v11 = vadd.f32 %v880_v10, %v334_v1 }
 0xa64   :  { %3266 = vtanh.f32 %v881_v11  ;;  %v2812_v15 = vmul.f32 -1.442695, %v881_v11  ;;  %v3577_v11 = vmov 0  }
 0xa65   :  { %3182 = vset.pattern.permute.xlu2 %v3577_v11  ;;  %3184 = vset.pattern.permute.xlu0 %v3577_v11 }
 0xa66   :  { %3268 = vpow2.f32 %v2812_v15 }
 0xa69   :  { %v882_v12 = vpop.f32.mrf.mxu0 }
 0xa6a   :  { %v3267_v14 = vpop.eup %3266 }
 0xa6b   :  { %906 = vrot.lane.b32.xlu2 %v3267_v14, %s3568_s5 }
 0xa6c   :  { %v3269_v16 = vpop.eup %3268 }
 0xa6d   :  { %v887_v17 = vadd.f32 1.0, %v3269_v16 }
 0xa6f   :  { %3270 = vrcp.f32 %v887_v17  ;;  %v899_v27 = vand.u32 2147483648, %v887_v17  ;;  %vm893_vm5 = vweird.f32 %v887_v17  ;;  %v897_v19 = vand.u32 2147483647, %v887_v17 }
 0xa71   :  { %v900_v29 = vor.u32 1.1754944e-38, %v899_v27  ;;  %vm898_vm7 = vcmp.eq.f32.partialorder %v897_v19, 8.507059e+37 }
 0xa75   :  { %v3271_v22 = vpop.eup %3270 }
 0xa76   :  { %v889_v23 = vmul.f32 %v3271_v22, %v887_v17  ;;  %vm894_vm4 = vweird.f32 %v3271_v22 }
 0xa77   :  { %vm895_vm6 = vmor %vm893_vm5, %vm894_vm4 }
 0xa78   :  { %v890_v24 = vsub.f32 1.0, %v889_v23  ;;  %v3110_v23 = vld [vmem:[%s4353_s8 + $0x8] sm:$0xff] }
 0xa79   :  { %1039 = vmatpush.bf16.msrb.mxu2 %v3110_v23 }
 0xa7a   :  { %v891_v25 = vmul.f32 %v3271_v22, %v890_v24 }
 0xa7c   :  { %v892_v26 = vadd.f32 %v3271_v22, %v891_v25 }
 0xa7e   :  { %v896_v28 = vsel %vm895_vm6, %v3271_v22, %v892_v26  ;;  %v3113_v22 = vld [vmem:[#allocation15] sm:$0xff] }
 0xa7f   :  { %v901_v32 = vsel %vm898_vm7, %v900_v29, %v896_v28 }
 0xa80   :  { %v904_v34 = vmul.f32 %v901_v32, %v833_v56 }
 0xac5   :  { %v907_v31 = vpop.permute.xlu2 %906 }
 0xac6   :  { %v909_v33 = vmul.f32 %v907_v31, %v901_v32 }
 0xac8   :  { %911 = vrot.lane.b32.xlu0 %v909_v33, %s3575_s3 }
 0xb3a   :  { %v912_v35 = vpop.permute.xlu0 %911 }
 0xb3b   :  { %v914_v36 = vadd.f32 %v912_v35, %v904_v34 }
 0xb3d   :  { %3272 = vtanh.f32 %v914_v36 }
 0xb43   :  { %v3273_v37 = vpop.eup %3272 }
 0xb44   :  { %917 = vrot.lane.b32.xlu1 %v3273_v37, %s3568_s5 }
 0xbb6   :  { %v918_v40 = vpop.permute.xlu1 %917 }
 0xbb7   :  { %v3945_v41 = vmul.f32 %v918_v40, %v901_v32  ;;  %v3118_v40 = vld [vmem:[#allocation18 + $0x8] sm:$0xff] }
 0xbb8   :  { %1478 = vmatpush.bf16.msra.mxu1 %v3118_v40 }
 0xbb9   :  { %v927_v42 = vpack.c.bf16 %v3945_v41, %v3945_v41 }
 0xbbb   :  { %935 = vrot.lane.b32.xlu2 %v927_v42, %s3575_s3  ;;  %v3203_v42 = vld [vmem:[%s4361_s16] ss:$0 sm:$0xff] }
 0xc15   :  { %v936_v43 = vpop.permute.xlu2 %935 }
 0xc16   :  { %2821 = vmatmul.msk.bf16.vlgmr.msrb.gmra.mxu1 %vm301_vm1, %v936_v43  ;;  %v3115_v43 = vld [vmem:[#allocation16] sm:$0xff] }
 0xc93   :  { %v961_v45 = vpop.f32.mrf.mxu1 }
 0xc94   :  { %v962_v46 = vadd.f32 %v961_v45, %v336_v44  ;;  %v3117_v44 = vld [vmem:[#allocation18] sm:$0xff]  ;;  %v1452_v45 = vpack.c.bf16 %v3203_v42, %v3203_v42 }
 0xc95   :  { %1479 = vmatpush.bf16.msra.mxu1 %v3117_v44 }
 0xc96   :  { %3274 = vtanh.f32 %v962_v46  ;;  %v2822_v49 = vmul.f32 -1.442695, %v962_v46 }
 0xc98   :  { %3276 = vpow2.f32 %v2822_v49  ;;  %2863 = vmatmul.msk.bf16.vlgmr.msra.gmra.mxu1 %vm301_vm1, %v1452_v45  ;;  %v339_v49 = vadd.f32 %v3881_v21, %v3812_v0  ;;  %v3206_v21 = vld [vmem:[%s4362_s17] ss:$0 sm:$0xff] }
 0xc9b   :  { %v963_v18 = vpop.f32.mrf.mxu1 }
 0xc9c   :  { %v3275_v47 = vpop.eup %3274 }
 0xc9d   :  { %987 = vrot.lane.b32.xlu0 %v3275_v47, %s3568_s5 }
 0xc9e   :  { %v3277_v51 = vpop.eup %3276 }
 0xc9f   :  { %v968_v52 = vadd.f32 1.0, %v3277_v51 }
 0xca1   :  { %3278 = vrcp.f32 %v968_v52  ;;  %v980_v58 = vand.u32 2147483648, %v968_v52  ;;  %vm974_vm9 = vweird.f32 %v968_v52  ;;  %v978_v59 = vand.u32 2147483647, %v968_v52 }
 0xca3   :  { %vm979_vm11 = vcmp.eq.f32.partialorder %v978_v59, 8.507059e+37 }
 0xca5   :  { %679 = vrot.lane.b32.xlu0 %v3895_v50, %s3575_s3  ;;  %v981_v50 = vor.u32 1.1754944e-38, %v980_v58  ;;  %v3205_v58 = vld [vmem:[%s4358_s13] ss:$0 sm:$0xff] }
 0xca7   :  { %v3279_v53 = vpop.eup %3278 }
 0xca8   :  { %v970_v20 = vmul.f32 %v3279_v53, %v968_v52  ;;  %vm975_vm8 = vweird.f32 %v3279_v53 }
 0xca9   :  { %vm976_vm10 = vmor %vm974_vm9, %vm975_vm8 }
 0xcaa   :  { %v971_v55 = vsub.f32 1.0, %v970_v20 }
 0xcac   :  { %v972_v56 = vmul.f32 %v3279_v53, %v971_v55  ;;  %v4006_v55 = vld [vmem:[%s4357_s12] ss:$0 sm:$0xff] }
 0xcae   :  { %v973_v57 = vadd.f32 %v3279_v53, %v972_v56 }
 0xcb0   :  { %v977_v60 = vsel %vm976_vm10, %v3279_v53, %v973_v57 }
 0xcb1   :  { %v982_v63 = vsel %vm979_vm11, %v981_v50, %v977_v60 }
 0xcb2   :  { %v985_v12 = vmul.f32 %v982_v63, %v914_v36 }
 0xd0f   :  { %v988_v62 = vpop.permute.xlu0 %987 }
 0xd10   :  { %v990_v1 = vmul.f32 %v988_v62, %v982_v63 }
 0xd12   :  { %992 = vrot.lane.b32.xlu1 %v990_v1, %s3575_s3 }
 0xd15   :  { %v1481_v18 = vpop.f32.mrf.mxu1 }
 0xd17   :  { %v680_v10 = vpop.permute.xlu0 %679 }
 0xd18   :  { %683 = vst.msk [vmem:[#allocation3 + $0x8] sm:$0xff] %vm301_vm1, %v680_v10 }
 0xd1a   :  { %599 = vrot.lane.b32.xlu1 %v3869_v13, %s3575_s3  ;;  %v3114_v13 = vld [vmem:[#allocation15 + $0x8] sm:$0xff] }
 0xd1b   :  { %1403 = vmatpush.bf16.msrb.mxu0 %v3114_v13 }
 0xd1d   :  { %v1483_v47 = vpop.f32.mrf.mxu1 }
 0xd1f   :  { %1404 = vmatpush.bf16.msrb.mxu0 %v3113_v22  ;;  %v3984_v26 = vld [vmem:[#allocation3 + $0x8] sm:$0xff] }
 0xd22   :  { %1250 = vperm.xlu1 %3183, %v3846_v2  }
 0xd2a   :  { %3185 = vset.pattern.permute.xlu1 %v3577_v11 }
 0xd84   :  { %v993_v14 = vpop.permute.xlu1 %992 }
 0xd85   :  { %v3965_v15 = vadd.f32 %v993_v14, %v985_v12 }
 0xd87   :  { %3280 = vtanh.f32 %v3965_v15 }
 0xd8c   :  { %v600_v16 = vpop.permute.xlu1 %599 }
 0xd8d   :  { %v3281_v17 = vpop.eup %3280  ;;  %602 = vst.msk [vmem:[#allocation3] sm:$0xff] %vm301_vm1, %v600_v16 }
 0xd8e   :  { %998 = vrot.lane.b32.xlu2 %v3281_v17, %s3568_s5 }
 0xd94   :  { %v3988_v28 = vld [vmem:[#allocation3] sm:$0xff]  ;;  %v1251_v29 = vpop.permute.xlu1 %1250 }
 0xd95   :  { %v1277_v32 = vmul.f32 %v1251_v29, %v3988_v28 }
 0xd96   :  { %1185 = vperm.xlu2 %3182, %v3846_v2   ;;  %v3109_v2 = vld [vmem:[%s4353_s8] sm:$0xff] }
 0xd97   :  { %1040 = vmatpush.bf16.msrb.mxu2 %v3109_v2 }
 0xd9b   :  { %1506 = vmatpush.bf16.msra.mxu2 %v3116_v39 }
 0xd9e   :  { %1180 = vperm.xlu2 %3182, %v3848_v3  }
 0xd9f   :  { %1507 = vmatpush.bf16.msra.mxu2 %v3115_v43 }
 0xda6   :  { %3186 = vset.pattern.permute.xlu2 %v3576_v54 }
 0xde8   :  { %v999_v24 = vpop.permute.xlu2 %998 }
 0xde9   :  { %v3976_v25 = vmul.f32 %v999_v24, %v982_v63 }
 0xdeb   :  { %v1008_v3 = vpack.c.bf16 %v3976_v25, %v3976_v25 }
 0xded   :  { %1016 = vrot.lane.b32.xlu0 %v1008_v3, %s3575_s3 }
 0xdf0   :  { %v1186_v27 = vpop.permute.xlu2 %1185 }
 0xdf1   :  { %v1219_v19 = vmul.f32 %v1186_v27, %v3984_v26 }
 0xdf3   :  { %1227 = vst.msk [vmem:[#allocation5 + $0x8] sm:$0xff] %vm301_vm1, %v1219_v19 }
 0xdf8   :  { %v1181_v31 = vpop.permute.xlu2 %1180 }
 0xdf9   :  { %v1218_v33 = vmul.f32 %v3988_v28, %v1181_v31 }
 0xdfa   :  { %v1235_v34 = vld [vmem:[#allocation5 + $0x8] sm:$0xff] }
 0xdfb   :  { %v1284_v35 = vadd.f32 %v1277_v32, %v1235_v34  ;;  %1226 = vst.msk [vmem:[#allocation5] sm:$0xff] %vm301_vm1, %v1218_v33 }
 0xdfd   :  { %1291 = vst.msk [vmem:[#allocation5 + $0x8] sm:$0xff] %vm301_vm1, %v1284_v35 }
 0xe02   :  { %v1353_v36 = vld [vmem:[#allocation5] sm:$0xff] }
 0xe04   :  { %v1354_v37 = vld [vmem:[#allocation5 + $0x8] sm:$0xff] }
 0xe05   :  { %v1361_v38 = vpack.c.bf16 %v1354_v37, %v1353_v36 }
 0xe07   :  { %2851 = vmatmul.msk.bf16.vlgmr.msrb.gmra.mxu0 %vm301_vm1, %v1361_v38 }
 0xe5f   :  { %v1017_v46 = vpop.permute.xlu0 %1016 }
 0xe60   :  { %2831 = vmatmul.msk.bf16.vlgmr.msrb.gmra.mxu2 %vm301_vm1, %v1017_v46 }
 0xe70   :  { %1508 = vmatmul.bf16.vlgmr.msra.gmra.mxu2 %v3577_v11 }
 0xe84   :  { %v1406_v56 = vpop.f32.mrf.mxu0 }
 0xe85   :  { %v1407_v57 = vadd.f32 %v4006_v55, %v1406_v56 }
 0xe87   :  { %v1439_v60 = vadd.f32 %v3205_v58, %v1407_v57 }
 0xee3   :  { %v1042_v51 = vpop.f32.mrf.mxu2 }
 0xee4   :  { %v1043_v52 = vadd.f32 %v1042_v51, %v339_v49 }
 0xee6   :  { %3282 = vtanh.f32 %v1043_v52  ;;  %v2832_v10 = vmul.f32 -1.442695, %v1043_v52 }
 0xeeb   :  { %v1044_v53 = vpop.f32.mrf.mxu2 }
 0xeec   :  { %v3283_v20 = vpop.eup %3282 }
 0xeed   :  { %1068 = vrot.lane.b32.xlu0 %v3283_v20, %s3568_s5 }
 0xef3   :  { %v1509_v59 = vpop.f32.mrf.mxu2 }
 0xef4   :  { %v1510_v50 = vadd.f32 %v1509_v59, %v1481_v18 }
 0xef5   :  { %1535 = vrot.lane.b32.xlu0 %v3206_v21, %s3575_s3 }
 0xef6   :  { %v1514_v62 = vadd.f32 %v1510_v50, %v1439_v60  ;;  %v3112_v60 = vld [vmem:[%s4353_s8 + $0x8] sm:$0xff]  ;;  %v3111_v50 = vld [vmem:[%s4353_s8] sm:$0xff] }
 0xef7   :  { %1120 = vmatpush.bf16.msrb.mxu3 %v3112_v60 }
 0xef8   :  { %3284 = vtanh.f32 %v1514_v62  ;;  %v2872_v16 = vmul.f32 -1.442695, %v1514_v62 }
 0xef9   :  { %3286 = vpow2.f32 %v2832_v10  ;;  %v3120_v10 = vld [vmem:[#allocation19 + $0x8] sm:$0xff] }
 0xefb   :  { %v1511_v63 = vpop.f32.mrf.mxu2  ;;  %1121 = vmatpush.bf16.msrb.mxu3 %v3111_v50 }
 0xefe   :  { %v3285_v1 = vpop.eup %3284 }
 0xeff   :  { %1540 = vrot.lane.b32.xlu1 %v3285_v1, %s3568_s5  ;;  %v3287_v12 = vpop.eup %3286  ;;  %1588 = vmatpush.bf16.msra.mxu3 %v3120_v10 }
 0xf00   :  { %v1049_v14 = vadd.f32 1.0, %v3287_v12  ;;  %v3124_v12 = vld [vmem:[#allocation18 + $0x8] sm:$0xff] }
 0xf01   :  { %1624 = vmatpush.bf16.msrb.mxu1 %v3124_v12  ;;  %v3130_v12 = vld [vmem:[#allocation18 + $0x8] sm:$0xff] }
 0xf02   :  { %3288 = vrcp.f32 %v1049_v14  ;;  %v1061_v27 = vand.u32 2147483648, %v1049_v14  ;;  %vm1055_vm13 = vweird.f32 %v1049_v14  ;;  %v1059_v19 = vand.u32 2147483647, %v1049_v14 }
 0xf03   :  { %3290 = vpow2.f32 %v2872_v16  ;;  %v3123_v16 = vld [vmem:[#allocation18] sm:$0xff] }
 0xf04   :  { %v1062_v32 = vor.u32 1.1754944e-38, %v1061_v27  ;;  %vm1060_vm15 = vcmp.eq.f32.partialorder %v1059_v19, 8.507059e+37  ;;  %v3207_v27 = vld [vmem:[%s4364_s19] ss:$0 sm:$0xff] }
 0xf05   :  { %1625 = vmatpush.bf16.msrb.mxu1 %v3123_v16  ;;  %v3129_v16 = vld [vmem:[#allocation18] sm:$0xff] }
 0xf08   :  { %v3289_v17 = vpop.eup %3288 }
 0xf09   :  { %v1051_v13 = vmul.f32 %v3289_v17, %v1049_v14  ;;  %v3291_v22 = vpop.eup %3290  ;;  %vm1056_vm12 = vweird.f32 %v3289_v17  ;;  %v3119_v14 = vld [vmem:[#allocation19] sm:$0xff]  ;;  %1769 = vmatpush.bf16.msra.mxu1 %v3130_v12 }
 0xf0a   :  { %v1518_v24 = vadd.f32 1.0, %v3291_v22  ;;  %vm1057_vm14 = vmor %vm1055_vm13, %vm1056_vm12  ;;  %1589 = vmatpush.bf16.msra.mxu3 %v3119_v14  ;;  %v3122_v22 = vld [vmem:[#allocation16 + $0x8] sm:$0xff]  ;;  %v3125_v14 = vld [vmem:[#allocation19] sm:$0xff] }
 0xf0b   :  { %v1052_v23 = vsub.f32 1.0, %v1051_v13  ;;  %1652 = vmatpush.bf16.msrb.mxu2 %v3122_v22 }
 0xf0c   :  { %3292 = vrcp.f32 %v1518_v24  ;;  %v1530_v40 = vand.u32 2147483648, %v1518_v24  ;;  %vm1524_vm2 = vweird.f32 %v1518_v24  ;;  %v1528_v42 = vand.u32 2147483647, %v1518_v24 }
 0xf0d   :  { %v1053_v2 = vmul.f32 %v3289_v17, %v1052_v23  ;;  %1770 = vmatpush.bf16.msra.mxu1 %v3129_v16 }
 0xf0e   :  { %v1531_v44 = vor.u32 1.1754944e-38, %v1530_v40  ;;  %vm1529_vm4 = vcmp.eq.f32.partialorder %v1528_v42, 8.507059e+37 }
 0xf0f   :  { %v1054_v3 = vadd.f32 %v3289_v17, %v1053_v2 }
 0xf11   :  { %v1058_v31 = vsel %vm1057_vm14, %v3289_v17, %v1054_v3 }
 0xf12   :  { %v3293_v29 = vpop.eup %3292  ;;  %v1063_v35 = vsel %vm1060_vm15, %v1062_v32, %v1058_v31 }
 0xf13   :  { %v1520_v33 = vmul.f32 %v3293_v29, %v1518_v24  ;;  %vm1525_vm0 = vweird.f32 %v3293_v29  ;;  %v1066_v47 = vmul.f32 %v1063_v35, %v3965_v15  ;;  %v3121_v24 = vld [vmem:[#allocation16] sm:$0xff] }
 0xf14   :  { %vm1526_vm3 = vmor %vm1524_vm2, %vm1525_vm0  ;;  %1653 = vmatpush.bf16.msrb.mxu2 %v3121_v24 }
 0xf15   :  { %v1521_v37 = vsub.f32 1.0, %v1520_v33 }
 0xf17   :  { %v1522_v38 = vmul.f32 %v3293_v29, %v1521_v37 }
 0xf19   :  { %v1523_v39 = vadd.f32 %v3293_v29, %v1522_v38 }
 0xf1b   :  { %v1527_v43 = vsel %vm1526_vm3, %v3293_v29, %v1523_v39 }
 0xf1c   :  { %v1532_v45 = vsel %vm1529_vm4, %v1531_v44, %v1527_v43 }
 0xf5f   :  { %v1069_v34 = vpop.permute.xlu0 %1068 }
 0xf60   :  { %v1071_v36 = vmul.f32 %v1069_v34, %v1063_v35 }
 0xf62   :  { %1073 = vrot.lane.b32.xlu2 %v1071_v36, %s3575_s3 }
 0xf67   :  { %v1536_v53 = vpop.permute.xlu0 %1535 }
 0xf68   :  { %v1538_v20 = vmul.f32 %v1536_v53, %v1532_v45 }
 0xf71   :  { %v1541_v46 = vpop.permute.xlu1 %1540 }
 0xf72   :  { %v1543_v18 = vmul.f32 %v1541_v46, %v1532_v45 }
 0xf74   :  { %1545 = vrot.lane.b32.xlu1 %v1543_v18, %s3575_s3 }
 0xfbc   :  { %v1074_v49 = vpop.permute.xlu2 %1073 }
 0xfbd   :  { %v4021_v51 = vadd.f32 %v1074_v49, %v1066_v47 }
 0xfbf   :  { %3294 = vtanh.f32 %v4021_v51 }
 0xfc5   :  { %v3295_v52 = vpop.eup %3294 }
 0xfc6   :  { %1079 = vrot.lane.b32.xlu2 %v3295_v52, %s3568_s5 }
 0xfe6   :  { %v1546_v56 = vpop.permute.xlu1 %1545 }
 0xfe7   :  { %v4025_v57 = vadd.f32 %v1546_v56, %v1538_v20 }
 0xfe9   :  { %3296 = vtanh.f32 %v4025_v57 }
 0xfef   :  { %v3297_v58 = vpop.eup %3296 }
 0xff0   :  { %1551 = vrot.lane.b32.xlu0 %v3297_v58, %s3568_s5 }
0x1020   :  { %v1080_v21 = vpop.permute.xlu2 %1079 }
0x1021   :  { %v4029_v15 = vmul.f32 %v1080_v21, %v1063_v35  ;;  %v1408_v35 = vpop.f32.mrf.mxu0 }
0x1022   :  { %v1409_v37 = vadd.f32 %v4006_v55, %v1408_v35  ;;  %v3128_v35 = vld [vmem:[#allocation16 + $0x8] sm:$0xff] }
0x1023   :  { %v1089_v59 = vpack.c.bf16 %v4029_v15, %v4029_v15  ;;  %1797 = vmatpush.bf16.msra.mxu2 %v3128_v35 }
0x1025   :  { %1097 = vrot.lane.b32.xlu1 %v1089_v59, %s3575_s3 }
0x1062   :  { %v1552_v62 = vpop.permute.xlu0 %1551 }
0x1063   :  { %v1554_v63 = vmul.f32 %v1552_v62, %v1532_v45 }
0x1065   :  { %v1555_v1 = vpack.c.bf16 %v1554_v63, %v1554_v63 }
0x1067   :  { %1565 = vrot.lane.b32.xlu2 %v1555_v1, %s3575_s3 }
0x1097   :  { %v1098_v17 = vpop.permute.xlu1 %1097 }
0x1098   :  { %2841 = vmatmul.msk.bf16.vlgmr.msrb.gmra.mxu3 %vm301_vm1, %v1098_v17 }
0x10c1   :  { %v1566_v13 = vpop.permute.xlu2 %1565 }
0x10c2   :  { %2881 = vmatmul.msk.bf16.vlgmr.msra.gmra.mxu3 %vm301_vm1, %v1566_v13  ;;  %2890 = vmatmul.msk.bf16.vlgmr.msrb.gmra.mxu1 %vm301_vm1, %v1566_v13 }
0x111b   :  { %v4044_v23 = vpop.f32.mrf.mxu3 }
0x1123   :  { %v1125_v2 = vpop.f32.mrf.mxu3 }
0x113f   :  { %v1627_v3 = vpop.f32.mrf.mxu1 }
0x1145   :  { %v1591_v19 = vpop.f32.mrf.mxu3 }
0x1146   :  { %v1592_v29 = vadd.f32 %v3207_v27, %v1591_v19 }
0x1147   :  { %v1629_v31 = vpop.f32.mrf.mxu1 }
0x1148   :  { %v1595_v32 = vmax.f32 %v1592_v29, 0.0 }
0x114a   :  { %1596 = vst.msk [vmem:[#allocation6] sm:$0xff] %vm301_vm1, %v1595_v32  ;;  %v1597_v33 = vpack.c.bf16 %v1595_v32, %v1595_v32 }
0x114c   :  { %2899 = vmatmul.msk.bf16.vlgmr.msrb.gmra.mxu2 %vm301_vm1, %v1597_v33 }
0x114d   :  { %v1593_v34 = vpop.f32.mrf.mxu3 }
0x11cf   :  { %v1655_v36 = vpop.f32.mrf.mxu2 }
0x11d0   :  { %v1656_v38 = vadd.f32 %v1655_v36, %v1627_v3 }
0x11d2   :  { %v1661_v39 = vadd.f32 %v1656_v38, %v1409_v37 }
0x11d4   :  { %3298 = vtanh.f32 %v1661_v39  ;;  %v2900_v43 = vmul.f32 -1.442695, %v1661_v39 }
0x11d6   :  { %3300 = vpow2.f32 %v2900_v43 }
0x11d7   :  { %v1657_v40 = vpop.f32.mrf.mxu2 }
0x11da   :  { %v3299_v42 = vpop.eup %3298 }
0x11db   :  { %1684 = vrot.lane.b32.xlu0 %v3299_v42, %s3568_s5 }
0x11dc   :  { %v3301_v44 = vpop.eup %3300 }
0x11dd   :  { %v1665_v45 = vadd.f32 1.0, %v3301_v44 }
0x11df   :  { %3302 = vrcp.f32 %v1665_v45  ;;  %v1677_v53 = vand.u32 2147483648, %v1665_v45  ;;  %vm1671_vm6 = vweird.f32 %v1665_v45  ;;  %v1675_v20 = vand.u32 2147483647, %v1665_v45 }
0x11e1   :  { %v1678_v58 = vor.u32 1.1754944e-38, %v1677_v53  ;;  %vm1676_vm8 = vcmp.eq.f32.partialorder %v1675_v20, 8.507059e+37  ;;  %v3208_v20 = vld [vmem:[%s4364_s19] ss:$0 sm:$0xff] }
0x11e5   :  { %v3303_v46 = vpop.eup %3302 }
0x11e6   :  { %v1667_v18 = vmul.f32 %v3303_v46, %v1665_v45  ;;  %vm1672_vm5 = vweird.f32 %v3303_v46 }
0x11e7   :  { %vm1673_vm7 = vmor %vm1671_vm6, %vm1672_vm5 }
0x11e8   :  { %v1668_v47 = vsub.f32 1.0, %v1667_v18 }
0x11ea   :  { %v1669_v49 = vmul.f32 %v3303_v46, %v1668_v47 }
0x11ec   :  { %v1670_v52 = vadd.f32 %v3303_v46, %v1669_v49 }
0x11ee   :  { %v1674_v56 = vsel %vm1673_vm7, %v3303_v46, %v1670_v52 }
0x11ef   :  { %v1679_v59 = vsel %vm1676_vm8, %v1678_v58, %v1674_v56 }
0x11f0   :  { %v1682_v50 = vmul.f32 %v1679_v59, %v4025_v57  ;;  %v3126_v57 = vld [vmem:[#allocation19 + $0x8] sm:$0xff] }
0x11f1   :  { %1732 = vmatpush.bf16.msrb.mxu3 %v3126_v57 }
0x11f5   :  { %1733 = vmatpush.bf16.msrb.mxu3 %v3125_v14 }
0x124d   :  { %v1685_v21 = vpop.permute.xlu0 %1684 }
0x124e   :  { %v1687_v60 = vmul.f32 %v1685_v21, %v1679_v59 }
0x1250   :  { %1689 = vrot.lane.b32.xlu1 %v1687_v60, %s3575_s3 }
0x1258   :  { %760 = vrot.lane.b32.xlu1 %v3911_v30, %s3575_s3  ;;  %v3578_v30 = vmov 2  }
0x1260   :  { %1195 = vperm.xlu1 %3185, %v3850_v4  }
0x1268   :  { %3187 = vset.pattern.permute.xlu1 %v3576_v54 }
0x1269   :  { %1258 = vperm.xlu1 %3187, %v3850_v4  }
0x1271   :  { %3191 = vset.pattern.permute.xlu1 %v3577_v11 }
0x12c2   :  { %v1690_v62 = vpop.permute.xlu1 %1689 }
0x12c3   :  { %v4061_v63 = vadd.f32 %v1690_v62, %v1682_v50 }
0x12c5   :  { %3304 = vtanh.f32 %v4061_v63 }
0x12ca   :  { %v761_v1 = vpop.permute.xlu1 %760 }
0x12cb   :  { %v3305_v10 = vpop.eup %3304  ;;  %764 = vst.msk [vmem:[#allocation3 + $0x10] sm:$0xff] %vm301_vm1, %v761_v1 }
0x12cc   :  { %1695 = vrot.lane.b32.xlu2 %v3305_v10, %s3568_s5 }
0x12d2   :  { %v1196_v24 = vpop.permute.xlu1 %1195  ;;  %v4081_v19 = vld [vmem:[#allocation3 + $0x10] sm:$0xff] }
0x12d4   :  { %841 = vrot.lane.b32.xlu2 %v3928_v61, %s3575_s3 }
0x12db   :  { %v1259_v27 = vpop.permute.xlu1 %1258 }
0x12dc   :  { %1254 = vperm.xlu2 %3186, %v3852_v5   ;;  %v1279_v29 = vmul.f32 %v1259_v27, %v4081_v19 }
0x12e4   :  { %3188 = vset.pattern.permute.xlu2 %v3578_v30 }
0x12e5   :  { %1312 = vperm.xlu2 %3188, %v3852_v5  }
0x12ed   :  { %3192 = vset.pattern.permute.xlu2 %v3576_v54 }
0x1326   :  { %v1696_v17 = vpop.permute.xlu2 %1695 }
0x1327   :  { %v1698_v13 = vmul.f32 %v1696_v17, %v1679_v59 }
0x1329   :  { %v1699_v61 = vpack.c.bf16 %v1698_v13, %v1698_v13 }
0x132b   :  { %1709 = vrot.lane.b32.xlu0 %v1699_v61, %s3575_s3 }
0x132e   :  { %v842_v22 = vpop.permute.xlu2 %841 }
0x132f   :  { %845 = vst.msk [vmem:[#allocation3 + $0x18] sm:$0xff] %vm301_vm1, %v842_v22 }
0x1333   :  { %1190 = vperm.xlu0 %3184, %v3852_v5  }
0x1336   :  { %v4075_v2 = vld [vmem:[#allocation3 + $0x18] sm:$0xff] }
0x1337   :  { %v1221_v3 = vmul.f32 %v1196_v24, %v4075_v2 }
0x1339   :  { %1229 = vst.msk [vmem:[#allocation5 + $0x18] sm:$0xff] %vm301_vm1, %v1221_v3 }
0x133b   :  { %3189 = vset.pattern.permute.xlu0 %v3578_v30 }
0x133c   :  { %1316 = vperm.xlu0 %3189, %v3850_v4   ;;  %v1255_v4 = vpop.permute.xlu2 %1254 }
0x133d   :  { %v1278_v36 = vmul.f32 %v1255_v4, %v3984_v26 }
0x1340   :  { %v1237_v31 = vld [vmem:[#allocation5 + $0x18] sm:$0xff] }
0x1341   :  { %v1286_v32 = vadd.f32 %v1279_v29, %v1237_v31 }
0x1343   :  { %1293 = vst.msk [vmem:[#allocation5 + $0x18] sm:$0xff] %vm301_vm1, %v1286_v32 }
0x1344   :  { %3190 = vset.pattern.permute.xlu0 %v3577_v11  ;;  %v1313_v44 = vpop.permute.xlu2 %1312 }
0x1345   :  { %v1335_v45 = vmul.f32 %v1313_v44, %v3988_v28  ;;  %v341_v44 = vadd.f32 %v3883_v48, %v3812_v0  ;;  %v3209_v48 = vld [vmem:[%s4364_s19] ss:$0 sm:$0xff] }
0x134a   :  { %v1300_v42 = vld [vmem:[#allocation5 + $0x18] sm:$0xff] }
0x139d   :  { %v1710_v5 = vpop.permute.xlu0 %1709 }
0x139e   :  { %2909 = vmatmul.msk.bf16.vlgmr.msrb.gmra.mxu3 %vm301_vm1, %v1710_v5  ;;  %2918 = vmatmul.msk.bf16.vlgmr.msra.gmra.mxu1 %vm301_vm1, %v1710_v5 }
0x13a5   :  { %v1191_v33 = vpop.permute.xlu0 %1190 }
0x13a6   :  { %v1220_v34 = vmul.f32 %v4081_v19, %v1191_v33 }
0x13a8   :  { %1228 = vst.msk [vmem:[#allocation5 + $0x10] sm:$0xff] %vm301_vm1, %v1220_v34 }
0x13ae   :  { %v1317_v37 = vpop.permute.xlu0 %1316 }
0x13af   :  { %v1236_v38 = vld [vmem:[#allocation5 + $0x10] sm:$0xff]  ;;  %v1336_v39 = vmul.f32 %v1317_v37, %v3984_v26  ;;  %v3127_v26 = vld [vmem:[#allocation16] sm:$0xff] }
0x13b0   :  { %v1285_v40 = vadd.f32 %v1278_v36, %v1236_v38  ;;  %1798 = vmatpush.bf16.msra.mxu2 %v3127_v26  ;;  %v3133_v26 = vld [vmem:[#allocation16] sm:$0xff] }
0x13b1   :  { %v1342_v43 = vadd.f32 %v1336_v39, %v1300_v42  ;;  %v3132_v39 = vld [vmem:[#allocation19 + $0x8] sm:$0xff]  ;;  %v3131_v42 = vld [vmem:[#allocation19] sm:$0xff] }
0x13b2   :  { %1292 = vst.msk [vmem:[#allocation5 + $0x10] sm:$0xff] %vm301_vm1, %v1285_v40  ;;  %v3136_v40 = vld [vmem:[#allocation18 + $0x8] sm:$0xff]  ;;  %1877 = vmatpush.bf16.msra.mxu3 %v3132_v39 }
0x13b3   :  { %1348 = vst.msk [vmem:[#allocation5 + $0x18] sm:$0xff] %vm301_vm1, %v1342_v43  ;;  %1914 = vmatpush.bf16.msrb.mxu1 %v3136_v40  ;;  %v3135_v43 = vld [vmem:[#allocation18] sm:$0xff] }
0x13b6   :  { %1878 = vmatpush.bf16.msra.mxu3 %v3131_v42 }
0x13b7   :  { %1915 = vmatpush.bf16.msrb.mxu1 %v3135_v43 }
0x13b9   :  { %v1299_v46 = vld [vmem:[#allocation5 + $0x10] sm:$0xff] }
0x13ba   :  { %v1341_v18 = vadd.f32 %v1335_v45, %v1299_v46  ;;  %v1356_v49 = vld [vmem:[#allocation5 + $0x18] sm:$0xff]  ;;  %v1124_v46 = vadd.f32 %v4044_v23, %v341_v44 }
0x13bc   :  { %1347 = vst.msk [vmem:[#allocation5 + $0x10] sm:$0xff] %vm301_vm1, %v1341_v18 }
0x13c3   :  { %v1355_v47 = vld [vmem:[#allocation5 + $0x10] sm:$0xff] }
0x13c4   :  { %v1362_v52 = vpack.c.bf16 %v1356_v49, %v1355_v47  ;;  %v3134_v49 = vld [vmem:[#allocation16 + $0x8] sm:$0xff] }
0x13c5   :  { %1942 = vmatpush.bf16.msrb.mxu2 %v3134_v49 }
0x13c6   :  { %2852 = vmatmul.msk.bf16.gmra.mxu0 %vm301_vm1, %v1362_v52 }
0x13c9   :  { %1943 = vmatpush.bf16.msrb.mxu2 %v3133_v26 }
0x141b   :  { %v1772_v53 = vpop.f32.mrf.mxu1 }
0x1421   :  { %v1735_v56 = vpop.f32.mrf.mxu3 }
0x1422   :  { %v1736_v58 = vadd.f32 %v3208_v20, %v1735_v56 }
0x1423   :  { %v1774_v21 = vpop.f32.mrf.mxu1 }
0x1424   :  { %v1739_v28 = vmax.f32 %v1736_v58, 0.0 }
0x1426   :  { %1741 = vst.msk [vmem:[#allocation6 + $0x8] sm:$0xff] %vm301_vm1, %v1739_v28  ;;  %v1742_v59 = vpack.c.bf16 %v1739_v28, %v1739_v28 }
0x1428   :  { %2927 = vmatmul.msk.bf16.vlgmr.msra.gmra.mxu2 %vm301_vm1, %v1742_v59 }
0x1429   :  { %v1737_v60 = vpop.f32.mrf.mxu3 }
0x1443   :  { %v1411_v50 = vpop.f32.mrf.mxu0 }
0x1444   :  { %v1412_v1 = vadd.f32 %v4006_v55, %v1411_v50 }
0x144b   :  { %v1413_v28 = vpop.f32.mrf.mxu0 }
0x144c   :  { %v1414_v60 = vadd.f32 %v4006_v55, %v1413_v28 }
0x14ab   :  { %v1800_v62 = vpop.f32.mrf.mxu2 }
0x14ac   :  { %v1801_v10 = vadd.f32 %v1800_v62, %v1772_v53 }
0x14ae   :  { %v1806_v57 = vadd.f32 %v1801_v10, %v1412_v1 }
0x14b0   :  { %3306 = vtanh.f32 %v1806_v57  ;;  %v2928_v16 = vmul.f32 -1.442695, %v1806_v57 }
0x14b2   :  { %3308 = vpow2.f32 %v2928_v16 }
0x14b3   :  { %v1802_v12 = vpop.f32.mrf.mxu2 }
0x14b4   :  { %v2842_v12 = vmul.f32 -1.442695, %v1124_v46 }
0x14b6   :  { %v3307_v14 = vpop.eup %3306 }
0x14b7   :  { %1829 = vrot.lane.b32.xlu1 %v3307_v14, %s3568_s5 }
0x14b8   :  { %v3309_v17 = vpop.eup %3308 }
0x14b9   :  { %v1810_v13 = vadd.f32 1.0, %v3309_v17 }
0x14bb   :  { %3310 = vrcp.f32 %v1810_v13  ;;  %v1822_v29 = vand.u32 2147483648, %v1810_v13  ;;  %vm1816_vm10 = vweird.f32 %v1810_v13  ;;  %v1820_v31 = vand.u32 2147483647, %v1810_v13 }
0x14bd   :  { %v1823_v5 = vor.u32 1.1754944e-38, %v1822_v29  ;;  %vm1821_vm12 = vcmp.eq.f32.partialorder %v1820_v31, 8.507059e+37 }
0x14c1   :  { %v3311_v61 = vpop.eup %3310 }
0x14c2   :  { %v1812_v22 = vmul.f32 %v3311_v61, %v1810_v13  ;;  %vm1817_vm9 = vweird.f32 %v3311_v61 }
0x14c3   :  { %vm1818_vm11 = vmor %vm1816_vm10, %vm1817_vm9 }
0x14c4   :  { %v1813_v24 = vsub.f32 1.0, %v1812_v22 }
0x14c6   :  { %v1814_v3 = vmul.f32 %v3311_v61, %v1813_v24 }
0x14c8   :  { %v1815_v27 = vadd.f32 %v3311_v61, %v1814_v3 }
0x14ca   :  { %v1819_v32 = vsel %vm1818_vm11, %v3311_v61, %v1815_v27 }
0x14cb   :  { %v1824_v34 = vsel %vm1821_vm12, %v1823_v5, %v1819_v32 }
0x14cc   :  { %v1827_v4 = vmul.f32 %v1824_v34, %v4061_v63 }
0x1529   :  { %v1830_v33 = vpop.permute.xlu1 %1829 }
0x152a   :  { %v1832_v35 = vmul.f32 %v1830_v33, %v1824_v34 }
0x152c   :  { %1834 = vrot.lane.b32.xlu2 %v1832_v35, %s3575_s3 }
0x1586   :  { %v1835_v36 = vpop.permute.xlu2 %1834 }
0x1587   :  { %v4106_v37 = vadd.f32 %v1835_v36, %v1827_v4 }
0x1589   :  { %3312 = vtanh.f32 %v4106_v37 }
0x158a   :  { %3314 = vtanh.f32 %v1124_v46 }
0x158f   :  { %v3313_v38 = vpop.eup %3312 }
0x1590   :  { %1840 = vrot.lane.b32.xlu1 %v3313_v38, %s3568_s5  ;;  %v3315_v47 = vpop.eup %3314 }
0x1602   :  { %v1841_v63 = vpop.permute.xlu1 %1840 }
0x1603   :  { %v1843_v45 = vmul.f32 %v1841_v63, %v1824_v34 }
0x1605   :  { %v1844_v18 = vpack.c.bf16 %v1843_v45, %v1843_v45 }
0x1607   :  { %1854 = vrot.lane.b32.xlu2 %v1844_v18, %s3575_s3 }
0x160f   :  { %1149 = vrot.lane.b32.xlu2 %v3315_v47, %s3568_s5 }
0x1661   :  { %v1855_v52 = vpop.permute.xlu2 %1854 }
0x1662   :  { %2937 = vmatmul.msk.bf16.vlgmr.msra.gmra.mxu3 %vm301_vm1, %v1855_v52  ;;  %2946 = vmatmul.msk.bf16.vlgmr.msrb.gmra.mxu1 %vm301_vm1, %v1855_v52 }
0x1669   :  { %v1150_v45 = vpop.permute.xlu2 %1149 }
0x16df   :  { %v1917_v0 = vpop.f32.mrf.mxu1 }
0x16e5   :  { %v1880_v23 = vpop.f32.mrf.mxu3 }
0x16e6   :  { %v1881_v53 = vadd.f32 %v3209_v48, %v1880_v23 }
0x16e7   :  { %v1919_v20 = vpop.f32.mrf.mxu1 }
0x16e8   :  { %v1884_v56 = vmax.f32 %v1881_v53, 0.0 }
0x16ea   :  { %1886 = vst.msk [vmem:[#allocation6 + $0x10] sm:$0xff] %vm301_vm1, %v1884_v56  ;;  %v1887_v58 = vpack.c.bf16 %v1884_v56, %v1884_v56 }
0x16ec   :  { %2955 = vmatmul.msk.bf16.vlgmr.msrb.gmra.mxu2 %vm301_vm1, %v1887_v58 }
0x16ed   :  { %v1882_v21 = vpop.f32.mrf.mxu3 }
0x176f   :  { %v1945_v59 = vpop.f32.mrf.mxu2 }
0x1770   :  { %v1946_v50 = vadd.f32 %v1945_v59, %v1917_v0 }
0x1772   :  { %v1951_v62 = vadd.f32 %v1946_v50, %v1414_v60  ;;  %v3138_v60 = vld [vmem:[#allocation19 + $0x8] sm:$0xff]  ;;  %v3137_v50 = vld [vmem:[#allocation19] sm:$0xff] }
0x1773   :  { %2022 = vmatpush.bf16.msrb.mxu3 %v3138_v60 }
0x1774   :  { %3316 = vtanh.f32 %v1951_v62  ;;  %v2956_v57 = vmul.f32 -1.442695, %v1951_v62 }
0x1776   :  { %3318 = vpow2.f32 %v2956_v57 }
0x1777   :  { %v1947_v1 = vpop.f32.mrf.mxu2  ;;  %3320 = vpow2.f32 %v2842_v12  ;;  %2023 = vmatpush.bf16.msrb.mxu3 %v3137_v50 }
0x177a   :  { %v3317_v10 = vpop.eup %3316 }
0x177b   :  { %1974 = vrot.lane.b32.xlu0 %v3317_v10, %s3568_s5 }
0x177c   :  { %v3319_v14 = vpop.eup %3318 }
0x177d   :  { %v1955_v16 = vadd.f32 1.0, %v3319_v14  ;;  %v3321_v17 = vpop.eup %3320 }
0x177e   :  { %v1130_v13 = vadd.f32 1.0, %v3321_v17 }
0x177f   :  { %3322 = vrcp.f32 %v1955_v16  ;;  %v1967_v5 = vand.u32 2147483648, %v1955_v16  ;;  %vm1961_vm14 = vweird.f32 %v1955_v16  ;;  %v1965_v33 = vand.u32 2147483647, %v1955_v16 }
0x1780   :  { %3324 = vrcp.f32 %v1130_v13  ;;  %v1142_v42 = vand.u32 2147483648, %v1130_v13  ;;  %vm1136_vm3 = vweird.f32 %v1130_v13  ;;  %v1140_v43 = vand.u32 2147483647, %v1130_v13 }
0x1781   :  { %v1968_v4 = vor.u32 1.1754944e-38, %v1967_v5  ;;  %vm1966_vm0 = vcmp.eq.f32.partialorder %v1965_v33, 8.507059e+37 }
0x1782   :  { %v1143_v63 = vor.u32 1.1754944e-38, %v1142_v42  ;;  %vm1141_vm5 = vcmp.eq.f32.partialorder %v1140_v43, 8.507059e+37 }
0x1785   :  { %v3323_v61 = vpop.eup %3322 }
0x1786   :  { %v1957_v22 = vmul.f32 %v3323_v61, %v1955_v16  ;;  %v3325_v3 = vpop.eup %3324  ;;  %vm1962_vm13 = vweird.f32 %v3323_v61 }
0x1787   :  { %v1132_v27 = vmul.f32 %v3325_v3, %v1130_v13  ;;  %vm1963_vm15 = vmor %vm1961_vm14, %vm1962_vm13  ;;  %vm1137_vm2 = vweird.f32 %v3325_v3 }
0x1788   :  { %v1958_v24 = vsub.f32 1.0, %v1957_v22  ;;  %vm1138_vm4 = vmor %vm1136_vm3, %vm1137_vm2  ;;  %vm2701_vm3 = vcmask 7168  }
0x1789   :  { %v1133_v31 = vsub.f32 1.0, %v1132_v27 }
0x178a   :  { %v1959_v29 = vmul.f32 %v3323_v61, %v1958_v24 }
0x178b   :  { %v1134_v34 = vmul.f32 %v3325_v3, %v1133_v31 }
0x178c   :  { %v1960_v32 = vadd.f32 %v3323_v61, %v1959_v29 }
0x178d   :  { %v1135_v39 = vadd.f32 %v3325_v3, %v1134_v34 }
0x178e   :  { %v1964_v35 = vsel %vm1963_vm15, %v3323_v61, %v1960_v32 }
0x178f   :  { %v1969_v38 = vsel %vm1966_vm0, %v1968_v4, %v1964_v35  ;;  %v1139_v44 = vsel %vm1138_vm4, %v3325_v3, %v1135_v39  ;;  %v3142_v3 = vld [vmem:[#allocation18 + $0x8] sm:$0xff] }
0x1790   :  { %v1144_v46 = vsel %vm1141_vm5, %v1143_v63, %v1139_v44  ;;  %v1972_v47 = vmul.f32 %v1969_v38, %v4106_v37  ;;  %2059 = vmatpush.bf16.msra.mxu0 %v3142_v3 }
0x1791   :  { %v1152_v18 = vmul.f32 %v1150_v45, %v1144_v46  ;;  %v1147_v26 = vmul.f32 %v1144_v46, %v4021_v51 }
0x17ed   :  { %v1975_v36 = vpop.permute.xlu0 %1974 }
0x17ee   :  { %v1977_v40 = vmul.f32 %v1975_v36, %v1969_v38 }
0x17f0   :  { %1979 = vrot.lane.b32.xlu1 %v1977_v40, %s3575_s3 }
0x17f8   :  { %1154 = vrot.lane.b32.xlu1 %v1152_v18, %s3575_s3 }
0x1800   :  { %922 = vrot.lane.b32.xlu1 %v3945_v41, %s3575_s3 }
0x1808   :  { %1205 = vperm.xlu1 %3191, %v3854_v6  }
0x1862   :  { %v1980_v49 = vpop.permute.xlu1 %1979 }
0x1863   :  { %v4130_v52 = vadd.f32 %v1980_v49, %v1972_v47 }
0x1865   :  { %3326 = vtanh.f32 %v4130_v52 }
0x186a   :  { %v1155_v0 = vpop.permute.xlu1 %1154 }
0x186b   :  { %v3327_v48 = vpop.eup %3326  ;;  %v1157_v23 = vadd.f32 %v1155_v0, %v1147_v26  ;;  %v3140_v26 = vld [vmem:[#allocation16 + $0x8] sm:$0xff] }
0x186c   :  { %1985 = vrot.lane.b32.xlu0 %v3327_v48, %s3568_s5  ;;  %2087 = vmatpush.bf16.msra.mxu1 %v3140_v26 }
0x186d   :  { %3328 = vtanh.f32 %v1157_v23  ;;  %v3139_v23 = vld [vmem:[#allocation16] sm:$0xff] }
0x1870   :  { %2088 = vmatpush.bf16.msra.mxu1 %v3139_v23 }
0x1872   :  { %v923_v53 = vpop.permute.xlu1 %922 }
0x1873   :  { %v3329_v20 = vpop.eup %3328  ;;  %926 = vst.msk [vmem:[#allocation3 + $0x20] sm:$0xff] %vm301_vm1, %v923_v53 }
0x1874   :  { %1160 = vrot.lane.b32.xlu0 %v3329_v20, %s3568_s5 }
0x187a   :  { %v4147_v28 = vld [vmem:[#allocation3 + $0x20] sm:$0xff] }
0x187c   :  { %1200 = vperm.xlu0 %3190, %v3856_v7  }
0x1884   :  { %3193 = vset.pattern.permute.xlu0 %v3576_v54 }
0x1885   :  { %1266 = vperm.xlu0 %3193, %v3854_v6  }
0x188d   :  { %1270 = vperm.xlu0 %3193, %v3858_v8  }
0x1895   :  { %3198 = vset.pattern.permute.xlu0 %v3578_v30 }
0x1896   :  { %1332 = vperm.xlu0 %3198, %v3860_v9  }
0x18de   :  { %v1986_v41 = vpop.permute.xlu0 %1985 }
0x18df   :  { %v1988_v51 = vmul.f32 %v1986_v41, %v1969_v38  ;;  %v3141_v38 = vld [vmem:[#allocation18] sm:$0xff] }
0x18e0   :  { %2060 = vmatpush.bf16.msra.mxu0 %v3141_v38  ;;  %v3147_v38 = vld [vmem:[#allocation18] sm:$0xff] }
0x18e1   :  { %v1989_v37 = vpack.c.bf16 %v1988_v51, %v1988_v51 }
0x18e3   :  { %1999 = vrot.lane.b32.xlu2 %v1989_v37, %s3575_s3 }
0x18e6   :  { %v1161_v56 = vpop.permute.xlu0 %1160 }
0x18e7   :  { %v1163_v58 = vmul.f32 %v1161_v56, %v1144_v46  ;;  %v3210_v56 = vld [vmem:[%s4364_s19] ss:$0 sm:$0xff] }
0x18e9   :  { %1165 = vrot.lane.b32.xlu1 %v1163_v58, %s3575_s3 }
0x18eb   :  { %1003 = vrot.lane.b32.xlu2 %v3976_v25, %s3575_s3 }
0x18ee   :  { %v1201_v21 = vpop.permute.xlu0 %1200 }
0x18ef   :  { %v1222_v59 = vmul.f32 %v1201_v21, %v4147_v28 }
0x18f1   :  { %1230 = vst.msk [vmem:[#allocation5 + $0x20] sm:$0xff] %vm301_vm1, %v1222_v59  ;;  %1210 = vperm.xlu1 %3191, %v3858_v8  }
0x18f3   :  { %1084 = vrot.lane.b32.xlu2 %v4029_v15, %s3575_s3 }
0x18f8   :  { %v1238_v1 = vld [vmem:[#allocation5 + $0x20] sm:$0xff] }
0x18f9   :  { %3195 = vset.pattern.permute.xlu1 %v3578_v30 }
0x18fa   :  { %1320 = vperm.xlu1 %3195, %v3856_v7  }
0x18fb   :  { %1262 = vperm.xlu2 %3192, %v3856_v7  }
0x1902   :  { %3197 = vset.pattern.permute.xlu1 %v3576_v54  ;;  %v1206_v54 = vpop.permute.xlu1 %1205 }
0x1903   :  { %3194 = vset.pattern.permute.xlu2 %v3577_v11  ;;  %1274 = vperm.xlu1 %3197, %v3860_v9  }
0x1904   :  { %1215 = vperm.xlu2 %3194, %v3860_v9  }
0x190c   :  { %3196 = vset.pattern.permute.xlu2 %v3578_v30  ;;  %v1267_v30 = vpop.permute.xlu0 %1266 }
0x190d   :  { %1324 = vperm.xlu2 %3196, %v3854_v6  }
0x1914   :  { %v1271_v5 = vpop.permute.xlu0 %1270 }
0x1915   :  { %1328 = vperm.xlu2 %3196, %v3858_v8   ;;  %v1281_v8 = vmul.f32 %v1267_v30, %v4147_v28 }
0x191c   :  { %v1333_v0 = vpop.permute.xlu0 %1332 }
0x193d   :  { %v4164_v25 = vpop.permute.xlu2 %1999 }
0x193e   :  { %2965 = vmatmul.msk.bf16.vlgmr.msrb.gmra.mxu3 %vm301_vm1, %v4164_v25 }
0x1945   :  { %v1004_v7 = vpop.permute.xlu2 %1003 }
0x1946   :  { %1007 = vst.msk [vmem:[#allocation3 + $0x28] sm:$0xff] %vm301_vm1, %v1004_v7 }
0x194d   :  { %v1085_v11 = vpop.permute.xlu2 %1084  ;;  %v1247_v15 = vld [vmem:[#allocation3 + $0x28] sm:$0xff] }
0x194e   :  { %1088 = vst.msk [vmem:[#allocation3 + $0x30] sm:$0xff] %vm301_vm1, %v1085_v11  ;;  %v1223_v9 = vmul.f32 %v1247_v15, %v1206_v54  ;;  %v1282_v34 = vmul.f32 %v1271_v5, %v1247_v15  ;;  %v1340_v48 = vmul.f32 %v1333_v0, %v1247_v15  ;;  %v4221_v0 = vld [vmem:[%s4357_s12] ss:$0 sm:$0xff] }
0x1950   :  { %1231 = vst.msk [vmem:[#allocation5 + $0x28] sm:$0xff] %vm301_vm1, %v1223_v9 }
0x1955   :  { %v1263_v6 = vpop.permute.xlu2 %1262  ;;  %v1176_v61 = vld [vmem:[#allocation3 + $0x30] sm:$0xff] }
0x1956   :  { %v1280_v62 = vmul.f32 %v1263_v6, %v4075_v2 }
0x1957   :  { %v1239_v10 = vld [vmem:[#allocation5 + $0x28] sm:$0xff] }
0x1958   :  { %v1287_v57 = vadd.f32 %v1280_v62, %v1238_v1  ;;  %v1288_v12 = vadd.f32 %v1281_v8, %v1239_v10 }
0x195a   :  { %1294 = vst.msk [vmem:[#allocation5 + $0x20] sm:$0xff] %vm301_vm1, %v1287_v57 }
0x195b   :  { %v1166_v14 = vpop.permute.xlu1 %1165  ;;  %1295 = vst.msk [vmem:[#allocation5 + $0x28] sm:$0xff] %vm301_vm1, %v1288_v12 }
0x195c   :  { %1169 = vst.msk [vmem:[#allocation3 + $0x38] sm:$0xff] %vm301_vm1, %v1166_v14 }
0x195e   :  { %v1216_v16 = vpop.permute.xlu2 %1215 }
0x1961   :  { %v1301_v36 = vld [vmem:[#allocation5 + $0x20] sm:$0xff] }
0x1962   :  { %v1302_v31 = vld [vmem:[#allocation5 + $0x28] sm:$0xff] }
0x1963   :  { %v1177_v17 = vld [vmem:[#allocation3 + $0x38] sm:$0xff]  ;;  %v1211_v13 = vpop.permute.xlu1 %1210 }
0x1964   :  { %v1225_v22 = vmul.f32 %v1216_v16, %v1177_v17  ;;  %v1224_v24 = vmul.f32 %v1211_v13, %v1176_v61 }
0x1966   :  { %1233 = vst.msk [vmem:[#allocation5 + $0x38] sm:$0xff] %vm301_vm1, %v1225_v22 }
0x1967   :  { %1232 = vst.msk [vmem:[#allocation5 + $0x30] sm:$0xff] %vm301_vm1, %v1224_v24  ;;  %v1325_v27 = vpop.permute.xlu2 %1324 }
0x1968   :  { %v1338_v29 = vmul.f32 %v1325_v27, %v4075_v2 }
0x196a   :  { %v1344_v32 = vadd.f32 %v1338_v29, %v1302_v31 }
0x196c   :  { %1350 = vst.msk [vmem:[#allocation5 + $0x28] sm:$0xff] %vm301_vm1, %v1344_v32  ;;  %v1321_v33 = vpop.permute.xlu1 %1320 }
0x196d   :  { %v1337_v35 = vmul.f32 %v1321_v33, %v4081_v19  ;;  %v1241_v63 = vld [vmem:[#allocation5 + $0x38] sm:$0xff] }
0x196e   :  { %v1240_v4 = vld [vmem:[#allocation5 + $0x30] sm:$0xff] }
0x196f   :  { %v1289_v39 = vadd.f32 %v1282_v34, %v1240_v4  ;;  %v1343_v40 = vadd.f32 %v1337_v35, %v1301_v36  ;;  %v1329_v2 = vpop.permute.xlu2 %1328  ;;  %v3144_v35 = vld [vmem:[#allocation19 + $0x8] sm:$0xff]  ;;  %v3148_v4 = vld [vmem:[#allocation18 + $0x8] sm:$0xff]  ;;  %v3143_v36 = vld [vmem:[#allocation19] sm:$0xff] }
0x1970   :  { %v1339_v44 = vmul.f32 %v1329_v2, %v4147_v28  ;;  %2167 = vmatpush.bf16.msra.mxu2 %v3144_v35  ;;  %2204 = vmatpush.bf16.msra.mxu3 %v3148_v4 }
0x1971   :  { %1296 = vst.msk [vmem:[#allocation5 + $0x30] sm:$0xff] %vm301_vm1, %v1289_v39 }
0x1972   :  { %1349 = vst.msk [vmem:[#allocation5 + $0x20] sm:$0xff] %vm301_vm1, %v1343_v40 }
0x1973   :  { %v1358_v47 = vld [vmem:[#allocation5 + $0x28] sm:$0xff] }
0x1974   :  { %2168 = vmatpush.bf16.msra.mxu2 %v3143_v36  ;;  %2205 = vmatpush.bf16.msra.mxu3 %v3147_v38 }
0x1975   :  { %v1275_v42 = vpop.permute.xlu1 %1274 }
0x1976   :  { %v1283_v43 = vmul.f32 %v1275_v42, %v1176_v61  ;;  %v3145_v42 = vld [vmem:[#allocation16] sm:$0xff] }
0x1978   :  { %v1303_v45 = vld [vmem:[#allocation5 + $0x30] sm:$0xff]  ;;  %v1290_v46 = vadd.f32 %v1283_v43, %v1241_v63 }
0x1979   :  { %v1345_v18 = vadd.f32 %v1339_v44, %v1303_v45  ;;  %v1357_v19 = vld [vmem:[#allocation5 + $0x20] sm:$0xff] }
0x197a   :  { %1297 = vst.msk [vmem:[#allocation5 + $0x38] sm:$0xff] %vm301_vm1, %v1290_v46  ;;  %v1363_v49 = vpack.c.bf16 %v1358_v47, %v1357_v19  ;;  %v3211_v44 = vld [vmem:[%s4364_s19] ss:$0 sm:$0xff] }
0x197b   :  { %1351 = vst.msk [vmem:[#allocation5 + $0x30] sm:$0xff] %vm301_vm1, %v1345_v18 }
0x197c   :  { %2853 = vmatmul.msk.bf16.gmra.mxu0 %vm301_vm1, %v1363_v49 }
0x1981   :  { %v1304_v53 = vld [vmem:[#allocation5 + $0x38] sm:$0xff] }
0x1982   :  { %v1346_v20 = vadd.f32 %v1340_v48, %v1304_v53  ;;  %v1359_v41 = vld [vmem:[#allocation5 + $0x30] sm:$0xff] }
0x1984   :  { %1352 = vst.msk [vmem:[#allocation5 + $0x38] sm:$0xff] %vm301_vm1, %v1346_v20 }
0x198b   :  { %v1360_v51 = vld [vmem:[#allocation5 + $0x38] sm:$0xff] }
0x198c   :  { %v1364_v37 = vpack.c.bf16 %v1360_v51, %v1359_v41 }
0x198e   :  { %2854 = vmatmul.msk.bf16.gmra.mxu0 %vm301_vm1, %v1364_v37 }
0x199e   :  { %2974 = vmatmul.msk.bf16.vlgmr.msra.gmra.mxu0 %vm301_vm1, %v4164_v25 }
0x19c1   :  { %v2025_v58 = vpop.f32.mrf.mxu3 }
0x19c2   :  { %v2026_v21 = vadd.f32 %v3210_v56, %v2025_v58 }
0x19c4   :  { %v2029_v28 = vmax.f32 %v2026_v21, 0.0 }
0x19c6   :  { %2031 = vst.msk [vmem:[#allocation6 + $0x18] sm:$0xff] %vm301_vm1, %v2029_v28  ;;  %v2032_v59 = vpack.c.bf16 %v2029_v28, %v2029_v28 }
0x19c8   :  { %2983 = vmatmul.msk.bf16.vlgmr.msra.gmra.mxu1 %vm301_vm1, %v2032_v59 }
0x19c9   :  { %v2027_v60 = vpop.f32.mrf.mxu3 }
0x19f9   :  { %v1416_v50 = vpop.f32.mrf.mxu0 }
0x19fa   :  { %v1417_v30 = vadd.f32 %v4006_v55, %v1416_v50 }
0x1a01   :  { %v4196_v7 = vpop.f32.mrf.mxu0 }
0x1a02   :  { %v1419_v48 = vadd.f32 %v4221_v0, %v4196_v7 }
0x1a0b   :  { %v4198_v54 = vpop.f32.mrf.mxu0 }
0x1a0c   :  { %v1422_v4 = vadd.f32 %v4221_v0, %v4198_v54 }
0x1a13   :  { %v4200_v11 = vpop.f32.mrf.mxu0 }
0x1a1b   :  { %v2062_v25 = vpop.f32.mrf.mxu0 }
0x1a23   :  { %v2064_v15 = vpop.f32.mrf.mxu0 }
0x1a45   :  { %v2090_v9 = vpop.f32.mrf.mxu1 }
0x1a46   :  { %v2091_v6 = vadd.f32 %v2090_v9, %v2062_v25 }
0x1a48   :  { %v2096_v8 = vadd.f32 %v2091_v6, %v1417_v30 }
0x1a4a   :  { %3330 = vtanh.f32 %v2096_v8  ;;  %v2984_v10 = vmul.f32 -1.442695, %v2096_v8 }
0x1a4c   :  { %3332 = vpow2.f32 %v2984_v10 }
0x1a4d   :  { %v2092_v62 = vpop.f32.mrf.mxu1 }
0x1a50   :  { %v3331_v1 = vpop.eup %3330 }
0x1a51   :  { %2119 = vrot.lane.b32.xlu1 %v3331_v1, %s3568_s5 }
0x1a52   :  { %v3333_v57 = vpop.eup %3332 }
0x1a53   :  { %v2100_v12 = vadd.f32 1.0, %v3333_v57  ;;  %v3150_v57 = vld [vmem:[#allocation19 + $0x8] sm:$0xff] }
0x1a54   :  { %2312 = vmatpush.bf16.msrb.mxu1 %v3150_v57 }
0x1a55   :  { %3334 = vrcp.f32 %v2100_v12  ;;  %v2112_v22 = vand.u32 2147483648, %v2100_v12  ;;  %vm2106_vm7 = vweird.f32 %v2100_v12  ;;  %v2110_v55 = vand.u32 2147483647, %v2100_v12 }
0x1a57   :  { %v2113_v3 = vor.u32 1.1754944e-38, %v2112_v22  ;;  %vm2111_vm9 = vcmp.eq.f32.partialorder %v2110_v55, 8.507059e+37  ;;  %v3152_v22 = vld [vmem:[#allocation16 + $0x8] sm:$0xff]  ;;  %v3151_v55 = vld [vmem:[#allocation16] sm:$0xff] }
0x1a58   :  { %2377 = vmatpush.bf16.msrb.mxu3 %v3152_v22 }
0x1a5b   :  { %v3335_v14 = vpop.eup %3334 }
0x1a5c   :  { %v2102_v16 = vmul.f32 %v3335_v14, %v2100_v12  ;;  %vm2107_vm6 = vweird.f32 %v3335_v14  ;;  %v3154_v12 = vld [vmem:[#allocation18 + $0x8] sm:$0xff]  ;;  %2378 = vmatpush.bf16.msrb.mxu3 %v3151_v55 }
0x1a5d   :  { %vm2108_vm8 = vmor %vm2106_vm7, %vm2107_vm6  ;;  %2349 = vmatpush.bf16.msrb.mxu2 %v3154_v12 }
0x1a5e   :  { %v2103_v17 = vsub.f32 1.0, %v2102_v16  ;;  %v3153_v16 = vld [vmem:[#allocation18] sm:$0xff] }
0x1a60   :  { %v2104_v13 = vmul.f32 %v3335_v14, %v2103_v17 }
0x1a61   :  { %2350 = vmatpush.bf16.msrb.mxu2 %v3153_v16 }
0x1a62   :  { %v2105_v61 = vadd.f32 %v3335_v14, %v2104_v13 }
0x1a64   :  { %v2109_v24 = vsel %vm2108_vm8, %v3335_v14, %v2105_v61  ;;  %v3149_v14 = vld [vmem:[#allocation19] sm:$0xff] }
0x1a65   :  { %v2114_v29 = vsel %vm2111_vm9, %v2113_v3, %v2109_v24  ;;  %2313 = vmatpush.bf16.msrb.mxu1 %v3149_v14  ;;  %v3212_v3 = vld [vmem:[%s4364_s19] ss:$0 sm:$0xff] }
0x1a66   :  { %v2117_v32 = vmul.f32 %v2114_v29, %v4130_v52  ;;  %v3146_v52 = vld [vmem:[#allocation16 + $0x8] sm:$0xff]  ;;  %v3213_v14 = vld [vmem:[%s4364_s19] ss:$0 sm:$0xff] }
0x1a67   :  { %2232 = vmatpush.bf16.msrb.mxu0 %v3146_v52 }
0x1a6b   :  { %2233 = vmatpush.bf16.msrb.mxu0 %v3145_v42 }
0x1ac3   :  { %v2120_v27 = vpop.permute.xlu1 %2119 }
0x1ac4   :  { %v2122_v31 = vmul.f32 %v2120_v27, %v2114_v29 }
0x1ac6   :  { %2124 = vrot.lane.b32.xlu2 %v2122_v31, %s3575_s3 }
0x1b20   :  { %v2125_v5 = vpop.permute.xlu2 %2124 }
0x1b21   :  { %v4206_v33 = vadd.f32 %v2125_v5, %v2117_v32 }
0x1b23   :  { %3336 = vtanh.f32 %v4206_v33 }
0x1b29   :  { %v3337_v34 = vpop.eup %3336 }
0x1b2a   :  { %2130 = vrot.lane.b32.xlu1 %v3337_v34, %s3568_s5 }
0x1b9c   :  { %v2131_v39 = vpop.permute.xlu1 %2130 }
0x1b9d   :  { %v2133_v40 = vmul.f32 %v2131_v39, %v2114_v29 }
0x1b9f   :  { %v2134_v2 = vpack.c.bf16 %v2133_v40, %v2133_v40 }
0x1ba1   :  { %2144 = vrot.lane.b32.xlu2 %v2134_v2, %s3575_s3 }
0x1bfb   :  { %v2145_v43 = vpop.permute.xlu2 %2144 }
0x1bfc   :  { %2993 = vmatmul.msk.bf16.vlgmr.msra.gmra.mxu2 %vm301_vm1, %v2145_v43  ;;  %3002 = vmatmul.msk.bf16.vlgmr.msra.gmra.mxu3 %vm301_vm1, %v2145_v43 }
0x1c7f   :  { %v2170_v63 = vpop.f32.mrf.mxu2  ;;  %v2207_v45 = vpop.f32.mrf.mxu3 }
0x1c80   :  { %v2171_v46 = vadd.f32 %v3211_v44, %v2170_v63 }
0x1c82   :  { %v2174_v18 = vmax.f32 %v2171_v46, 0.0 }
0x1c84   :  { %2176 = vst.msk [vmem:[#allocation6 + $0x20] sm:$0xff] %vm301_vm1, %v2174_v18  ;;  %v2177_v19 = vpack.c.bf16 %v2174_v18, %v2174_v18 }
0x1c86   :  { %3011 = vmatmul.msk.bf16.vlgmr.msrb.gmra.mxu0 %vm301_vm1, %v2177_v19 }
0x1c87   :  { %v2172_v47 = vpop.f32.mrf.mxu2  ;;  %v2209_v49 = vpop.f32.mrf.mxu3 }
0x1c8b   :  { %v2616_v57 = vld [vmem:[#allocation6 + $0x20] sm:$0xff] }
0x1d03   :  { %v2235_v26 = vpop.f32.mrf.mxu0 }
0x1d04   :  { %v2236_v23 = vadd.f32 %v2235_v26, %v2207_v45 }
0x1d06   :  { %v2241_v53 = vadd.f32 %v2236_v23, %v1419_v48 }
0x1d08   :  { %3338 = vtanh.f32 %v2241_v53  ;;  %v3012_v51 = vmul.f32 -1.442695, %v2241_v53 }
0x1d0a   :  { %3340 = vpow2.f32 %v3012_v51  ;;  %v3156_v51 = vld [vmem:[#allocation19 + $0x8] sm:$0xff] }
0x1d0b   :  { %v2237_v20 = vpop.f32.mrf.mxu0  ;;  %2457 = vmatpush.bf16.msra.mxu0 %v3156_v51 }
0x1d0e   :  { %v3339_v41 = vpop.eup %3338 }
0x1d0f   :  { %2264 = vrot.lane.b32.xlu0 %v3339_v41, %s3568_s5 }
0x1d10   :  { %v3341_v37 = vpop.eup %3340 }
0x1d11   :  { %v2245_v56 = vadd.f32 1.0, %v3341_v37  ;;  %v3160_v37 = vld [vmem:[#allocation18 + $0x8] sm:$0xff] }
0x1d12   :  { %2494 = vmatpush.bf16.msra.mxu1 %v3160_v37 }
0x1d13   :  { %3342 = vrcp.f32 %v2245_v56  ;;  %v2257_v50 = vand.u32 2147483648, %v2245_v56  ;;  %vm2251_vm11 = vweird.f32 %v2245_v56  ;;  %v2255_v7 = vand.u32 2147483647, %v2245_v56 }
0x1d15   :  { %v2258_v15 = vor.u32 1.1754944e-38, %v2257_v50  ;;  %vm2256_vm13 = vcmp.eq.f32.partialorder %v2255_v7, 8.507059e+37  ;;  %v3163_v50 = vld [vmem:[%s4365_s20] sm:$0xff] }
0x1d19   :  { %v3343_v58 = vpop.eup %3342 }
0x1d1a   :  { %v2247_v21 = vmul.f32 %v3343_v58, %v2245_v56  ;;  %vm2252_vm10 = vweird.f32 %v3343_v58  ;;  %v3155_v56 = vld [vmem:[#allocation19] sm:$0xff] }
0x1d1b   :  { %vm2253_vm12 = vmor %vm2251_vm11, %vm2252_vm10  ;;  %2458 = vmatpush.bf16.msra.mxu0 %v3155_v56 }
0x1d1c   :  { %v2248_v28 = vsub.f32 1.0, %v2247_v21 }
0x1d1e   :  { %v2249_v59 = vmul.f32 %v3343_v58, %v2248_v28 }
0x1d20   :  { %v2250_v60 = vadd.f32 %v3343_v58, %v2249_v59 }
0x1d22   :  { %v2254_v25 = vsel %vm2253_vm12, %v3343_v58, %v2250_v60  ;;  %v3159_v58 = vld [vmem:[#allocation18] sm:$0xff] }
0x1d23   :  { %v2259_v30 = vsel %vm2256_vm13, %v2258_v15, %v2254_v25  ;;  %2495 = vmatpush.bf16.msra.mxu1 %v3159_v58  ;;  %v3164_v60 = vld [vmem:[%s4365_s20 + $0x8] sm:$0xff]  ;;  %v2612_v15 = vld [vmem:[#allocation6] sm:$0xff] }
0x1d24   :  { %v2262_v8 = vmul.f32 %v2259_v30, %v4206_v33  ;;  %2662 = vmatpush.bf16.msrb.mxu0 %v3164_v60  ;;  %v2613_v25 = vld [vmem:[#allocation6 + $0x8] sm:$0xff] }
0x1d28   :  { %2663 = vmatpush.bf16.msrb.mxu0 %v3163_v50 }
0x1d81   :  { %v2265_v9 = vpop.permute.xlu0 %2264 }
0x1d82   :  { %v2267_v6 = vmul.f32 %v2265_v9, %v2259_v30  ;;  %v2620_v9 = vpack.c.bf16 %v2613_v25, %v2612_v15 }
0x1d84   :  { %2269 = vrot.lane.b32.xlu1 %v2267_v6, %s3575_s3  ;;  %v3157_v6 = vld [vmem:[#allocation16] sm:$0xff] }
0x1df6   :  { %v2270_v62 = vpop.permute.xlu1 %2269 }
0x1df7   :  { %v4228_v1 = vadd.f32 %v2270_v62, %v2262_v8  ;;  %v2615_v8 = vld [vmem:[#allocation6 + $0x18] sm:$0xff]  ;;  %v2614_v62 = vld [vmem:[#allocation6 + $0x10] sm:$0xff] }
0x1df9   :  { %3344 = vtanh.f32 %v4228_v1 }
0x1dff   :  { %v3345_v10 = vpop.eup %3344 }
0x1e00   :  { %2275 = vrot.lane.b32.xlu2 %v3345_v10, %s3568_s5 }
0x1e5a   :  { %v2276_v17 = vpop.permute.xlu2 %2275 }
0x1e5b   :  { %v2278_v13 = vmul.f32 %v2276_v17, %v2259_v30  ;;  %v3158_v30 = vld [vmem:[#allocation16 + $0x8] sm:$0xff] }
0x1e5c   :  { %2522 = vmatpush.bf16.msra.mxu2 %v3158_v30 }
0x1e5d   :  { %v2279_v61 = vpack.c.bf16 %v2278_v13, %v2278_v13 }
0x1e5f   :  { %2289 = vrot.lane.b32.xlu0 %v2279_v61, %s3575_s3 }
0x1e60   :  { %2523 = vmatpush.bf16.msra.mxu2 %v3157_v6 }
0x1ed1   :  { %v2290_v24 = vpop.permute.xlu0 %2289 }
0x1ed2   :  { %3021 = vmatmul.msk.bf16.vlgmr.msrb.gmra.mxu1 %vm301_vm1, %v2290_v24  ;;  %3030 = vmatmul.msk.bf16.vlgmr.msrb.gmra.mxu2 %vm301_vm1, %v2290_v24 }
0x1f4f   :  { %v2315_v27 = vpop.f32.mrf.mxu1 }
0x1f50   :  { %v2316_v29 = vadd.f32 %v3212_v3, %v2315_v27  ;;  %v4266_v3 = vld [vmem:[#allocation7] ss:$0 sm:$0xff] }
0x1f52   :  { %v2319_v31 = vmax.f32 %v2316_v29, 0.0  ;;  %v2685_v29 = vld [vmem:[%s4385_s11] sm:$0xff] }
0x1f54   :  { %2321 = vst.msk [vmem:[#allocation6 + $0x28] sm:$0xff] %vm301_vm1, %v2319_v31  ;;  %v2322_v32 = vpack.c.bf16 %v2319_v31, %v2319_v31 }
0x1f55   :  { %v2352_v5 = vpop.f32.mrf.mxu2 }
0x1f56   :  { %3039 = vmatmul.msk.bf16.vlgmr.msrb.gmra.mxu3 %vm301_vm1, %v2322_v32 }
0x1f57   :  { %v2317_v33 = vpop.f32.mrf.mxu1 }
0x1f58   :  { %v2686_v33 = vld [vmem:[%s4385_s11 + $0x8] sm:$0xff] }
0x1f5b   :  { %v2617_v10 = vld [vmem:[#allocation6 + $0x28] sm:$0xff] }
0x1f5c   :  { %v2622_v12 = vpack.c.bf16 %v2617_v10, %v2616_v57 }
0x1f5d   :  { %v2354_v34 = vpop.f32.mrf.mxu2 }
0x1fd9   :  { %v2380_v35 = vpop.f32.mrf.mxu3 }
0x1fda   :  { %v2381_v36 = vadd.f32 %v2380_v35, %v2352_v5 }
0x1fdc   :  { %v2386_v38 = vadd.f32 %v2381_v36, %v1422_v4  ;;  %v2687_v36 = vld [vmem:[%s4385_s11 + $0x10] sm:$0xff] }
0x1fde   :  { %3346 = vtanh.f32 %v2386_v38  ;;  %v3040_v2 = vmul.f32 -1.442695, %v2386_v38 }
0x1fe0   :  { %3348 = vpow2.f32 %v3040_v2  ;;  %v2688_v2 = vld [vmem:[%s4385_s11 + $0x18] sm:$0xff] }
0x1fe1   :  { %v2382_v39 = vpop.f32.mrf.mxu3 }
0x1fe4   :  { %v3347_v40 = vpop.eup %3346 }
0x1fe5   :  { %2409 = vrot.lane.b32.xlu1 %v3347_v40, %s3568_s5 }
0x1fe6   :  { %v3349_v52 = vpop.eup %3348 }
0x1fe7   :  { %v2390_v42 = vadd.f32 1.0, %v3349_v52 }
0x1fe9   :  { %3350 = vrcp.f32 %v2390_v42  ;;  %v2402_v18 = vand.u32 2147483648, %v2390_v42  ;;  %vm2396_vm15 = vweird.f32 %v2390_v42  ;;  %v2400_v54 = vand.u32 2147483647, %v2390_v42 }
0x1feb   :  { %v2403_v47 = vor.u32 1.1754944e-38, %v2402_v18  ;;  %vm2401_vm2 = vcmp.eq.f32.partialorder %v2400_v54, 8.507059e+37  ;;  %v2690_v18 = vld [vmem:[%s4385_s11 + $0x28] sm:$0xff] }
0x1fef   :  { %v3351_v43 = vpop.eup %3350 }
0x1ff0   :  { %v2392_v44 = vmul.f32 %v3351_v43, %v2390_v42  ;;  %vm2397_vm14 = vweird.f32 %v3351_v43 }
0x1ff1   :  { %vm2398_vm0 = vmor %vm2396_vm15, %vm2397_vm14 }
0x1ff2   :  { %v2393_v63 = vsub.f32 1.0, %v2392_v44  ;;  %v2689_v44 = vld [vmem:[%s4385_s11 + $0x20] sm:$0xff] }
0x1ff4   :  { %v2394_v45 = vmul.f32 %v3351_v43, %v2393_v63 }
0x1ff6   :  { %v2395_v46 = vadd.f32 %v3351_v43, %v2394_v45 }
0x1ff8   :  { %v2399_v19 = vsel %vm2398_vm0, %v3351_v43, %v2395_v46 }
0x1ff9   :  { %v2404_v26 = vsel %vm2401_vm2, %v2403_v47, %v2399_v19 }
0x1ffa   :  { %v2407_v23 = vmul.f32 %v2404_v26, %v4228_v1  ;;  %v2621_v1 = vpack.c.bf16 %v2615_v8, %v2614_v62  ;;  %v3162_v62 = vld [vmem:[#allocation19 + $0x8] sm:$0xff] }
0x1ffb   :  { %2602 = vmatpush.bf16.msra.mxu3 %v3162_v62 }
0x2057   :  { %v2410_v49 = vpop.permute.xlu1 %2409 }
0x2058   :  { %v2412_v48 = vmul.f32 %v2410_v49, %v2404_v26  ;;  %v1424_v49 = vadd.f32 %v4221_v0, %v4200_v11 }
0x205a   :  { %2414 = vrot.lane.b32.xlu2 %v2412_v48, %s3575_s3 }
0x20b4   :  { %v2415_v53 = vpop.permute.xlu2 %2414 }
0x20b5   :  { %v4245_v20 = vadd.f32 %v2415_v53, %v2407_v23 }
0x20b7   :  { %3352 = vtanh.f32 %v4245_v20 }
0x20bd   :  { %v3353_v41 = vpop.eup %3352 }
0x20be   :  { %2420 = vrot.lane.b32.xlu0 %v3353_v41, %s3568_s5 }
0x2130   :  { %v2421_v21 = vpop.permute.xlu0 %2420 }
0x2131   :  { %v2423_v28 = vmul.f32 %v2421_v21, %v2404_v26 }
0x2133   :  { %v2424_v59 = vpack.c.bf16 %v2423_v28, %v2423_v28 }
0x2135   :  { %2434 = vrot.lane.b32.xlu1 %v2424_v59, %s3575_s3 }
0x21a7   :  { %v2435_v7 = vpop.permute.xlu1 %2434 }
0x21a8   :  { %3049 = vmatmul.msk.bf16.vlgmr.msra.gmra.mxu0 %vm301_vm1, %v2435_v7  ;;  %3058 = vmatmul.msk.bf16.vlgmr.msra.gmra.mxu1 %vm301_vm1, %v2435_v7 }
0x21b8   :  { %3086 = vmatmul.msk.bf16.vlgmr.msrb.gmra.mxu0 %vm301_vm1, %v2620_v9 }
0x21c8   :  { %3087 = vmatmul.msk.bf16.gmra.mxu0 %vm301_vm1, %v2621_v1  ;;  %v3161_v1 = vld [vmem:[#allocation19] sm:$0xff] }
0x21c9   :  { %2603 = vmatpush.bf16.msra.mxu3 %v3161_v1 }
0x21d8   :  { %3088 = vmatmul.msk.bf16.gmra.mxu0 %vm301_vm1, %v2622_v12 }
0x2225   :  { %v2460_v16 = vpop.f32.mrf.mxu0  ;;  %v2497_v17 = vpop.f32.mrf.mxu1 }
0x2226   :  { %v2461_v13 = vadd.f32 %v3213_v14, %v2460_v16 }
0x2228   :  { %v2464_v61 = vmax.f32 %v2461_v13, 0.0 }
0x222a   :  { %2466 = vst.msk [vmem:[#allocation6 + $0x30] sm:$0xff] %vm301_vm1, %v2464_v61  ;;  %v2467_v22 = vpack.c.bf16 %v2464_v61, %v2464_v61 }
0x222c   :  { %3067 = vmatmul.msk.bf16.vlgmr.msra.gmra.mxu2 %vm301_vm1, %v2467_v22 }
0x222d   :  { %v2462_v55 = vpop.f32.mrf.mxu0  ;;  %v2499_v24 = vpop.f32.mrf.mxu1 }
0x2231   :  { %v2618_v22 = vld [vmem:[#allocation6 + $0x30] sm:$0xff] }
0x2235   :  { %v2665_v27 = vpop.f32.mrf.mxu0 }
0x2236   :  { %v2666_v31 = vadd.f32 %v4266_v3, %v2665_v27 }
0x2238   :  { %v2693_v32 = vmul.f32 %v2685_v29, %v2666_v31  ;;  %v2691_v29 = vld [vmem:[%s4385_s11 + $0x30] sm:$0xff] }
0x223a   :  { %2702 = vst.msk [vmem:[%s4367_s22] sm:$0xff] %vm2701_vm3, %v2693_v32 }
0x223d   :  { %v2667_v5 = vpop.f32.mrf.mxu0 }
0x223e   :  { %v2668_v34 = vadd.f32 %v4266_v3, %v2667_v5 }
0x2240   :  { %v2694_v35 = vmul.f32 %v2686_v33, %v2668_v34  ;;  %v2692_v33 = vld [vmem:[%s4385_s11 + $0x38] sm:$0xff] }
0x2242   :  { %2703 = vst.msk [vmem:[%s4367_s22 + $0x8] sm:$0xff] %vm2701_vm3, %v2694_v35 }
0x2245   :  { %v2670_v4 = vpop.f32.mrf.mxu0 }
0x2246   :  { %v2671_v38 = vadd.f32 %v4266_v3, %v2670_v4 }
0x2248   :  { %v2695_v39 = vmul.f32 %v2687_v36, %v2671_v38 }
0x224a   :  { %2704 = vst.msk [vmem:[%s4367_s22 + $0x10] sm:$0xff] %vm2701_vm3, %v2695_v39 }
0x224d   :  { %v2672_v40 = vpop.f32.mrf.mxu0 }
0x224e   :  { %v2673_v52 = vadd.f32 %v4266_v3, %v2672_v40 }
0x2250   :  { %v2696_v42 = vmul.f32 %v2688_v2, %v2673_v52 }
0x2252   :  { %2705 = vst.msk [vmem:[%s4367_s22 + $0x18] sm:$0xff] %vm2701_vm3, %v2696_v42 }
0x2255   :  { %v2675_v43 = vpop.f32.mrf.mxu0 }
0x2256   :  { %v2676_v63 = vadd.f32 %v4266_v3, %v2675_v43 }
0x2258   :  { %v2697_v45 = vmul.f32 %v2689_v44, %v2676_v63 }
0x225a   :  { %2706 = vst.msk [vmem:[%s4367_s22 + $0x20] sm:$0xff] %vm2701_vm3, %v2697_v45 }
0x225d   :  { %v2677_v46 = vpop.f32.mrf.mxu0 }
0x225e   :  { %v2678_v54 = vadd.f32 %v4266_v3, %v2677_v46 }
0x2260   :  { %v2698_v19 = vmul.f32 %v2690_v18, %v2678_v54 }
0x2262   :  { %2707 = vst.msk [vmem:[%s4367_s22 + $0x28] sm:$0xff] %vm2701_vm3, %v2698_v19 }
0x22af   :  { %v2525_v47 = vpop.f32.mrf.mxu2 }
0x22b0   :  { %v2526_v26 = vadd.f32 %v2525_v47, %v2497_v17 }
0x22b2   :  { %v2531_v48 = vadd.f32 %v2526_v26, %v1424_v49 }
0x22b4   :  { %3354 = vtanh.f32 %v2531_v48  ;;  %v3068_v41 = vmul.f32 -1.442695, %v2531_v48 }
0x22b6   :  { %3356 = vpow2.f32 %v3068_v41 }
0x22b7   :  { %v2527_v23 = vpop.f32.mrf.mxu2 }
0x22ba   :  { %v3355_v53 = vpop.eup %3354 }
0x22bb   :  { %2554 = vrot.lane.b32.xlu2 %v3355_v53, %s3568_s5 }
0x22bc   :  { %v3357_v51 = vpop.eup %3356 }
0x22bd   :  { %v2535_v37 = vadd.f32 1.0, %v3357_v51 }
0x22bf   :  { %3358 = vrcp.f32 %v2535_v37  ;;  %v2547_v60 = vand.u32 2147483648, %v2535_v37  ;;  %vm2541_vm5 = vweird.f32 %v2535_v37  ;;  %v2545_v11 = vand.u32 2147483647, %v2535_v37 }
0x22c1   :  { %v2548_v50 = vor.u32 1.1754944e-38, %v2547_v60  ;;  %vm2546_vm7 = vcmp.eq.f32.partialorder %v2545_v11, 8.507059e+37 }
0x22c5   :  { %v3359_v56 = vpop.eup %3358 }
0x22c6   :  { %v2537_v58 = vmul.f32 %v3359_v56, %v2535_v37  ;;  %vm2542_vm4 = vweird.f32 %v3359_v56 }
0x22c7   :  { %vm2543_vm6 = vmor %vm2541_vm5, %vm2542_vm4 }
0x22c8   :  { %v2538_v21 = vsub.f32 1.0, %v2537_v58 }
0x22ca   :  { %v2539_v28 = vmul.f32 %v3359_v56, %v2538_v21 }
0x22cc   :  { %v2540_v59 = vadd.f32 %v3359_v56, %v2539_v28 }
0x22ce   :  { %v2544_v0 = vsel %vm2543_vm6, %v3359_v56, %v2540_v59 }
0x22cf   :  { %v2549_v25 = vsel %vm2546_vm7, %v2548_v50, %v2544_v0 }
0x22d0   :  { %v2552_v9 = vmul.f32 %v2549_v25, %v4245_v20  ;;  %v3215_v20 = vld [vmem:[%s4364_s19] ss:$0 sm:$0xff] }
0x2315   :  { %v2555_v7 = vpop.permute.xlu2 %2554 }
0x2316   :  { %v2557_v15 = vmul.f32 %v2555_v7, %v2549_v25 }
0x2318   :  { %2559 = vrot.lane.b32.xlu0 %v2557_v15, %s3575_s3 }
0x238a   :  { %v2560_v30 = vpop.permute.xlu0 %2559 }
0x238b   :  { %v2562_v6 = vadd.f32 %v2560_v30, %v2552_v9 }
0x238d   :  { %3360 = vtanh.f32 %v2562_v6 }
0x2393   :  { %v3361_v8 = vpop.eup %3360 }
0x2394   :  { %2565 = vrot.lane.b32.xlu1 %v3361_v8, %s3568_s5 }
0x2406   :  { %v2566_v10 = vpop.permute.xlu1 %2565 }
0x2407   :  { %v2568_v57 = vmul.f32 %v2566_v10, %v2549_v25 }
0x2409   :  { %v2569_v12 = vpack.c.bf16 %v2568_v57, %v2568_v57 }
0x240b   :  { %2579 = vrot.lane.b32.xlu2 %v2569_v12, %s3575_s3 }
0x2465   :  { %v2580_v14 = vpop.permute.xlu2 %2579 }
0x2466   :  { %3077 = vmatmul.msk.bf16.vlgmr.msra.gmra.mxu3 %vm301_vm1, %v2580_v14 }
0x24e9   :  { %v2605_v16 = vpop.f32.mrf.mxu3 }
0x24ea   :  { %v2606_v17 = vadd.f32 %v3215_v20, %v2605_v16 }
0x24ec   :  { %v2609_v13 = vmax.f32 %v2606_v17, 0.0 }
0x24ee   :  { %2611 = vst.msk [vmem:[#allocation6 + $0x38] sm:$0xff] %vm301_vm1, %v2609_v13 }
0x24f1   :  { %v2607_v61 = vpop.f32.mrf.mxu3 }
0x24f5   :  { %v2619_v55 = vld [vmem:[#allocation6 + $0x38] sm:$0xff] }
0x24f6   :  { %v2623_v24 = vpack.c.bf16 %v2619_v55, %v2618_v22 }
0x24f8   :  { %3089 = vmatmul.msk.bf16.gmra.mxu0 %vm301_vm1, %v2623_v24 }
0x2575   :  { %v2680_v27 = vpop.f32.mrf.mxu0 }
0x2576   :  { %v2681_v31 = vadd.f32 %v4266_v3, %v2680_v27 }
0x2578   :  { %v2699_v32 = vmul.f32 %v2691_v29, %v2681_v31 }
0x257a   :  { %2708 = vst.msk [vmem:[%s4367_s22 + $0x30] sm:$0xff] %vm2701_vm3, %v2699_v32 }
0x257d   :  { %v2682_v5 = vpop.f32.mrf.mxu0 }
0x257e   :  { %v2683_v34 = vadd.f32 %v4266_v3, %v2682_v5 }
0x2580   :  { %v2700_v35 = vmul.f32 %v2692_v33, %v2683_v34 }
0x2582   :  { %2709 = vst.msk [vmem:[%s4367_s22 + $0x38] sm:$0xff] %vm2701_vm3, %v2700_v35 }
0x2583   :  { %2714 = vsyncpa [#allocation9], 1 }
0x2584   :  { %2715 = vsyncpa [#allocation11], 1 }
0x2585   :  { %2716 = vsyncpa [#allocation14], 1 }
0x2586   :  { %2717 = vsyncpa [#allocation17], 1 }
0x2587   :  { %2718 = vsyncpa [#allocation20], 1 }

</bundles_post_ra>
